<compile_context>
chip_gen: v7x
topology: tpu7x:2x2x1
jax: 0.10.0
libtpu: 0.0.40
codegen_flags: <defaults>
</compile_context>

<pallas_src>
import functools

import jax
import jax.numpy as jnp
from jax.experimental import pallas as pl
from jax.experimental.pallas import tpu as pltpu


def _rdb_kernel(*refs, H, W, G0, G, C, kSize):
    """One batch element of RDB: out = LFF(convs(x)) + x.

    Ref layouts (channel-major, spatial flattened onto the 128-wide lane axis):
      refs[0]            x      : (1, G0, H*W)
      refs[1 : 1+C]      w_c    : (kSize*kSize, G, G0 + c*G)  tap-major weights
      refs[1+C]          b      : (C, G, 1)                   conv biases
      refs[2+C]          w_lff  : (G0, G0 + C*G)              1x1 LFF weights
      refs[3+C]          b_lff  : (G0, 1)
      refs[4+C]          out    : (1, G0, H*W)
      refs[5+C]          feats  : VMEM scratch (G0 + C*G, H*W) f32
    """
    x_ref = refs[0]
    w_refs = refs[1:1 + C]
    b_ref = refs[1 + C]
    wlff_ref = refs[2 + C]
    blff_ref = refs[3 + C]
    o_ref = refs[4 + C]
    feats_ref = refs[5 + C]

    HW = H * W
    pad = (kSize - 1) // 2

    # Lane iota -> flat pixel index; column index is a cheap AND for pow2 W.
    lane = jax.lax.broadcasted_iota(jnp.int32, (1, HW), 1)
    col = (lane & (W - 1)) if (W & (W - 1)) == 0 else (lane % W)

    # Precompute the kSize*kSize tap offsets and boundary masks ONCE; they are
    # shared by every conv layer in the block.
    offsets = []
    masks = []
    for kh in range(kSize):
        dh = kh - pad
        for kw in range(kSize):
            dw = kw - pad
            offsets.append(dh * W + dw)
            valid = None
            if dh > 0:                              # row h+dh must be < H
                valid = lane < (H - dh) * W
            elif dh < 0:                            # row h+dh must be >= 0
                valid = lane >= (-dh) * W
            if dw > 0:                              # col w+dw must be < W
                c = col < (W - dw)
                valid = c if valid is None else (valid & c)
            elif dw < 0:                            # col w+dw must be >= 0
                c = col >= (-dw)
                valid = c if valid is None else (valid & c)
            masks.append(valid)

    # Stage the RDB input into channels [0, G0) of the persistent VMEM buffer.
    feats_ref[pl.ds(0, G0), :] = x_ref[0].astype(jnp.float32)

    # C fused RDB_Conv layers: 3x3 conv -> bias -> ReLU, "concat" realized by
    # writing the new G channels right after the existing ones (VMEM only).
    for c in range(C):
        cin = G0 + c * G
        xin = feats_ref[pl.ds(0, cin), :]           # (cin, HW) f32, lane-dense
        acc = jnp.zeros((G, HW), jnp.float32)
        for t, (off, mask) in enumerate(zip(offsets, masks)):
            # patch[:, h*W + w] == xin[:, h+dh, w+dw] (zeros outside image).
            patch = xin if off == 0 else pltpu.roll(xin, (HW - off) % HW, axis=1)
            if mask is not None:
                patch = jnp.where(mask, patch, 0.0)
            # (G, cin) x (cin, HW) -> (G, HW) on the MXU, f32 accumulate.
            acc = acc + jnp.dot(w_refs[c][t], patch,
                                preferred_element_type=jnp.float32)
        acc = acc + b_ref[c]                        # (G, 1) bias, lane broadcast
        feats_ref[pl.ds(cin, G), :] = jnp.maximum(acc, 0.0)

    # LFF 1x1 conv over all G0 + C*G features, then the residual add of x.
    lff = jnp.dot(wlff_ref[...], feats_ref[...],
                  preferred_element_type=jnp.float32)
    lff = lff + blff_ref[...]
    o_ref[0] = (lff + feats_ref[pl.ds(0, G0), :]).astype(o_ref.dtype)


def rdb_forward(x_nchw, conv_weights, conv_biases, lff_weight, lff_bias,
                kSize=3):
    """RDB forward:  LFF(convs(x)) + x.

    x_nchw       : (N, G0, H, W)
    conv_weights : list of C arrays, layer c has shape (G, G0 + c*G, k, k)
    conv_biases  : list of C arrays of shape (G,)
    lff_weight   : (G0, G0 + C*G, 1, 1)   (torch Conv2d layout)
    lff_bias     : (G0,)
    Returns (N, G0, H, W).
    """
    N, G0, H, W = x_nchw.shape
    C = len(conv_weights)
    G = conv_weights[0].shape[0]
    HW = H * W

    # Free reshapes only; all conv math happens inside the kernel.
    x_flat = x_nchw.reshape(N, G0, HW)
    w_taps = [
        jnp.transpose(w, (2, 3, 0, 1)).reshape(kSize * kSize, G, w.shape[1])
        for w in conv_weights
    ]
    b_stack = jnp.stack(conv_biases).reshape(C, G, 1).astype(jnp.float32)
    lff_w2d = lff_weight.reshape(G0, G0 + C * G)
    lff_b2d = lff_bias.reshape(G0, 1).astype(jnp.float32)

    kernel = functools.partial(_rdb_kernel, H=H, W=W, G0=G0, G=G, C=C,
                               kSize=kSize)

    in_specs = [pl.BlockSpec((1, G0, HW), lambda n: (n, 0, 0))]
    for c in range(C):
        cin = G0 + c * G
        # Grid-invariant weight blocks: constant index_map -> fetched once.
        in_specs.append(
            pl.BlockSpec((kSize * kSize, G, cin), lambda n: (0, 0, 0)))
    in_specs.append(pl.BlockSpec((C, G, 1), lambda n: (0, 0, 0)))
    in_specs.append(pl.BlockSpec((G0, G0 + C * G), lambda n: (0, 0)))
    in_specs.append(pl.BlockSpec((G0, 1), lambda n: (0, 0)))

    out_flat = pl.pallas_call(
        kernel,
        out_shape=jax.ShapeDtypeStruct((N, G0, HW), x_nchw.dtype),
        grid_spec=pltpu.PrefetchScalarGridSpec(
            num_scalar_prefetch=0,
            grid=(N,),  # batch axis -> both v7x TensorCores busy for N >= 2
            in_specs=in_specs,
            out_specs=pl.BlockSpec((1, G0, HW), lambda n: (n, 0, 0)),
            scratch_shapes=[pltpu.VMEM((G0 + C * G, HW), jnp.float32)],
        ),
        compiler_params=pltpu.CompilerParams(
            dimension_semantics=("parallel",)),
    )(x_flat, *w_taps, b_stack, lff_w2d, lff_b2d)

    return out_flat.reshape(N, G0, H, W)


def _rdb_reference(x, conv_ws, conv_bs, lff_w, lff_b):
    """Pure-JAX reference of torch RDB.forward (convs -> LFF -> + x)."""
    feats = x
    for w, b in zip(conv_ws, conv_bs):
        y = jax.lax.conv_general_dilated(
            feats, w, (1, 1), "SAME",
            dimension_numbers=("NCHW", "OIHW", "NCHW"),
            precision=jax.lax.Precision.HIGHEST)
        y = jnp.maximum(y + b[None, :, None, None], 0.0)
        feats = jnp.concatenate([feats, y], axis=1)
    lff = jax.lax.conv_general_dilated(
        feats, lff_w, (1, 1), "SAME",
        dimension_numbers=("NCHW", "OIHW", "NCHW"),
        precision=jax.lax.Precision.HIGHEST)
    return lff + lff_b[None, :, None, None] + x


if __name__ == "__main__":
    # Small shapes consistent with RDB(growRate0=G0, growRate=G, nConvLayers=4)
    # (the real model uses G0=96, G=32, C=4; scaled down here).
    N, G0, H, W = 2, 32, 16, 16
    C, G, kSize = 4, 16, 3

    key = jax.random.PRNGKey(0)
    keys = jax.random.split(key, 2 * C + 3)
    x = jax.random.normal(keys[0], (N, G0, H, W), dtype=jnp.float32)

    conv_ws, conv_bs = [], []
    for c in range(C):
        cin = G0 + c * G
        conv_ws.append(
            jax.random.normal(keys[1 + c], (G, cin, kSize, kSize),
                              dtype=jnp.float32) * 0.05)
        conv_bs.append(
            jax.random.normal(keys[1 + C + c], (G,), dtype=jnp.float32) * 0.05)
    lff_w = jax.random.normal(keys[1 + 2 * C], (G0, G0 + C * G, 1, 1),
                              dtype=jnp.float32) * 0.05
    lff_b = jax.random.normal(keys[2 + 2 * C], (G0,), dtype=jnp.float32) * 0.05

    out = rdb_forward(x, conv_ws, conv_bs, lff_w, lff_b, kSize=kSize)
    out = jax.block_until_ready(out)
    assert out.shape == (N, G0, H, W), out.shape

    ref = _rdb_reference(x, conv_ws, conv_bs, lff_w, lff_b)
    max_err = float(jnp.max(jnp.abs(out - ref)))
    # Tolerance covers TPU matmul default-precision differences across the
    # 5 chained convs; real bugs (wrong tap / mask / concat) give O(1) errors.
    assert jnp.allclose(out, ref, rtol=2e-2, atol=2e-2), max_err

    print("KERNEL_OK")
</pallas_src>

<mosaic_0001>
module attributes {stable_mosaic.version = 11 : i64} {
  func.func @_rdb_kernel(%arg0: i32, %arg1: memref<1x32x256xf32, #tpu.memory_space<vmem>>, %arg2: memref<9x16x32xf32, #tpu.memory_space<vmem>>, %arg3: memref<9x16x48xf32, #tpu.memory_space<vmem>>, %arg4: memref<9x16x64xf32, #tpu.memory_space<vmem>>, %arg5: memref<9x16x80xf32, #tpu.memory_space<vmem>>, %arg6: memref<4x16x1xf32, #tpu.memory_space<vmem>>, %arg7: memref<32x96xf32, #tpu.memory_space<vmem>>, %arg8: memref<32x1xf32, #tpu.memory_space<vmem>>, %arg9: memref<1x32x256xf32, #tpu.memory_space<vmem>>, %arg10: memref<96x256xf32, #tpu.memory_space<vmem>>) attributes {dimension_semantics = [#tpu.dimension_semantics<parallel>], iteration_bounds = array<i64: 2>, scalar_prefetch = 0 : i64, scratch_operands = 1 : i64, tpu.core_type = #tpu.core_type<tc>, window_params = [{transform_indices = @transform_0, window_bounds = array<i64: 1, 32, 256>}, {pipeline_mode = #tpu.pipeline_mode<synchronous>, transform_indices = @transform_1, window_bounds = array<i64: 9, 16, 32>}, {pipeline_mode = #tpu.pipeline_mode<synchronous>, transform_indices = @transform_2, window_bounds = array<i64: 9, 16, 48>}, {pipeline_mode = #tpu.pipeline_mode<synchronous>, transform_indices = @transform_3, window_bounds = array<i64: 9, 16, 64>}, {pipeline_mode = #tpu.pipeline_mode<synchronous>, transform_indices = @transform_4, window_bounds = array<i64: 9, 16, 80>}, {pipeline_mode = #tpu.pipeline_mode<synchronous>, transform_indices = @transform_5, window_bounds = array<i64: 4, 16, 1>}, {pipeline_mode = #tpu.pipeline_mode<synchronous>, transform_indices = @transform_6, window_bounds = array<i64: 32, 96>}, {pipeline_mode = #tpu.pipeline_mode<synchronous>, transform_indices = @transform_7, window_bounds = array<i64: 32, 1>}, {transform_indices = @transform_8, window_bounds = array<i64: 1, 32, 256>}]} {
    %0 = tpu.iota {dimensions = array<i32: 1>} : vector<1x256xi32>
    %c15_i32 = arith.constant 15 : i32
    %1 = vector.broadcast %c15_i32 : i32 to vector<1x256xi32>
    %2 = arith.andi %0, %1 : vector<1x256xi32>
    %c16_i32 = arith.constant 16 : i32
    %3 = vector.broadcast %c16_i32 : i32 to vector<1x256xi32>
    %4 = arith.cmpi sge, %0, %3 : vector<1x256xi32>
    %c1_i32 = arith.constant 1 : i32
    %5 = vector.broadcast %c1_i32 : i32 to vector<1x256xi32>
    %6 = arith.cmpi sge, %2, %5 : vector<1x256xi32>
    %7 = arith.andi %4, %6 : vector<1x256xi1>
    %c16_i32_0 = arith.constant 16 : i32
    %8 = vector.broadcast %c16_i32_0 : i32 to vector<1x256xi32>
    %9 = arith.cmpi sge, %0, %8 : vector<1x256xi32>
    %c16_i32_1 = arith.constant 16 : i32
    %10 = vector.broadcast %c16_i32_1 : i32 to vector<1x256xi32>
    %11 = arith.cmpi sge, %0, %10 : vector<1x256xi32>
    %c15_i32_2 = arith.constant 15 : i32
    %12 = vector.broadcast %c15_i32_2 : i32 to vector<1x256xi32>
    %13 = arith.cmpi slt, %2, %12 : vector<1x256xi32>
    %14 = arith.andi %11, %13 : vector<1x256xi1>
    %c1_i32_3 = arith.constant 1 : i32
    %15 = vector.broadcast %c1_i32_3 : i32 to vector<1x256xi32>
    %16 = arith.cmpi sge, %2, %15 : vector<1x256xi32>
    %c15_i32_4 = arith.constant 15 : i32
    %17 = vector.broadcast %c15_i32_4 : i32 to vector<1x256xi32>
    %18 = arith.cmpi slt, %2, %17 : vector<1x256xi32>
    %c240_i32 = arith.constant 240 : i32
    %19 = vector.broadcast %c240_i32 : i32 to vector<1x256xi32>
    %20 = arith.cmpi slt, %0, %19 : vector<1x256xi32>
    %c1_i32_5 = arith.constant 1 : i32
    %21 = vector.broadcast %c1_i32_5 : i32 to vector<1x256xi32>
    %22 = arith.cmpi sge, %2, %21 : vector<1x256xi32>
    %23 = arith.andi %20, %22 : vector<1x256xi1>
    %c240_i32_6 = arith.constant 240 : i32
    %24 = vector.broadcast %c240_i32_6 : i32 to vector<1x256xi32>
    %25 = arith.cmpi slt, %0, %24 : vector<1x256xi32>
    %c240_i32_7 = arith.constant 240 : i32
    %26 = vector.broadcast %c240_i32_7 : i32 to vector<1x256xi32>
    %27 = arith.cmpi slt, %0, %26 : vector<1x256xi32>
    %c15_i32_8 = arith.constant 15 : i32
    %28 = vector.broadcast %c15_i32_8 : i32 to vector<1x256xi32>
    %29 = arith.cmpi slt, %2, %28 : vector<1x256xi32>
    %30 = arith.andi %27, %29 : vector<1x256xi1>
    %c0 = arith.constant 0 : index
    %c0_9 = arith.constant 0 : index
    %c0_10 = arith.constant 0 : index
    %31 = vector.load %arg1[%c0, %c0_9, %c0_10] : memref<1x32x256xf32, #tpu.memory_space<vmem>>, vector<1x32x256xf32>
    %32 = vector.shape_cast %31 : vector<1x32x256xf32> to vector<32x256xf32>
    %c0_11 = arith.constant 0 : index
    %c0_12 = arith.constant 0 : index
    %33 = vector.load %arg10[%c0_11, %c0_12] : memref<96x256xf32, #tpu.memory_space<vmem>>, vector<32x256xf32>
    tpu.vector_store %arg10[%c0_11, %c0_12], %32 {strides = array<i32>} : memref<96x256xf32, #tpu.memory_space<vmem>>, vector<32x256xf32>,
    %c0_13 = arith.constant 0 : index
    %c0_14 = arith.constant 0 : index
    %34 = vector.load %arg10[%c0_13, %c0_14] : memref<96x256xf32, #tpu.memory_space<vmem>>, vector<32x256xf32>
    %cst = arith.constant 0.000000e+00 : f32
    %35 = vector.broadcast %cst : f32 to vector<16x256xf32>
    %c17_i32 = arith.constant 17 : i32
    %36 = tpu.dynamic_rotate %34 by %c17_i32 dim 1 : vector<32x256xf32>, i32 -> vector<32x256xf32>
    %cst_15 = arith.constant 0.000000e+00 : f32
    %37 = vector.shape_cast %7 : vector<1x256xi1> to vector<1x256xi1>
    %38 = vector.broadcast %37 : vector<1x256xi1> to vector<32x256xi1>
    %39 = vector.broadcast %cst_15 : f32 to vector<32x256xf32>
    %40 = arith.select %38, %36, %39 : vector<32x256xi1>, vector<32x256xf32>
    %c0_16 = arith.constant 0 : index
    %c0_17 = arith.constant 0 : index
    %c0_18 = arith.constant 0 : index
    %41 = vector.load %arg2[%c0_16, %c0_17, %c0_18] : memref<9x16x32xf32, #tpu.memory_space<vmem>>, vector<1x16x32xf32>
    %42 = vector.shape_cast %41 : vector<1x16x32xf32> to vector<16x32xf32>
    %cst_19 = arith.constant dense<0.000000e+00> : vector<16x256xf32>
    %43 = tpu.matmul %42, %40, %cst_19 {dimension_numbers = #tpu.dot_dimension_numbers<[1], [0], [0], [1], [0, 0, 1, 1], [], []>} : vector<16x32xf32>, vector<32x256xf32>, vector<16x256xf32> -> vector<16x256xf32>
    %44 = arith.addf %35, %43 : vector<16x256xf32>
    %c16_i32_20 = arith.constant 16 : i32
    %45 = tpu.dynamic_rotate %34 by %c16_i32_20 dim 1 : vector<32x256xf32>, i32 -> vector<32x256xf32>
    %cst_21 = arith.constant 0.000000e+00 : f32
    %46 = vector.shape_cast %9 : vector<1x256xi1> to vector<1x256xi1>
    %47 = vector.broadcast %46 : vector<1x256xi1> to vector<32x256xi1>
    %48 = vector.broadcast %cst_21 : f32 to vector<32x256xf32>
    %49 = arith.select %47, %45, %48 : vector<32x256xi1>, vector<32x256xf32>
    %c1 = arith.constant 1 : index
    %c0_22 = arith.constant 0 : index
    %c0_23 = arith.constant 0 : index
    %50 = vector.load %arg2[%c1, %c0_22, %c0_23] : memref<9x16x32xf32, #tpu.memory_space<vmem>>, vector<1x16x32xf32>
    %51 = vector.shape_cast %50 : vector<1x16x32xf32> to vector<16x32xf32>
    %cst_24 = arith.constant dense<0.000000e+00> : vector<16x256xf32>
    %52 = tpu.matmul %51, %49, %cst_24 {dimension_numbers = #tpu.dot_dimension_numbers<[1], [0], [0], [1], [0, 0, 1, 1], [], []>} : vector<16x32xf32>, vector<32x256xf32>, vector<16x256xf32> -> vector<16x256xf32>
    %53 = arith.addf %44, %52 : vector<16x256xf32>
    %c15_i32_25 = arith.constant 15 : i32
    %54 = tpu.dynamic_rotate %34 by %c15_i32_25 dim 1 : vector<32x256xf32>, i32 -> vector<32x256xf32>
    %cst_26 = arith.constant 0.000000e+00 : f32
    %55 = vector.shape_cast %14 : vector<1x256xi1> to vector<1x256xi1>
    %56 = vector.broadcast %55 : vector<1x256xi1> to vector<32x256xi1>
    %57 = vector.broadcast %cst_26 : f32 to vector<32x256xf32>
    %58 = arith.select %56, %54, %57 : vector<32x256xi1>, vector<32x256xf32>
    %c2 = arith.constant 2 : index
    %c0_27 = arith.constant 0 : index
    %c0_28 = arith.constant 0 : index
    %59 = vector.load %arg2[%c2, %c0_27, %c0_28] : memref<9x16x32xf32, #tpu.memory_space<vmem>>, vector<1x16x32xf32>
    %60 = vector.shape_cast %59 : vector<1x16x32xf32> to vector<16x32xf32>
    %cst_29 = arith.constant dense<0.000000e+00> : vector<16x256xf32>
    %61 = tpu.matmul %60, %58, %cst_29 {dimension_numbers = #tpu.dot_dimension_numbers<[1], [0], [0], [1], [0, 0, 1, 1], [], []>} : vector<16x32xf32>, vector<32x256xf32>, vector<16x256xf32> -> vector<16x256xf32>
    %62 = arith.addf %53, %61 : vector<16x256xf32>
    %c1_i32_30 = arith.constant 1 : i32
    %63 = tpu.dynamic_rotate %34 by %c1_i32_30 dim 1 : vector<32x256xf32>, i32 -> vector<32x256xf32>
    %cst_31 = arith.constant 0.000000e+00 : f32
    %64 = vector.shape_cast %16 : vector<1x256xi1> to vector<1x256xi1>
    %65 = vector.broadcast %64 : vector<1x256xi1> to vector<32x256xi1>
    %66 = vector.broadcast %cst_31 : f32 to vector<32x256xf32>
    %67 = arith.select %65, %63, %66 : vector<32x256xi1>, vector<32x256xf32>
    %c3 = arith.constant 3 : index
    %c0_32 = arith.constant 0 : index
    %c0_33 = arith.constant 0 : index
    %68 = vector.load %arg2[%c3, %c0_32, %c0_33] : memref<9x16x32xf32, #tpu.memory_space<vmem>>, vector<1x16x32xf32>
    %69 = vector.shape_cast %68 : vector<1x16x32xf32> to vector<16x32xf32>
    %cst_34 = arith.constant dense<0.000000e+00> : vector<16x256xf32>
    %70 = tpu.matmul %69, %67, %cst_34 {dimension_numbers = #tpu.dot_dimension_numbers<[1], [0], [0], [1], [0, 0, 1, 1], [], []>} : vector<16x32xf32>, vector<32x256xf32>, vector<16x256xf32> -> vector<16x256xf32>
    %71 = arith.addf %62, %70 : vector<16x256xf32>
    %c4 = arith.constant 4 : index
    %c0_35 = arith.constant 0 : index
    %c0_36 = arith.constant 0 : index
    %72 = vector.load %arg2[%c4, %c0_35, %c0_36] : memref<9x16x32xf32, #tpu.memory_space<vmem>>, vector<1x16x32xf32>
    %73 = vector.shape_cast %72 : vector<1x16x32xf32> to vector<16x32xf32>
    %cst_37 = arith.constant dense<0.000000e+00> : vector<16x256xf32>
    %74 = tpu.matmul %73, %34, %cst_37 {dimension_numbers = #tpu.dot_dimension_numbers<[1], [0], [0], [1], [0, 0, 1, 1], [], []>} : vector<16x32xf32>, vector<32x256xf32>, vector<16x256xf32> -> vector<16x256xf32>
    %75 = arith.addf %71, %74 : vector<16x256xf32>
    %c255_i32 = arith.constant 255 : i32
    %76 = tpu.dynamic_rotate %34 by %c255_i32 dim 1 : vector<32x256xf32>, i32 -> vector<32x256xf32>
    %cst_38 = arith.constant 0.000000e+00 : f32
    %77 = vector.shape_cast %18 : vector<1x256xi1> to vector<1x256xi1>
    %78 = vector.broadcast %77 : vector<1x256xi1> to vector<32x256xi1>
    %79 = vector.broadcast %cst_38 : f32 to vector<32x256xf32>
    %80 = arith.select %78, %76, %79 : vector<32x256xi1>, vector<32x256xf32>
    %c5 = arith.constant 5 : index
    %c0_39 = arith.constant 0 : index
    %c0_40 = arith.constant 0 : index
    %81 = vector.load %arg2[%c5, %c0_39, %c0_40] : memref<9x16x32xf32, #tpu.memory_space<vmem>>, vector<1x16x32xf32>
    %82 = vector.shape_cast %81 : vector<1x16x32xf32> to vector<16x32xf32>
    %cst_41 = arith.constant dense<0.000000e+00> : vector<16x256xf32>
    %83 = tpu.matmul %82, %80, %cst_41 {dimension_numbers = #tpu.dot_dimension_numbers<[1], [0], [0], [1], [0, 0, 1, 1], [], []>} : vector<16x32xf32>, vector<32x256xf32>, vector<16x256xf32> -> vector<16x256xf32>
    %84 = arith.addf %75, %83 : vector<16x256xf32>
    %c241_i32 = arith.constant 241 : i32
    %85 = tpu.dynamic_rotate %34 by %c241_i32 dim 1 : vector<32x256xf32>, i32 -> vector<32x256xf32>
    %cst_42 = arith.constant 0.000000e+00 : f32
    %86 = vector.shape_cast %23 : vector<1x256xi1> to vector<1x256xi1>
    %87 = vector.broadcast %86 : vector<1x256xi1> to vector<32x256xi1>
    %88 = vector.broadcast %cst_42 : f32 to vector<32x256xf32>
    %89 = arith.select %87, %85, %88 : vector<32x256xi1>, vector<32x256xf32>
    %c6 = arith.constant 6 : index
    %c0_43 = arith.constant 0 : index
    %c0_44 = arith.constant 0 : index
    %90 = vector.load %arg2[%c6, %c0_43, %c0_44] : memref<9x16x32xf32, #tpu.memory_space<vmem>>, vector<1x16x32xf32>
    %91 = vector.shape_cast %90 : vector<1x16x32xf32> to vector<16x32xf32>
    %cst_45 = arith.constant dense<0.000000e+00> : vector<16x256xf32>
    %92 = tpu.matmul %91, %89, %cst_45 {dimension_numbers = #tpu.dot_dimension_numbers<[1], [0], [0], [1], [0, 0, 1, 1], [], []>} : vector<16x32xf32>, vector<32x256xf32>, vector<16x256xf32> -> vector<16x256xf32>
    %93 = arith.addf %84, %92 : vector<16x256xf32>
    %c240_i32_46 = arith.constant 240 : i32
    %94 = tpu.dynamic_rotate %34 by %c240_i32_46 dim 1 : vector<32x256xf32>, i32 -> vector<32x256xf32>
    %cst_47 = arith.constant 0.000000e+00 : f32
    %95 = vector.shape_cast %25 : vector<1x256xi1> to vector<1x256xi1>
    %96 = vector.broadcast %95 : vector<1x256xi1> to vector<32x256xi1>
    %97 = vector.broadcast %cst_47 : f32 to vector<32x256xf32>
    %98 = arith.select %96, %94, %97 : vector<32x256xi1>, vector<32x256xf32>
    %c7 = arith.constant 7 : index
    %c0_48 = arith.constant 0 : index
    %c0_49 = arith.constant 0 : index
    %99 = vector.load %arg2[%c7, %c0_48, %c0_49] : memref<9x16x32xf32, #tpu.memory_space<vmem>>, vector<1x16x32xf32>
    %100 = vector.shape_cast %99 : vector<1x16x32xf32> to vector<16x32xf32>
    %cst_50 = arith.constant dense<0.000000e+00> : vector<16x256xf32>
    %101 = tpu.matmul %100, %98, %cst_50 {dimension_numbers = #tpu.dot_dimension_numbers<[1], [0], [0], [1], [0, 0, 1, 1], [], []>} : vector<16x32xf32>, vector<32x256xf32>, vector<16x256xf32> -> vector<16x256xf32>
    %102 = arith.addf %93, %101 : vector<16x256xf32>
    %c239_i32 = arith.constant 239 : i32
    %103 = tpu.dynamic_rotate %34 by %c239_i32 dim 1 : vector<32x256xf32>, i32 -> vector<32x256xf32>
    %cst_51 = arith.constant 0.000000e+00 : f32
    %104 = vector.shape_cast %30 : vector<1x256xi1> to vector<1x256xi1>
    %105 = vector.broadcast %104 : vector<1x256xi1> to vector<32x256xi1>
    %106 = vector.broadcast %cst_51 : f32 to vector<32x256xf32>
    %107 = arith.select %105, %103, %106 : vector<32x256xi1>, vector<32x256xf32>
    %c8 = arith.constant 8 : index
    %c0_52 = arith.constant 0 : index
    %c0_53 = arith.constant 0 : index
    %108 = vector.load %arg2[%c8, %c0_52, %c0_53] : memref<9x16x32xf32, #tpu.memory_space<vmem>>, vector<1x16x32xf32>
    %109 = vector.shape_cast %108 : vector<1x16x32xf32> to vector<16x32xf32>
    %cst_54 = arith.constant dense<0.000000e+00> : vector<16x256xf32>
    %110 = tpu.matmul %109, %107, %cst_54 {dimension_numbers = #tpu.dot_dimension_numbers<[1], [0], [0], [1], [0, 0, 1, 1], [], []>} : vector<16x32xf32>, vector<32x256xf32>, vector<16x256xf32> -> vector<16x256xf32>
    %111 = arith.addf %102, %110 : vector<16x256xf32>
    %c0_55 = arith.constant 0 : index
    %c0_56 = arith.constant 0 : index
    %c0_57 = arith.constant 0 : index
    %112 = vector.load %arg6[%c0_55, %c0_56, %c0_57] : memref<4x16x1xf32, #tpu.memory_space<vmem>>, vector<1x16x1xf32>
    %113 = vector.shape_cast %112 : vector<1x16x1xf32> to vector<16x1xf32>
    %114 = vector.broadcast %113 : vector<16x1xf32> to vector<16x256xf32>
    %115 = arith.addf %111, %114 : vector<16x256xf32>
    %cst_58 = arith.constant 0.000000e+00 : f32
    %116 = vector.broadcast %cst_58 : f32 to vector<16x256xf32>
    %117 = arith.maximumf %115, %116 : vector<16x256xf32>
    %c32 = arith.constant 32 : index
    %c0_59 = arith.constant 0 : index
    %118 = vector.load %arg10[%c32, %c0_59] : memref<96x256xf32, #tpu.memory_space<vmem>>, vector<16x256xf32>
    tpu.vector_store %arg10[%c32, %c0_59], %117 {strides = array<i32>} : memref<96x256xf32, #tpu.memory_space<vmem>>, vector<16x256xf32>,
    %c0_60 = arith.constant 0 : index
    %c0_61 = arith.constant 0 : index
    %119 = vector.load %arg10[%c0_60, %c0_61] : memref<96x256xf32, #tpu.memory_space<vmem>>, vector<48x256xf32>
    %cst_62 = arith.constant 0.000000e+00 : f32
    %120 = vector.broadcast %cst_62 : f32 to vector<16x256xf32>
    %c17_i32_63 = arith.constant 17 : i32
    %121 = tpu.dynamic_rotate %119 by %c17_i32_63 dim 1 : vector<48x256xf32>, i32 -> vector<48x256xf32>
    %cst_64 = arith.constant 0.000000e+00 : f32
    %122 = vector.shape_cast %7 : vector<1x256xi1> to vector<1x256xi1>
    %123 = vector.broadcast %122 : vector<1x256xi1> to vector<48x256xi1>
    %124 = vector.broadcast %cst_64 : f32 to vector<48x256xf32>
    %125 = arith.select %123, %121, %124 : vector<48x256xi1>, vector<48x256xf32>
    %c0_65 = arith.constant 0 : index
    %c0_66 = arith.constant 0 : index
    %c0_67 = arith.constant 0 : index
    %126 = vector.load %arg3[%c0_65, %c0_66, %c0_67] : memref<9x16x48xf32, #tpu.memory_space<vmem>>, vector<1x16x48xf32>
    %127 = vector.shape_cast %126 : vector<1x16x48xf32> to vector<16x48xf32>
    %cst_68 = arith.constant dense<0.000000e+00> : vector<16x256xf32>
    %128 = tpu.matmul %127, %125, %cst_68 {dimension_numbers = #tpu.dot_dimension_numbers<[1], [0], [0], [1], [0, 0, 1, 1], [], []>} : vector<16x48xf32>, vector<48x256xf32>, vector<16x256xf32> -> vector<16x256xf32>
    %129 = arith.addf %120, %128 : vector<16x256xf32>
    %c16_i32_69 = arith.constant 16 : i32
    %130 = tpu.dynamic_rotate %119 by %c16_i32_69 dim 1 : vector<48x256xf32>, i32 -> vector<48x256xf32>
    %cst_70 = arith.constant 0.000000e+00 : f32
    %131 = vector.shape_cast %9 : vector<1x256xi1> to vector<1x256xi1>
    %132 = vector.broadcast %131 : vector<1x256xi1> to vector<48x256xi1>
    %133 = vector.broadcast %cst_70 : f32 to vector<48x256xf32>
    %134 = arith.select %132, %130, %133 : vector<48x256xi1>, vector<48x256xf32>
    %c1_71 = arith.constant 1 : index
    %c0_72 = arith.constant 0 : index
    %c0_73 = arith.constant 0 : index
    %135 = vector.load %arg3[%c1_71, %c0_72, %c0_73] : memref<9x16x48xf32, #tpu.memory_space<vmem>>, vector<1x16x48xf32>
    %136 = vector.shape_cast %135 : vector<1x16x48xf32> to vector<16x48xf32>
    %cst_74 = arith.constant dense<0.000000e+00> : vector<16x256xf32>
    %137 = tpu.matmul %136, %134, %cst_74 {dimension_numbers = #tpu.dot_dimension_numbers<[1], [0], [0], [1], [0, 0, 1, 1], [], []>} : vector<16x48xf32>, vector<48x256xf32>, vector<16x256xf32> -> vector<16x256xf32>
    %138 = arith.addf %129, %137 : vector<16x256xf32>
    %c15_i32_75 = arith.constant 15 : i32
    %139 = tpu.dynamic_rotate %119 by %c15_i32_75 dim 1 : vector<48x256xf32>, i32 -> vector<48x256xf32>
    %cst_76 = arith.constant 0.000000e+00 : f32
    %140 = vector.shape_cast %14 : vector<1x256xi1> to vector<1x256xi1>
    %141 = vector.broadcast %140 : vector<1x256xi1> to vector<48x256xi1>
    %142 = vector.broadcast %cst_76 : f32 to vector<48x256xf32>
    %143 = arith.select %141, %139, %142 : vector<48x256xi1>, vector<48x256xf32>
    %c2_77 = arith.constant 2 : index
    %c0_78 = arith.constant 0 : index
    %c0_79 = arith.constant 0 : index
    %144 = vector.load %arg3[%c2_77, %c0_78, %c0_79] : memref<9x16x48xf32, #tpu.memory_space<vmem>>, vector<1x16x48xf32>
    %145 = vector.shape_cast %144 : vector<1x16x48xf32> to vector<16x48xf32>
    %cst_80 = arith.constant dense<0.000000e+00> : vector<16x256xf32>
    %146 = tpu.matmul %145, %143, %cst_80 {dimension_numbers = #tpu.dot_dimension_numbers<[1], [0], [0], [1], [0, 0, 1, 1], [], []>} : vector<16x48xf32>, vector<48x256xf32>, vector<16x256xf32> -> vector<16x256xf32>
    %147 = arith.addf %138, %146 : vector<16x256xf32>
    %c1_i32_81 = arith.constant 1 : i32
    %148 = tpu.dynamic_rotate %119 by %c1_i32_81 dim 1 : vector<48x256xf32>, i32 -> vector<48x256xf32>
    %cst_82 = arith.constant 0.000000e+00 : f32
    %149 = vector.shape_cast %16 : vector<1x256xi1> to vector<1x256xi1>
    %150 = vector.broadcast %149 : vector<1x256xi1> to vector<48x256xi1>
    %151 = vector.broadcast %cst_82 : f32 to vector<48x256xf32>
    %152 = arith.select %150, %148, %151 : vector<48x256xi1>, vector<48x256xf32>
    %c3_83 = arith.constant 3 : index
    %c0_84 = arith.constant 0 : index
    %c0_85 = arith.constant 0 : index
    %153 = vector.load %arg3[%c3_83, %c0_84, %c0_85] : memref<9x16x48xf32, #tpu.memory_space<vmem>>, vector<1x16x48xf32>
    %154 = vector.shape_cast %153 : vector<1x16x48xf32> to vector<16x48xf32>
    %cst_86 = arith.constant dense<0.000000e+00> : vector<16x256xf32>
    %155 = tpu.matmul %154, %152, %cst_86 {dimension_numbers = #tpu.dot_dimension_numbers<[1], [0], [0], [1], [0, 0, 1, 1], [], []>} : vector<16x48xf32>, vector<48x256xf32>, vector<16x256xf32> -> vector<16x256xf32>
    %156 = arith.addf %147, %155 : vector<16x256xf32>
    %c4_87 = arith.constant 4 : index
    %c0_88 = arith.constant 0 : index
    %c0_89 = arith.constant 0 : index
    %157 = vector.load %arg3[%c4_87, %c0_88, %c0_89] : memref<9x16x48xf32, #tpu.memory_space<vmem>>, vector<1x16x48xf32>
    %158 = vector.shape_cast %157 : vector<1x16x48xf32> to vector<16x48xf32>
    %cst_90 = arith.constant dense<0.000000e+00> : vector<16x256xf32>
    %159 = tpu.matmul %158, %119, %cst_90 {dimension_numbers = #tpu.dot_dimension_numbers<[1], [0], [0], [1], [0, 0, 1, 1], [], []>} : vector<16x48xf32>, vector<48x256xf32>, vector<16x256xf32> -> vector<16x256xf32>
    %160 = arith.addf %156, %159 : vector<16x256xf32>
    %c255_i32_91 = arith.constant 255 : i32
    %161 = tpu.dynamic_rotate %119 by %c255_i32_91 dim 1 : vector<48x256xf32>, i32 -> vector<48x256xf32>
    %cst_92 = arith.constant 0.000000e+00 : f32
    %162 = vector.shape_cast %18 : vector<1x256xi1> to vector<1x256xi1>
    %163 = vector.broadcast %162 : vector<1x256xi1> to vector<48x256xi1>
    %164 = vector.broadcast %cst_92 : f32 to vector<48x256xf32>
    %165 = arith.select %163, %161, %164 : vector<48x256xi1>, vector<48x256xf32>
    %c5_93 = arith.constant 5 : index
    %c0_94 = arith.constant 0 : index
    %c0_95 = arith.constant 0 : index
    %166 = vector.load %arg3[%c5_93, %c0_94, %c0_95] : memref<9x16x48xf32, #tpu.memory_space<vmem>>, vector<1x16x48xf32>
    %167 = vector.shape_cast %166 : vector<1x16x48xf32> to vector<16x48xf32>
    %cst_96 = arith.constant dense<0.000000e+00> : vector<16x256xf32>
    %168 = tpu.matmul %167, %165, %cst_96 {dimension_numbers = #tpu.dot_dimension_numbers<[1], [0], [0], [1], [0, 0, 1, 1], [], []>} : vector<16x48xf32>, vector<48x256xf32>, vector<16x256xf32> -> vector<16x256xf32>
    %169 = arith.addf %160, %168 : vector<16x256xf32>
    %c241_i32_97 = arith.constant 241 : i32
    %170 = tpu.dynamic_rotate %119 by %c241_i32_97 dim 1 : vector<48x256xf32>, i32 -> vector<48x256xf32>
    %cst_98 = arith.constant 0.000000e+00 : f32
    %171 = vector.shape_cast %23 : vector<1x256xi1> to vector<1x256xi1>
    %172 = vector.broadcast %171 : vector<1x256xi1> to vector<48x256xi1>
    %173 = vector.broadcast %cst_98 : f32 to vector<48x256xf32>
    %174 = arith.select %172, %170, %173 : vector<48x256xi1>, vector<48x256xf32>
    %c6_99 = arith.constant 6 : index
    %c0_100 = arith.constant 0 : index
    %c0_101 = arith.constant 0 : index
    %175 = vector.load %arg3[%c6_99, %c0_100, %c0_101] : memref<9x16x48xf32, #tpu.memory_space<vmem>>, vector<1x16x48xf32>
    %176 = vector.shape_cast %175 : vector<1x16x48xf32> to vector<16x48xf32>
    %cst_102 = arith.constant dense<0.000000e+00> : vector<16x256xf32>
    %177 = tpu.matmul %176, %174, %cst_102 {dimension_numbers = #tpu.dot_dimension_numbers<[1], [0], [0], [1], [0, 0, 1, 1], [], []>} : vector<16x48xf32>, vector<48x256xf32>, vector<16x256xf32> -> vector<16x256xf32>
    %178 = arith.addf %169, %177 : vector<16x256xf32>
    %c240_i32_103 = arith.constant 240 : i32
    %179 = tpu.dynamic_rotate %119 by %c240_i32_103 dim 1 : vector<48x256xf32>, i32 -> vector<48x256xf32>
    %cst_104 = arith.constant 0.000000e+00 : f32
    %180 = vector.shape_cast %25 : vector<1x256xi1> to vector<1x256xi1>
    %181 = vector.broadcast %180 : vector<1x256xi1> to vector<48x256xi1>
    %182 = vector.broadcast %cst_104 : f32 to vector<48x256xf32>
    %183 = arith.select %181, %179, %182 : vector<48x256xi1>, vector<48x256xf32>
    %c7_105 = arith.constant 7 : index
    %c0_106 = arith.constant 0 : index
    %c0_107 = arith.constant 0 : index
    %184 = vector.load %arg3[%c7_105, %c0_106, %c0_107] : memref<9x16x48xf32, #tpu.memory_space<vmem>>, vector<1x16x48xf32>
    %185 = vector.shape_cast %184 : vector<1x16x48xf32> to vector<16x48xf32>
    %cst_108 = arith.constant dense<0.000000e+00> : vector<16x256xf32>
    %186 = tpu.matmul %185, %183, %cst_108 {dimension_numbers = #tpu.dot_dimension_numbers<[1], [0], [0], [1], [0, 0, 1, 1], [], []>} : vector<16x48xf32>, vector<48x256xf32>, vector<16x256xf32> -> vector<16x256xf32>
    %187 = arith.addf %178, %186 : vector<16x256xf32>
    %c239_i32_109 = arith.constant 239 : i32
    %188 = tpu.dynamic_rotate %119 by %c239_i32_109 dim 1 : vector<48x256xf32>, i32 -> vector<48x256xf32>
    %cst_110 = arith.constant 0.000000e+00 : f32
    %189 = vector.shape_cast %30 : vector<1x256xi1> to vector<1x256xi1>
    %190 = vector.broadcast %189 : vector<1x256xi1> to vector<48x256xi1>
    %191 = vector.broadcast %cst_110 : f32 to vector<48x256xf32>
    %192 = arith.select %190, %188, %191 : vector<48x256xi1>, vector<48x256xf32>
    %c8_111 = arith.constant 8 : index
    %c0_112 = arith.constant 0 : index
    %c0_113 = arith.constant 0 : index
    %193 = vector.load %arg3[%c8_111, %c0_112, %c0_113] : memref<9x16x48xf32, #tpu.memory_space<vmem>>, vector<1x16x48xf32>
    %194 = vector.shape_cast %193 : vector<1x16x48xf32> to vector<16x48xf32>
    %cst_114 = arith.constant dense<0.000000e+00> : vector<16x256xf32>
    %195 = tpu.matmul %194, %192, %cst_114 {dimension_numbers = #tpu.dot_dimension_numbers<[1], [0], [0], [1], [0, 0, 1, 1], [], []>} : vector<16x48xf32>, vector<48x256xf32>, vector<16x256xf32> -> vector<16x256xf32>
    %196 = arith.addf %187, %195 : vector<16x256xf32>
    %c1_115 = arith.constant 1 : index
    %c0_116 = arith.constant 0 : index
    %c0_117 = arith.constant 0 : index
    %197 = vector.load %arg6[%c1_115, %c0_116, %c0_117] : memref<4x16x1xf32, #tpu.memory_space<vmem>>, vector<1x16x1xf32>
    %198 = vector.shape_cast %197 : vector<1x16x1xf32> to vector<16x1xf32>
    %199 = vector.broadcast %198 : vector<16x1xf32> to vector<16x256xf32>
    %200 = arith.addf %196, %199 : vector<16x256xf32>
    %cst_118 = arith.constant 0.000000e+00 : f32
    %201 = vector.broadcast %cst_118 : f32 to vector<16x256xf32>
    %202 = arith.maximumf %200, %201 : vector<16x256xf32>
    %c48 = arith.constant 48 : index
    %c0_119 = arith.constant 0 : index
    %203 = vector.load %arg10[%c48, %c0_119] : memref<96x256xf32, #tpu.memory_space<vmem>>, vector<16x256xf32>
    tpu.vector_store %arg10[%c48, %c0_119], %202 {strides = array<i32>} : memref<96x256xf32, #tpu.memory_space<vmem>>, vector<16x256xf32>,
    %c0_120 = arith.constant 0 : index
    %c0_121 = arith.constant 0 : index
    %204 = vector.load %arg10[%c0_120, %c0_121] : memref<96x256xf32, #tpu.memory_space<vmem>>, vector<64x256xf32>
    %cst_122 = arith.constant 0.000000e+00 : f32
    %205 = vector.broadcast %cst_122 : f32 to vector<16x256xf32>
    %c17_i32_123 = arith.constant 17 : i32
    %206 = tpu.dynamic_rotate %204 by %c17_i32_123 dim 1 : vector<64x256xf32>, i32 -> vector<64x256xf32>
    %cst_124 = arith.constant 0.000000e+00 : f32
    %207 = vector.shape_cast %7 : vector<1x256xi1> to vector<1x256xi1>
    %208 = vector.broadcast %207 : vector<1x256xi1> to vector<64x256xi1>
    %209 = vector.broadcast %cst_124 : f32 to vector<64x256xf32>
    %210 = arith.select %208, %206, %209 : vector<64x256xi1>, vector<64x256xf32>
    %c0_125 = arith.constant 0 : index
    %c0_126 = arith.constant 0 : index
    %c0_127 = arith.constant 0 : index
    %211 = vector.load %arg4[%c0_125, %c0_126, %c0_127] : memref<9x16x64xf32, #tpu.memory_space<vmem>>, vector<1x16x64xf32>
    %212 = vector.shape_cast %211 : vector<1x16x64xf32> to vector<16x64xf32>
    %cst_128 = arith.constant dense<0.000000e+00> : vector<16x256xf32>
    %213 = tpu.matmul %212, %210, %cst_128 {dimension_numbers = #tpu.dot_dimension_numbers<[1], [0], [0], [1], [0, 0, 1, 1], [], []>} : vector<16x64xf32>, vector<64x256xf32>, vector<16x256xf32> -> vector<16x256xf32>
    %214 = arith.addf %205, %213 : vector<16x256xf32>
    %c16_i32_129 = arith.constant 16 : i32
    %215 = tpu.dynamic_rotate %204 by %c16_i32_129 dim 1 : vector<64x256xf32>, i32 -> vector<64x256xf32>
    %cst_130 = arith.constant 0.000000e+00 : f32
    %216 = vector.shape_cast %9 : vector<1x256xi1> to vector<1x256xi1>
    %217 = vector.broadcast %216 : vector<1x256xi1> to vector<64x256xi1>
    %218 = vector.broadcast %cst_130 : f32 to vector<64x256xf32>
    %219 = arith.select %217, %215, %218 : vector<64x256xi1>, vector<64x256xf32>
    %c1_131 = arith.constant 1 : index
    %c0_132 = arith.constant 0 : index
    %c0_133 = arith.constant 0 : index
    %220 = vector.load %arg4[%c1_131, %c0_132, %c0_133] : memref<9x16x64xf32, #tpu.memory_space<vmem>>, vector<1x16x64xf32>
    %221 = vector.shape_cast %220 : vector<1x16x64xf32> to vector<16x64xf32>
    %cst_134 = arith.constant dense<0.000000e+00> : vector<16x256xf32>
    %222 = tpu.matmul %221, %219, %cst_134 {dimension_numbers = #tpu.dot_dimension_numbers<[1], [0], [0], [1], [0, 0, 1, 1], [], []>} : vector<16x64xf32>, vector<64x256xf32>, vector<16x256xf32> -> vector<16x256xf32>
    %223 = arith.addf %214, %222 : vector<16x256xf32>
    %c15_i32_135 = arith.constant 15 : i32
    %224 = tpu.dynamic_rotate %204 by %c15_i32_135 dim 1 : vector<64x256xf32>, i32 -> vector<64x256xf32>
    %cst_136 = arith.constant 0.000000e+00 : f32
    %225 = vector.shape_cast %14 : vector<1x256xi1> to vector<1x256xi1>
    %226 = vector.broadcast %225 : vector<1x256xi1> to vector<64x256xi1>
    %227 = vector.broadcast %cst_136 : f32 to vector<64x256xf32>
    %228 = arith.select %226, %224, %227 : vector<64x256xi1>, vector<64x256xf32>
    %c2_137 = arith.constant 2 : index
    %c0_138 = arith.constant 0 : index
    %c0_139 = arith.constant 0 : index
    %229 = vector.load %arg4[%c2_137, %c0_138, %c0_139] : memref<9x16x64xf32, #tpu.memory_space<vmem>>, vector<1x16x64xf32>
    %230 = vector.shape_cast %229 : vector<1x16x64xf32> to vector<16x64xf32>
    %cst_140 = arith.constant dense<0.000000e+00> : vector<16x256xf32>
    %231 = tpu.matmul %230, %228, %cst_140 {dimension_numbers = #tpu.dot_dimension_numbers<[1], [0], [0], [1], [0, 0, 1, 1], [], []>} : vector<16x64xf32>, vector<64x256xf32>, vector<16x256xf32> -> vector<16x256xf32>
    %232 = arith.addf %223, %231 : vector<16x256xf32>
    %c1_i32_141 = arith.constant 1 : i32
    %233 = tpu.dynamic_rotate %204 by %c1_i32_141 dim 1 : vector<64x256xf32>, i32 -> vector<64x256xf32>
    %cst_142 = arith.constant 0.000000e+00 : f32
    %234 = vector.shape_cast %16 : vector<1x256xi1> to vector<1x256xi1>
    %235 = vector.broadcast %234 : vector<1x256xi1> to vector<64x256xi1>
    %236 = vector.broadcast %cst_142 : f32 to vector<64x256xf32>
    %237 = arith.select %235, %233, %236 : vector<64x256xi1>, vector<64x256xf32>
    %c3_143 = arith.constant 3 : index
    %c0_144 = arith.constant 0 : index
    %c0_145 = arith.constant 0 : index
    %238 = vector.load %arg4[%c3_143, %c0_144, %c0_145] : memref<9x16x64xf32, #tpu.memory_space<vmem>>, vector<1x16x64xf32>
    %239 = vector.shape_cast %238 : vector<1x16x64xf32> to vector<16x64xf32>
    %cst_146 = arith.constant dense<0.000000e+00> : vector<16x256xf32>
    %240 = tpu.matmul %239, %237, %cst_146 {dimension_numbers = #tpu.dot_dimension_numbers<[1], [0], [0], [1], [0, 0, 1, 1], [], []>} : vector<16x64xf32>, vector<64x256xf32>, vector<16x256xf32> -> vector<16x256xf32>
    %241 = arith.addf %232, %240 : vector<16x256xf32>
    %c4_147 = arith.constant 4 : index
    %c0_148 = arith.constant 0 : index
    %c0_149 = arith.constant 0 : index
    %242 = vector.load %arg4[%c4_147, %c0_148, %c0_149] : memref<9x16x64xf32, #tpu.memory_space<vmem>>, vector<1x16x64xf32>
    %243 = vector.shape_cast %242 : vector<1x16x64xf32> to vector<16x64xf32>
    %cst_150 = arith.constant dense<0.000000e+00> : vector<16x256xf32>
    %244 = tpu.matmul %243, %204, %cst_150 {dimension_numbers = #tpu.dot_dimension_numbers<[1], [0], [0], [1], [0, 0, 1, 1], [], []>} : vector<16x64xf32>, vector<64x256xf32>, vector<16x256xf32> -> vector<16x256xf32>
    %245 = arith.addf %241, %244 : vector<16x256xf32>
    %c255_i32_151 = arith.constant 255 : i32
    %246 = tpu.dynamic_rotate %204 by %c255_i32_151 dim 1 : vector<64x256xf32>, i32 -> vector<64x256xf32>
    %cst_152 = arith.constant 0.000000e+00 : f32
    %247 = vector.shape_cast %18 : vector<1x256xi1> to vector<1x256xi1>
    %248 = vector.broadcast %247 : vector<1x256xi1> to vector<64x256xi1>
    %249 = vector.broadcast %cst_152 : f32 to vector<64x256xf32>
    %250 = arith.select %248, %246, %249 : vector<64x256xi1>, vector<64x256xf32>
    %c5_153 = arith.constant 5 : index
    %c0_154 = arith.constant 0 : index
    %c0_155 = arith.constant 0 : index
    %251 = vector.load %arg4[%c5_153, %c0_154, %c0_155] : memref<9x16x64xf32, #tpu.memory_space<vmem>>, vector<1x16x64xf32>
    %252 = vector.shape_cast %251 : vector<1x16x64xf32> to vector<16x64xf32>
    %cst_156 = arith.constant dense<0.000000e+00> : vector<16x256xf32>
    %253 = tpu.matmul %252, %250, %cst_156 {dimension_numbers = #tpu.dot_dimension_numbers<[1], [0], [0], [1], [0, 0, 1, 1], [], []>} : vector<16x64xf32>, vector<64x256xf32>, vector<16x256xf32> -> vector<16x256xf32>
    %254 = arith.addf %245, %253 : vector<16x256xf32>
    %c241_i32_157 = arith.constant 241 : i32
    %255 = tpu.dynamic_rotate %204 by %c241_i32_157 dim 1 : vector<64x256xf32>, i32 -> vector<64x256xf32>
    %cst_158 = arith.constant 0.000000e+00 : f32
    %256 = vector.shape_cast %23 : vector<1x256xi1> to vector<1x256xi1>
    %257 = vector.broadcast %256 : vector<1x256xi1> to vector<64x256xi1>
    %258 = vector.broadcast %cst_158 : f32 to vector<64x256xf32>
    %259 = arith.select %257, %255, %258 : vector<64x256xi1>, vector<64x256xf32>
    %c6_159 = arith.constant 6 : index
    %c0_160 = arith.constant 0 : index
    %c0_161 = arith.constant 0 : index
    %260 = vector.load %arg4[%c6_159, %c0_160, %c0_161] : memref<9x16x64xf32, #tpu.memory_space<vmem>>, vector<1x16x64xf32>
    %261 = vector.shape_cast %260 : vector<1x16x64xf32> to vector<16x64xf32>
    %cst_162 = arith.constant dense<0.000000e+00> : vector<16x256xf32>
    %262 = tpu.matmul %261, %259, %cst_162 {dimension_numbers = #tpu.dot_dimension_numbers<[1], [0], [0], [1], [0, 0, 1, 1], [], []>} : vector<16x64xf32>, vector<64x256xf32>, vector<16x256xf32> -> vector<16x256xf32>
    %263 = arith.addf %254, %262 : vector<16x256xf32>
    %c240_i32_163 = arith.constant 240 : i32
    %264 = tpu.dynamic_rotate %204 by %c240_i32_163 dim 1 : vector<64x256xf32>, i32 -> vector<64x256xf32>
    %cst_164 = arith.constant 0.000000e+00 : f32
    %265 = vector.shape_cast %25 : vector<1x256xi1> to vector<1x256xi1>
    %266 = vector.broadcast %265 : vector<1x256xi1> to vector<64x256xi1>
    %267 = vector.broadcast %cst_164 : f32 to vector<64x256xf32>
    %268 = arith.select %266, %264, %267 : vector<64x256xi1>, vector<64x256xf32>
    %c7_165 = arith.constant 7 : index
    %c0_166 = arith.constant 0 : index
    %c0_167 = arith.constant 0 : index
    %269 = vector.load %arg4[%c7_165, %c0_166, %c0_167] : memref<9x16x64xf32, #tpu.memory_space<vmem>>, vector<1x16x64xf32>
    %270 = vector.shape_cast %269 : vector<1x16x64xf32> to vector<16x64xf32>
    %cst_168 = arith.constant dense<0.000000e+00> : vector<16x256xf32>
    %271 = tpu.matmul %270, %268, %cst_168 {dimension_numbers = #tpu.dot_dimension_numbers<[1], [0], [0], [1], [0, 0, 1, 1], [], []>} : vector<16x64xf32>, vector<64x256xf32>, vector<16x256xf32> -> vector<16x256xf32>
    %272 = arith.addf %263, %271 : vector<16x256xf32>
    %c239_i32_169 = arith.constant 239 : i32
    %273 = tpu.dynamic_rotate %204 by %c239_i32_169 dim 1 : vector<64x256xf32>, i32 -> vector<64x256xf32>
    %cst_170 = arith.constant 0.000000e+00 : f32
    %274 = vector.shape_cast %30 : vector<1x256xi1> to vector<1x256xi1>
    %275 = vector.broadcast %274 : vector<1x256xi1> to vector<64x256xi1>
    %276 = vector.broadcast %cst_170 : f32 to vector<64x256xf32>
    %277 = arith.select %275, %273, %276 : vector<64x256xi1>, vector<64x256xf32>
    %c8_171 = arith.constant 8 : index
    %c0_172 = arith.constant 0 : index
    %c0_173 = arith.constant 0 : index
    %278 = vector.load %arg4[%c8_171, %c0_172, %c0_173] : memref<9x16x64xf32, #tpu.memory_space<vmem>>, vector<1x16x64xf32>
    %279 = vector.shape_cast %278 : vector<1x16x64xf32> to vector<16x64xf32>
    %cst_174 = arith.constant dense<0.000000e+00> : vector<16x256xf32>
    %280 = tpu.matmul %279, %277, %cst_174 {dimension_numbers = #tpu.dot_dimension_numbers<[1], [0], [0], [1], [0, 0, 1, 1], [], []>} : vector<16x64xf32>, vector<64x256xf32>, vector<16x256xf32> -> vector<16x256xf32>
    %281 = arith.addf %272, %280 : vector<16x256xf32>
    %c2_175 = arith.constant 2 : index
    %c0_176 = arith.constant 0 : index
    %c0_177 = arith.constant 0 : index
    %282 = vector.load %arg6[%c2_175, %c0_176, %c0_177] : memref<4x16x1xf32, #tpu.memory_space<vmem>>, vector<1x16x1xf32>
    %283 = vector.shape_cast %282 : vector<1x16x1xf32> to vector<16x1xf32>
    %284 = vector.broadcast %283 : vector<16x1xf32> to vector<16x256xf32>
    %285 = arith.addf %281, %284 : vector<16x256xf32>
    %cst_178 = arith.constant 0.000000e+00 : f32
    %286 = vector.broadcast %cst_178 : f32 to vector<16x256xf32>
    %287 = arith.maximumf %285, %286 : vector<16x256xf32>
    %c64 = arith.constant 64 : index
    %c0_179 = arith.constant 0 : index
    %288 = vector.load %arg10[%c64, %c0_179] : memref<96x256xf32, #tpu.memory_space<vmem>>, vector<16x256xf32>
    tpu.vector_store %arg10[%c64, %c0_179], %287 {strides = array<i32>} : memref<96x256xf32, #tpu.memory_space<vmem>>, vector<16x256xf32>,
    %c0_180 = arith.constant 0 : index
    %c0_181 = arith.constant 0 : index
    %289 = vector.load %arg10[%c0_180, %c0_181] : memref<96x256xf32, #tpu.memory_space<vmem>>, vector<80x256xf32>
    %cst_182 = arith.constant 0.000000e+00 : f32
    %290 = vector.broadcast %cst_182 : f32 to vector<16x256xf32>
    %c17_i32_183 = arith.constant 17 : i32
    %291 = tpu.dynamic_rotate %289 by %c17_i32_183 dim 1 : vector<80x256xf32>, i32 -> vector<80x256xf32>
    %cst_184 = arith.constant 0.000000e+00 : f32
    %292 = vector.shape_cast %7 : vector<1x256xi1> to vector<1x256xi1>
    %293 = vector.broadcast %292 : vector<1x256xi1> to vector<80x256xi1>
    %294 = vector.broadcast %cst_184 : f32 to vector<80x256xf32>
    %295 = arith.select %293, %291, %294 : vector<80x256xi1>, vector<80x256xf32>
    %c0_185 = arith.constant 0 : index
    %c0_186 = arith.constant 0 : index
    %c0_187 = arith.constant 0 : index
    %296 = vector.load %arg5[%c0_185, %c0_186, %c0_187] : memref<9x16x80xf32, #tpu.memory_space<vmem>>, vector<1x16x80xf32>
    %297 = vector.shape_cast %296 : vector<1x16x80xf32> to vector<16x80xf32>
    %cst_188 = arith.constant dense<0.000000e+00> : vector<16x256xf32>
    %298 = tpu.matmul %297, %295, %cst_188 {dimension_numbers = #tpu.dot_dimension_numbers<[1], [0], [0], [1], [0, 0, 1, 1], [], []>} : vector<16x80xf32>, vector<80x256xf32>, vector<16x256xf32> -> vector<16x256xf32>
    %299 = arith.addf %290, %298 : vector<16x256xf32>
    %c16_i32_189 = arith.constant 16 : i32
    %300 = tpu.dynamic_rotate %289 by %c16_i32_189 dim 1 : vector<80x256xf32>, i32 -> vector<80x256xf32>
    %cst_190 = arith.constant 0.000000e+00 : f32
    %301 = vector.shape_cast %9 : vector<1x256xi1> to vector<1x256xi1>
    %302 = vector.broadcast %301 : vector<1x256xi1> to vector<80x256xi1>
    %303 = vector.broadcast %cst_190 : f32 to vector<80x256xf32>
    %304 = arith.select %302, %300, %303 : vector<80x256xi1>, vector<80x256xf32>
    %c1_191 = arith.constant 1 : index
    %c0_192 = arith.constant 0 : index
    %c0_193 = arith.constant 0 : index
    %305 = vector.load %arg5[%c1_191, %c0_192, %c0_193] : memref<9x16x80xf32, #tpu.memory_space<vmem>>, vector<1x16x80xf32>
    %306 = vector.shape_cast %305 : vector<1x16x80xf32> to vector<16x80xf32>
    %cst_194 = arith.constant dense<0.000000e+00> : vector<16x256xf32>
    %307 = tpu.matmul %306, %304, %cst_194 {dimension_numbers = #tpu.dot_dimension_numbers<[1], [0], [0], [1], [0, 0, 1, 1], [], []>} : vector<16x80xf32>, vector<80x256xf32>, vector<16x256xf32> -> vector<16x256xf32>
    %308 = arith.addf %299, %307 : vector<16x256xf32>
    %c15_i32_195 = arith.constant 15 : i32
    %309 = tpu.dynamic_rotate %289 by %c15_i32_195 dim 1 : vector<80x256xf32>, i32 -> vector<80x256xf32>
    %cst_196 = arith.constant 0.000000e+00 : f32
    %310 = vector.shape_cast %14 : vector<1x256xi1> to vector<1x256xi1>
    %311 = vector.broadcast %310 : vector<1x256xi1> to vector<80x256xi1>
    %312 = vector.broadcast %cst_196 : f32 to vector<80x256xf32>
    %313 = arith.select %311, %309, %312 : vector<80x256xi1>, vector<80x256xf32>
    %c2_197 = arith.constant 2 : index
    %c0_198 = arith.constant 0 : index
    %c0_199 = arith.constant 0 : index
    %314 = vector.load %arg5[%c2_197, %c0_198, %c0_199] : memref<9x16x80xf32, #tpu.memory_space<vmem>>, vector<1x16x80xf32>
    %315 = vector.shape_cast %314 : vector<1x16x80xf32> to vector<16x80xf32>
    %cst_200 = arith.constant dense<0.000000e+00> : vector<16x256xf32>
    %316 = tpu.matmul %315, %313, %cst_200 {dimension_numbers = #tpu.dot_dimension_numbers<[1], [0], [0], [1], [0, 0, 1, 1], [], []>} : vector<16x80xf32>, vector<80x256xf32>, vector<16x256xf32> -> vector<16x256xf32>
    %317 = arith.addf %308, %316 : vector<16x256xf32>
    %c1_i32_201 = arith.constant 1 : i32
    %318 = tpu.dynamic_rotate %289 by %c1_i32_201 dim 1 : vector<80x256xf32>, i32 -> vector<80x256xf32>
    %cst_202 = arith.constant 0.000000e+00 : f32
    %319 = vector.shape_cast %16 : vector<1x256xi1> to vector<1x256xi1>
    %320 = vector.broadcast %319 : vector<1x256xi1> to vector<80x256xi1>
    %321 = vector.broadcast %cst_202 : f32 to vector<80x256xf32>
    %322 = arith.select %320, %318, %321 : vector<80x256xi1>, vector<80x256xf32>
    %c3_203 = arith.constant 3 : index
    %c0_204 = arith.constant 0 : index
    %c0_205 = arith.constant 0 : index
    %323 = vector.load %arg5[%c3_203, %c0_204, %c0_205] : memref<9x16x80xf32, #tpu.memory_space<vmem>>, vector<1x16x80xf32>
    %324 = vector.shape_cast %323 : vector<1x16x80xf32> to vector<16x80xf32>
    %cst_206 = arith.constant dense<0.000000e+00> : vector<16x256xf32>
    %325 = tpu.matmul %324, %322, %cst_206 {dimension_numbers = #tpu.dot_dimension_numbers<[1], [0], [0], [1], [0, 0, 1, 1], [], []>} : vector<16x80xf32>, vector<80x256xf32>, vector<16x256xf32> -> vector<16x256xf32>
    %326 = arith.addf %317, %325 : vector<16x256xf32>
    %c4_207 = arith.constant 4 : index
    %c0_208 = arith.constant 0 : index
    %c0_209 = arith.constant 0 : index
    %327 = vector.load %arg5[%c4_207, %c0_208, %c0_209] : memref<9x16x80xf32, #tpu.memory_space<vmem>>, vector<1x16x80xf32>
    %328 = vector.shape_cast %327 : vector<1x16x80xf32> to vector<16x80xf32>
    %cst_210 = arith.constant dense<0.000000e+00> : vector<16x256xf32>
    %329 = tpu.matmul %328, %289, %cst_210 {dimension_numbers = #tpu.dot_dimension_numbers<[1], [0], [0], [1], [0, 0, 1, 1], [], []>} : vector<16x80xf32>, vector<80x256xf32>, vector<16x256xf32> -> vector<16x256xf32>
    %330 = arith.addf %326, %329 : vector<16x256xf32>
    %c255_i32_211 = arith.constant 255 : i32
    %331 = tpu.dynamic_rotate %289 by %c255_i32_211 dim 1 : vector<80x256xf32>, i32 -> vector<80x256xf32>
    %cst_212 = arith.constant 0.000000e+00 : f32
    %332 = vector.shape_cast %18 : vector<1x256xi1> to vector<1x256xi1>
    %333 = vector.broadcast %332 : vector<1x256xi1> to vector<80x256xi1>
    %334 = vector.broadcast %cst_212 : f32 to vector<80x256xf32>
    %335 = arith.select %333, %331, %334 : vector<80x256xi1>, vector<80x256xf32>
    %c5_213 = arith.constant 5 : index
    %c0_214 = arith.constant 0 : index
    %c0_215 = arith.constant 0 : index
    %336 = vector.load %arg5[%c5_213, %c0_214, %c0_215] : memref<9x16x80xf32, #tpu.memory_space<vmem>>, vector<1x16x80xf32>
    %337 = vector.shape_cast %336 : vector<1x16x80xf32> to vector<16x80xf32>
    %cst_216 = arith.constant dense<0.000000e+00> : vector<16x256xf32>
    %338 = tpu.matmul %337, %335, %cst_216 {dimension_numbers = #tpu.dot_dimension_numbers<[1], [0], [0], [1], [0, 0, 1, 1], [], []>} : vector<16x80xf32>, vector<80x256xf32>, vector<16x256xf32> -> vector<16x256xf32>
    %339 = arith.addf %330, %338 : vector<16x256xf32>
    %c241_i32_217 = arith.constant 241 : i32
    %340 = tpu.dynamic_rotate %289 by %c241_i32_217 dim 1 : vector<80x256xf32>, i32 -> vector<80x256xf32>
    %cst_218 = arith.constant 0.000000e+00 : f32
    %341 = vector.shape_cast %23 : vector<1x256xi1> to vector<1x256xi1>
    %342 = vector.broadcast %341 : vector<1x256xi1> to vector<80x256xi1>
    %343 = vector.broadcast %cst_218 : f32 to vector<80x256xf32>
    %344 = arith.select %342, %340, %343 : vector<80x256xi1>, vector<80x256xf32>
    %c6_219 = arith.constant 6 : index
    %c0_220 = arith.constant 0 : index
    %c0_221 = arith.constant 0 : index
    %345 = vector.load %arg5[%c6_219, %c0_220, %c0_221] : memref<9x16x80xf32, #tpu.memory_space<vmem>>, vector<1x16x80xf32>
    %346 = vector.shape_cast %345 : vector<1x16x80xf32> to vector<16x80xf32>
    %cst_222 = arith.constant dense<0.000000e+00> : vector<16x256xf32>
    %347 = tpu.matmul %346, %344, %cst_222 {dimension_numbers = #tpu.dot_dimension_numbers<[1], [0], [0], [1], [0, 0, 1, 1], [], []>} : vector<16x80xf32>, vector<80x256xf32>, vector<16x256xf32> -> vector<16x256xf32>
    %348 = arith.addf %339, %347 : vector<16x256xf32>
    %c240_i32_223 = arith.constant 240 : i32
    %349 = tpu.dynamic_rotate %289 by %c240_i32_223 dim 1 : vector<80x256xf32>, i32 -> vector<80x256xf32>
    %cst_224 = arith.constant 0.000000e+00 : f32
    %350 = vector.shape_cast %25 : vector<1x256xi1> to vector<1x256xi1>
    %351 = vector.broadcast %350 : vector<1x256xi1> to vector<80x256xi1>
    %352 = vector.broadcast %cst_224 : f32 to vector<80x256xf32>
    %353 = arith.select %351, %349, %352 : vector<80x256xi1>, vector<80x256xf32>
    %c7_225 = arith.constant 7 : index
    %c0_226 = arith.constant 0 : index
    %c0_227 = arith.constant 0 : index
    %354 = vector.load %arg5[%c7_225, %c0_226, %c0_227] : memref<9x16x80xf32, #tpu.memory_space<vmem>>, vector<1x16x80xf32>
    %355 = vector.shape_cast %354 : vector<1x16x80xf32> to vector<16x80xf32>
    %cst_228 = arith.constant dense<0.000000e+00> : vector<16x256xf32>
    %356 = tpu.matmul %355, %353, %cst_228 {dimension_numbers = #tpu.dot_dimension_numbers<[1], [0], [0], [1], [0, 0, 1, 1], [], []>} : vector<16x80xf32>, vector<80x256xf32>, vector<16x256xf32> -> vector<16x256xf32>
    %357 = arith.addf %348, %356 : vector<16x256xf32>
    %c239_i32_229 = arith.constant 239 : i32
    %358 = tpu.dynamic_rotate %289 by %c239_i32_229 dim 1 : vector<80x256xf32>, i32 -> vector<80x256xf32>
    %cst_230 = arith.constant 0.000000e+00 : f32
    %359 = vector.shape_cast %30 : vector<1x256xi1> to vector<1x256xi1>
    %360 = vector.broadcast %359 : vector<1x256xi1> to vector<80x256xi1>
    %361 = vector.broadcast %cst_230 : f32 to vector<80x256xf32>
    %362 = arith.select %360, %358, %361 : vector<80x256xi1>, vector<80x256xf32>
    %c8_231 = arith.constant 8 : index
    %c0_232 = arith.constant 0 : index
    %c0_233 = arith.constant 0 : index
    %363 = vector.load %arg5[%c8_231, %c0_232, %c0_233] : memref<9x16x80xf32, #tpu.memory_space<vmem>>, vector<1x16x80xf32>
    %364 = vector.shape_cast %363 : vector<1x16x80xf32> to vector<16x80xf32>
    %cst_234 = arith.constant dense<0.000000e+00> : vector<16x256xf32>
    %365 = tpu.matmul %364, %362, %cst_234 {dimension_numbers = #tpu.dot_dimension_numbers<[1], [0], [0], [1], [0, 0, 1, 1], [], []>} : vector<16x80xf32>, vector<80x256xf32>, vector<16x256xf32> -> vector<16x256xf32>
    %366 = arith.addf %357, %365 : vector<16x256xf32>
    %c3_235 = arith.constant 3 : index
    %c0_236 = arith.constant 0 : index
    %c0_237 = arith.constant 0 : index
    %367 = vector.load %arg6[%c3_235, %c0_236, %c0_237] : memref<4x16x1xf32, #tpu.memory_space<vmem>>, vector<1x16x1xf32>
    %368 = vector.shape_cast %367 : vector<1x16x1xf32> to vector<16x1xf32>
    %369 = vector.broadcast %368 : vector<16x1xf32> to vector<16x256xf32>
    %370 = arith.addf %366, %369 : vector<16x256xf32>
    %cst_238 = arith.constant 0.000000e+00 : f32
    %371 = vector.broadcast %cst_238 : f32 to vector<16x256xf32>
    %372 = arith.maximumf %370, %371 : vector<16x256xf32>
    %c80 = arith.constant 80 : index
    %c0_239 = arith.constant 0 : index
    %373 = vector.load %arg10[%c80, %c0_239] : memref<96x256xf32, #tpu.memory_space<vmem>>, vector<16x256xf32>
    tpu.vector_store %arg10[%c80, %c0_239], %372 {strides = array<i32>} : memref<96x256xf32, #tpu.memory_space<vmem>>, vector<16x256xf32>,
    %c0_240 = arith.constant 0 : index
    %c0_241 = arith.constant 0 : index
    %374 = vector.load %arg7[%c0_240, %c0_241] : memref<32x96xf32, #tpu.memory_space<vmem>>, vector<32x96xf32>
    %c0_242 = arith.constant 0 : index
    %c0_243 = arith.constant 0 : index
    %375 = vector.load %arg10[%c0_242, %c0_243] : memref<96x256xf32, #tpu.memory_space<vmem>>, vector<96x256xf32>
    %cst_244 = arith.constant dense<0.000000e+00> : vector<32x256xf32>
    %376 = tpu.matmul %374, %375, %cst_244 {dimension_numbers = #tpu.dot_dimension_numbers<[1], [0], [0], [1], [0, 0, 1, 1], [], []>} : vector<32x96xf32>, vector<96x256xf32>, vector<32x256xf32> -> vector<32x256xf32>
    %c0_245 = arith.constant 0 : index
    %c0_246 = arith.constant 0 : index
    %377 = vector.load %arg8[%c0_245, %c0_246] : memref<32x1xf32, #tpu.memory_space<vmem>>, vector<32x1xf32>
    %378 = vector.broadcast %377 : vector<32x1xf32> to vector<32x256xf32>
    %379 = arith.addf %376, %378 : vector<32x256xf32>
    %c0_247 = arith.constant 0 : index
    %c0_248 = arith.constant 0 : index
    %380 = vector.load %arg10[%c0_247, %c0_248] : memref<96x256xf32, #tpu.memory_space<vmem>>, vector<32x256xf32>
    %381 = arith.addf %379, %380 : vector<32x256xf32>
    %c0_249 = arith.constant 0 : index
    %c0_250 = arith.constant 0 : index
    %c0_251 = arith.constant 0 : index
    %382 = vector.load %arg9[%c0_249, %c0_250, %c0_251] : memref<1x32x256xf32, #tpu.memory_space<vmem>>, vector<1x32x256xf32>
    %383 = vector.shape_cast %382 : vector<1x32x256xf32> to vector<32x256xf32>
    %384 = vector.shape_cast %381 : vector<32x256xf32> to vector<1x32x256xf32>
    tpu.vector_store %arg9[%c0_249, %c0_250, %c0_251], %384 {strides = array<i32>} : memref<1x32x256xf32, #tpu.memory_space<vmem>>, vector<1x32x256xf32>,
    return
  }
  func.func @transform_0(%arg0: i32) -> (i32, i32, i32) {
    %c0_i32 = arith.constant 0 : i32
    %c0_i32_0 = arith.constant 0 : i32
    %c0_i32_1 = arith.constant 0 : i32
    return %arg0, %c0_i32, %c0_i32_0 : i32, i32, i32
  }
  func.func @transform_1(%arg0: i32) -> (i32, i32, i32) {
    %c0_i32 = arith.constant 0 : i32
    %c0_i32_0 = arith.constant 0 : i32
    %c0_i32_1 = arith.constant 0 : i32
    %c0_i32_2 = arith.constant 0 : i32
    return %c0_i32, %c0_i32_0, %c0_i32_1 : i32, i32, i32
  }
  func.func @transform_2(%arg0: i32) -> (i32, i32, i32) {
    %c0_i32 = arith.constant 0 : i32
    %c0_i32_0 = arith.constant 0 : i32
    %c0_i32_1 = arith.constant 0 : i32
    %c0_i32_2 = arith.constant 0 : i32
    return %c0_i32, %c0_i32_0, %c0_i32_1 : i32, i32, i32
  }
  func.func @transform_3(%arg0: i32) -> (i32, i32, i32) {
    %c0_i32 = arith.constant 0 : i32
    %c0_i32_0 = arith.constant 0 : i32
    %c0_i32_1 = arith.constant 0 : i32
    %c0_i32_2 = arith.constant 0 : i32
    return %c0_i32, %c0_i32_0, %c0_i32_1 : i32, i32, i32
  }
  func.func @transform_4(%arg0: i32) -> (i32, i32, i32) {
    %c0_i32 = arith.constant 0 : i32
    %c0_i32_0 = arith.constant 0 : i32
    %c0_i32_1 = arith.constant 0 : i32
    %c0_i32_2 = arith.constant 0 : i32
    return %c0_i32, %c0_i32_0, %c0_i32_1 : i32, i32, i32
  }
  func.func @transform_5(%arg0: i32) -> (i32, i32, i32) {
    %c0_i32 = arith.constant 0 : i32
    %c0_i32_0 = arith.constant 0 : i32
    %c0_i32_1 = arith.constant 0 : i32
    %c0_i32_2 = arith.constant 0 : i32
    return %c0_i32, %c0_i32_0, %c0_i32_1 : i32, i32, i32
  }
  func.func @transform_6(%arg0: i32) -> (i32, i32) {
    %c0_i32 = arith.constant 0 : i32
    %c0_i32_0 = arith.constant 0 : i32
    %c0_i32_1 = arith.constant 0 : i32
    return %c0_i32, %c0_i32_0 : i32, i32
  }
  func.func @transform_7(%arg0: i32) -> (i32, i32) {
    %c0_i32 = arith.constant 0 : i32
    %c0_i32_0 = arith.constant 0 : i32
    %c0_i32_1 = arith.constant 0 : i32
    return %c0_i32, %c0_i32_0 : i32, i32
  }
  func.func @transform_8(%arg0: i32) -> (i32, i32, i32) {
    %c0_i32 = arith.constant 0 : i32
    %c0_i32_0 = arith.constant 0 : i32
    %c0_i32_1 = arith.constant 0 : i32
    return %arg0, %c0_i32, %c0_i32_0 : i32, i32, i32
  }
}

</mosaic_0001>

<bundles_post_ra>
// kernel: tpu_custom_call.1
= control target key start
LH: loop header
LB: loop body
LE: loop exit
PB: predicated region body
PF: predicated region fallthrough
CT: control target
= control target key end

     0   :  { %13 = vsyncpa [#allocation4], 0  ;;  %s11504_s0 = inlined_call_operand.hbm [shape: f32[2,32,256], index: 0, kind: input, shape index: {}]   ;;  %s11505_s1 = inlined_call_operand.hbm [shape: f32[9,16,32], index: 1, kind: input, shape index: {}]   ;;  %s11506_s2 = inlined_call_operand.hbm [shape: f32[9,16,48], index: 2, kind: input, shape index: {}]   ;;  %s11507_s3 = inlined_call_operand.hbm [shape: f32[9,16,64], index: 3, kind: input, shape index: {}]   ;;  %s11508_s4 = inlined_call_operand.hbm [shape: f32[9,16,80], index: 4, kind: input, shape index: {}]   ;;  %s11509_s5 = inlined_call_operand.vmem [shape: f32[4,16,1], index: 5, kind: input, shape index: {}]   ;;  %s11510_s6 = inlined_call_operand.vmem [shape: f32[32,96], index: 6, kind: input, shape index: {}]   ;;  %s11511_s7 = inlined_call_operand.vmem [shape: f32[32,1], index: 7, kind: input, shape index: {}]   ;;  %s11512_s8 = inlined_call_operand.hbm [shape: f32[2,32,256], index: 8, kind: output, shape index: {}]  }
   0x1   :  { %15 = vsyncpa [#allocation4 + $0x1], 0 }
   0x2   :  { %16 = vsyncpa [#allocation7], 0 }
   0x3   :  { %17 = vsyncpa [#allocation10], 0 }
   0x4   :  { %18 = vsyncpa [#allocation5], 0 }
   0x5   :  { %20 = vsyncpa [#allocation5 + $0x1], 0  ;;  %s8807_s27 = smov 0   ;;  %s8809_s28 = smov 0  }
   0x6   :  { %s8811_s29 = smov 0   ;;  %s8813_s30 = smov 0  }
   0x7 LB: > { %11528 = sst [smem:[#allocation17_spill]] %s8727_s27  ;;  %s8828_s9 = sadd.s32 4294967295, %s8739_s30   ;;  %s8739_s30 = sphi %s8813_s30, %s11904_s30   ;;  %s8735_s29 = sphi %s8811_s29, %s11903_s29   ;;  %s8731_s28 = sphi %s8809_s28, %s11902_s28   ;;  %s8727_s27 = sphi %s8807_s27, %s11901_s27  }
   0x8   : > { %s5917_s10 = sadd.s32 4294967294, %s8739_s30   ;;  %p46_p0 = scmp.ne.s32.totalorder %s8731_s28, %s8727_s27 }
   0x9   : > { %p11513_p1 = scmp.eq.s32.totalorder %s8828_s9, 0  ;;  %p223_p3 = scmp.eq.s32.totalorder %s5917_s10, 1 }
   0xa   : > { %p5918_p5 = scmp.ge.s32.totalorder %s8739_s30, 1  ;;  %p230_p7 = scmp.lt.s32.totalorder %s8739_s30, 3 }
   0xb   : > { %p8837_p4 = por %p11513_p1, %p46_p0  ;;  %p8842_p6 = por %p223_p3, %p46_p0 }
   0xc   : > { %p8847_p8 = pnand %p5918_p5, %p230_p7  ;;  %s8741_s14 = smov [#allocation6]  }
   0xd   : > { %s11529_s11 = scalar_select %p8837_p4, 1, 0 }
   0xe   : > { %s11530_s12 = scalar_select %p8842_p6, 1, 0 }
   0xf   : > { %s11532_s13 = scalar_select %p8847_p8, 1, 0 }
  0x10   : > { %11531 = sst [smem:[#allocation18_spill]] %s11530_s12  ;;  %s242_s15 = sshll.u32 %s8741_s14, 4  ;;  %s8851_s15 = int_to_ptr.vmem [resolvable:$true] %s242_s15 }
  0x11   : > { %p7287_p9 = pneg %p8847_p8  ;;  %s8742_s17 = smov [#allocation9]  }
  0x12   : > { %s268_s18 = sshll.u32 %s8742_s17, 4  ;;  %s8743_s19 = smov [#allocation8]   ;;  %s8862_s18 = int_to_ptr.vmem [resolvable:$true] %s268_s18 }
  0x13   : > { %p8858_p11 = pnand %p7287_p9, %p11513_p1  ;;  %s8864_s20 = sshll.u32 %s8743_s19, 4  ;;  %s256_s20 = int_to_ptr.vmem [resolvable:$true] %s8864_s20 }
  0x14   : > { %s8523_s23 = scalar_lea.hbm %s11505_s1, 2304 }
  0x15   : > { %p8524_p12 = scmp.ne.s32.totalorder %s11505_s1, %s8523_s23  ;;  %p8874_p13 = pneg %p8858_p11 }
  0x16   : > { %p8530_p5 = scmp.lt.u32.totalorder %s8523_s23, %s11505_s1 }
  0x17   : > { %p8526_p0 = pnand %p8874_p13, %p8524_p12 }
  0x19   : > { %p8527_p3 = pneg %p8526_p0 }
  0x1b   : > { %p8532_p7 = pnand %p8530_p5, %p8527_p3 }
  0x1d   : > { %8535 = shalt.err (!%p8532_p7)
}
  0x1e   : > { %s8536_s17 = scalar_lea.vmem %s8851_s15, 2304  ;;  %p8544_p2 = scmp.lt.s32.totalorder %s8851_s15, %s8851_s15 }
  0x1f   : > { %p8537_p9 = scmp.ne.s32.totalorder %s8851_s15, %s8536_s17  ;;  %p8545_p6 = scmp.lt.s32.totalorder %s8536_s17, %s8536_s17 }
  0x21   : > { %p8539_p10 = pnand %p8537_p9, %p8874_p13  ;;  %p8546_p12 = por %p8545_p6, %p8544_p2 }
  0x23   : > { %p8540_p1 = pneg %p8539_p10 }
  0x25   : > { %p8547_p0 = pnand %p8546_p12, %p8540_p1 }
  0x27   : > { %8550 = shalt.err (!%p8547_p0)
}
  0x28   : > { %s8744_s19 = smov 128   ;;  %s8745_s21 = smov 8  }
  0x29   : > { %7290 = dma.hbm_to_vmem [thread:$0]  (!%p8858_p11), %s11505_s1, 2304, %s8851_s15, [#allocation7], %s8744_s19, %s8744_s19, %s8745_s21  }
  0x2a   : > { %s8551_s10 = scalar_lea.hbm %s11507_s3, 2304 }
  0x2b   : > { %p8552_p1 = scmp.ne.s32.totalorder %s11507_s3, %s8551_s10  ;;  %p8558_p10 = scmp.lt.u32.totalorder %s8551_s10, %s11507_s3 }
  0x2d   : > { %p8554_p2 = pnand %p8552_p1, %p8874_p13 }
  0x2f   : > { %p8555_p6 = pneg %p8554_p2 }
  0x31   : > { %p8560_p3 = pnand %p8558_p10, %p8555_p6 }
  0x33   : > { %8563 = shalt.err (!%p8560_p3)
}
  0x34   : > { %s8564_s15 = scalar_lea.vmem %s8862_s18, 2304  ;;  %p8572_p12 = scmp.lt.s32.totalorder %s8862_s18, %s8862_s18 }
  0x35   : > { %p8565_p5 = scmp.ne.s32.totalorder %s8862_s18, %s8564_s15  ;;  %p8573_p0 = scmp.lt.s32.totalorder %s8564_s15, %s8564_s15 }
  0x37   : > { %p8567_p7 = pnand %p8565_p5, %p8874_p13  ;;  %p8574_p1 = por %p8573_p0, %p8572_p12 }
  0x39   : > { %p8568_p9 = pneg %p8567_p7 }
  0x3b   : > { %p8575_p2 = pnand %p8574_p1, %p8568_p9 }
  0x3d   : > { %8578 = shalt.err (!%p8575_p2)
}
  0x3e   : > { %7296 = dma.hbm_to_vmem [thread:$0]  (!%p8858_p11), %s11507_s3, 2304, %s8862_s18, [#allocation10], %s8744_s19, %s8744_s19, %s8745_s21  }
  0x3f   : > { %s8579_s24 = scalar_lea.hbm %s11506_s2, 2304 }
  0x40   : > { %p8580_p6 = scmp.ne.s32.totalorder %s11506_s2, %s8579_s24  ;;  %p8586_p5 = scmp.lt.u32.totalorder %s8579_s24, %s11506_s2 }
  0x42   : > { %p8582_p10 = pnand %p8580_p6, %p8874_p13 }
  0x44   : > { %p8583_p3 = pneg %p8582_p10 }
  0x46   : > { %p8588_p7 = pnand %p8586_p5, %p8583_p3 }
  0x48   : > { %8591 = shalt.err (!%p8588_p7)
}
  0x49   : > { %s8592_s15 = scalar_lea.vmem %s256_s20, 2304  ;;  %p8600_p1 = scmp.lt.s32.totalorder %s256_s20, %s256_s20 }
  0x4a   : > { %p8593_p9 = scmp.ne.s32.totalorder %s256_s20, %s8592_s15  ;;  %p8601_p2 = scmp.lt.s32.totalorder %s8592_s15, %s8592_s15 }
  0x4c   : > { %p8595_p12 = pnand %p8593_p9, %p8874_p13  ;;  %p8602_p4 = por %p8601_p2, %p8600_p1 }
  0x4e   : > { %p8596_p0 = pneg %p8595_p12 }
  0x50   : > { %p8603_p8 = pnand %p8602_p4, %p8596_p0 }
  0x52   : > { %8606 = shalt.err (!%p8603_p8)
}
  0x53   : > { %7293 = dma.hbm_to_vmem [thread:$0]  (!%p8858_p11), %s11506_s2, 2304, %s256_s20, [#allocation7], %s8744_s19, %s8744_s19, %s8745_s21  }
  0x54   : > { %s8746_s12 = smov [#allocation11]   ;;  %s8607_s25 = scalar_lea.hbm %s11508_s4, 2304 }
  0x55   : > { %s281_s22 = sshll.u32 %s8746_s12, 4  ;;  %p8608_p4 = scmp.ne.s32.totalorder %s11508_s4, %s8607_s25  ;;  %s282_s22 = int_to_ptr.vmem [resolvable:$true] %s281_s22 }
  0x56   : > { %p8614_p10 = scmp.lt.u32.totalorder %s8607_s25, %s11508_s4 }
  0x57   : > { %p8610_p8 = pnand %p8608_p4, %p8874_p13 }
  0x59   : > { %p8611_p6 = pneg %p8610_p8 }
  0x5b   : > { %p8616_p3 = pnand %p8614_p10, %p8611_p6 }
  0x5d   : > { %8619 = shalt.err (!%p8616_p3)
}
  0x5e   : > { %s8620_s20 = scalar_lea.vmem %s282_s22, 2304  ;;  %p8628_p12 = scmp.lt.s32.totalorder %s282_s22, %s282_s22 }
  0x5f   : > { %p8621_p5 = scmp.ne.s32.totalorder %s282_s22, %s8620_s20  ;;  %p8629_p0 = scmp.lt.s32.totalorder %s8620_s20, %s8620_s20 }
  0x61   : > { %p8623_p7 = pnand %p8621_p5, %p8874_p13  ;;  %p8630_p1 = por %p8629_p0, %p8628_p12 }
  0x63   : > { %p8624_p9 = pneg %p8623_p7 }
  0x65   : > { %p8631_p2 = pnand %p8630_p1, %p8624_p9 }
  0x67   : > { %8634 = shalt.err (!%p8631_p2)
}
  0x68   : > { %7299 = dma.hbm_to_vmem [thread:$0]  (!%p8858_p11), %s11508_s4, 2304, %s282_s22, [#allocation10], %s8744_s19, %s8744_s19, %s8745_s21  }
  0x69   : > { %s8968_s26 = sadd.s32 1, %s8739_s30   ;;  %s33_s16 = sadd.s32 1, %s8735_s29 }
  0x6a   : > { %s30_s12 = ssub.s32 %s8739_s30, %s8968_s26  ;;  %p40_p13 = scmp.ne.s32.totalorder %s8735_s29, %s8731_s28 }
  0x6b   : > { %p31_p4 = scmp.eq.s32.totalorder %s30_s12, 0  ;;  %p41_p8 = scmp.eq.s32.totalorder %s8739_s30, 0 }
  0x6c   : > { %p11535_p6 = scmp.eq.s32.totalorder %s8828_s9, 1  ;;  %p7312_p3 = scmp.lt.s32.totalorder %s8739_s30, 2 }
  0x6d   : > { %s8984_s24 = scalar_select %p31_p4, %s8735_s29, %s33_s16  }
  0x6e   : > { %p8978_p10 = por %p11535_p6, %p40_p13  ;;  %p42_p5 = por %p41_p8, %p40_p13 }
  0x6f   : > { %s304_s25 = sand.u32 1, %s8735_s29   ;;  %s6413_s19 = sshll.u32 %s8739_s30, 10 }
  0x70   : > { %s5924_s10 = sshll.u32 %s304_s25, 6  ;;  %s8991_s14 = scalar_lea.hbm %s11504_s0, %s6413_s19 }
  0x71   : > { %s308_s17 = scalar_lea.vmem [#allocation3], %s5924_s10  ;;  %p8995_p11 = pnand %p7312_p3, %p42_p5 }
  0x72   : > { %s315_s15 = sshll.u32 %s308_s17, 4  ;;  %s8999_s18 = scalar_lea.sflag [#allocation4], %s304_s25  ;;  %s8993_s15 = int_to_ptr.vmem [resolvable:$true] %s315_s15 }
  0x73   : > { %s8635_s27 = scalar_lea.hbm %s8991_s14, 1024  ;;  %p8637_p9 = pneg %p8995_p11 }
  0x74   : > { %p8636_p7 = scmp.ne.s32.totalorder %s8991_s14, %s8635_s27  ;;  %s8640_s10 = scalar_lea.hbm %s11504_s0, 2048 }
  0x75   : > { %p8641_p1 = scmp.lt.u32.totalorder %s8991_s14, %s11504_s0  ;;  %p8642_p2 = scmp.lt.u32.totalorder %s8640_s10, %s8635_s27 }
  0x76   : > { %p8638_p12 = pnand %p8637_p9, %p8636_p7  ;;  %p8644_p4 = scmp.lt.u32.totalorder %s8635_s27, %s8991_s14 }
  0x77   : > { %p8643_p13 = por %p8642_p2, %p8641_p1 }
  0x78   : > { %p8639_p0 = pneg %p8638_p12 }
  0x79   : > { %p8645_p8 = por %p8644_p4, %p8643_p13 }
  0x7b   : > { %p8646_p6 = pnand %p8645_p8, %p8639_p0 }
  0x7d   : > { %8649 = shalt.err (!%p8646_p6)
}
  0x7e   : > { %s8650_s25 = scalar_lea.vmem %s8993_s15, 1024  ;;  %s8747_s22 = smov [#allocation3]  }
  0x7f   : > { %p8651_p3 = scmp.ne.s32.totalorder %s8993_s15, %s8650_s25  ;;  %s8655_s17 = sshll.u32 %s8747_s22, 4  ;;  %s8656_s17 = int_to_ptr.vmem [resolvable:$false] %s8655_s17 }
  0x80   : > { %s8657_s16 = scalar_lea.vmem %s8656_s17, 2048  ;;  %p8658_p12 = scmp.lt.s32.totalorder %s8993_s15, %s8656_s17 }
  0x81   : > { %p8653_p5 = pnand %p8651_p3, %p8637_p9  ;;  %p8659_p1 = scmp.lt.s32.totalorder %s8657_s16, %s8650_s25 }
  0x83   : > { %p8654_p7 = pneg %p8653_p5  ;;  %p8660_p2 = por %p8659_p1, %p8658_p12 }
  0x85   : > { %p8661_p13 = pnand %p8660_p2, %p8654_p7 }
  0x87   : > { %8664 = shalt.err (!%p8661_p13)
}
  0x88   : > { %s8748_s27 = smov 256   ;;  %s8749_s12 = smov 16  }
  0x89   : > { %7303 = dma.hbm_to_vmem [thread:$0]  (!%p8995_p11), %s8991_s14, 1024, %s8993_s15, %s8999_s18, %s8748_s27, %s8748_s27, %s8749_s12  }
  0x8a   : > { %p11538_p9 = scmp.ne.s32.totalorder %s11532_s13, 0 }
  0x8b   : > { %s9030_s10 = sand.u32 (!%p11538_p9), 1, %s8731_s28   ;;  %p11539_p0 = scmp.ne.s32.totalorder (!%p11538_p9), %s11529_s11, 0 }
  0x8c   : > { %327 = sbr.rel (%p11538_p9) target bundleno = 2241 (0x8c1), region = 52  ;;  %s5928_s19 = sshll.u32 (!%p11538_p9), %s9030_s10, 6 }
  0x8d   : > { %s330_s21 = scalar_lea.sflag (!%p11538_p9), [#allocation4], %s9030_s10  ;;  %s9036_s25 = scalar_lea.vmem (!%p11538_p9), [#allocation3], %s5928_s19 }
  0x93   : > { %8710 = dma.done.wait (%p11539_p0), %s330_s21, 1024  }
  0x94   : > { %8712 = vsyncadd (%p11539_p0), %s330_s21, 4294966272  ;;  %p11540_p11 = scmp.eq.s32.totalorder %s8828_s9, 0 }
  0x96   : > { %8714 = dma.done.wait (%p11540_p11), [#allocation7], 4608   ;;  %p11541_p4 = pmov %p11540_p11 }
  0x98   : > { %8716 = vsyncadd (%p11541_p4), [#allocation7], 4294962688  ;;  %p11542_p8 = pmov %p11541_p4 }
  0x99   : > { %p11543_p6 = pmov %p11541_p4 }
  0x9a   : > { %8718 = dma.done.wait (%p11542_p8), [#allocation10], 4608  }
  0x9b   : > { %8720 = vsyncadd (%p11543_p6), [#allocation10], 4294962688  ;;  %v9051_v0 = vld [vmem:[%s9036_s25 + $0x20] sm:$0xff]  ;;  %v9054_v1 = vld [vmem:[%s9036_s25 + $0x30] sm:$0xff]  ;;  %s8750_s11 = smov 16   ;;  %v8751_v12 = vmov 0.0   ;;  %v382_v16 = vlaneseq }
  0x9c   : > { %v9057_v2 = vld [vmem:[%s9036_s25] sm:$0xff]  ;;  %v9061_v3 = vpack.i.bf16 %v9054_v1, %v9051_v0  ;;  %v9064_v4 = vld [vmem:[%s9036_s25 + $0x10] sm:$0xff]  ;;  %v9067_v5 = vld [vmem:[%s9036_s25 + $0x28] sm:$0xff]  ;;  %577 = vmatprep.mubr.f32.mxu0 %v8751_v12  ;;  %1733 = vmatprep.mubr.f32.mxu1 %v8751_v12  ;;  %s8752_s13 = smov 17   ;;  %s8753_s14 = smov 15   ;;  %v8759_v15 = vmov 0  }
  0x9d   : > { %v9070_v6 = vld [vmem:[%s9036_s25 + $0x38] sm:$0xff]  ;;  %v9074_v7 = vpack.i.bf16 %v9064_v4, %v9057_v2  ;;  %v9077_v8 = vld [vmem:[%s9036_s25 + $0x8] sm:$0xff]  ;;  %s8754_s15 = smov 1   ;;  %s8755_s20 = smov 127   ;;  %v1525_v13 = vld [vmem:[%s11509_s5] sm:$0xff]  ;;  %7529 = vset.pattern.permute.xlu0 %v8759_v15  ;;  %7530 = vset.pattern.permute.xlu1 %v8759_v15  ;;  %v9162_v18 = vand.u32 127, %v382_v16 }
  0x9e   : > { %v9080_v9 = vld [vmem:[%s9036_s25 + $0x18] sm:$0xff]  ;;  %7380 = vrot.lane.b32.xlu1 %v9061_v3, %s8750_s11  ;;  %v9086_v10 = vpack.i.bf16 %v9070_v6, %v9067_v5  ;;  %s8756_s18 = smov 113   ;;  %s8757_s22 = smov 112   ;;  %v1526_v14 = vld [vmem:[%s11509_s5 + $0x8] sm:$0xff]  ;;  %vm506_vm8 = vcmask 261120   ;;  %v5500_v42 = vld [vmem:[#allocation11 + $0x80] sm:$0xff] }
  0x9f   : > { %7370 = vrot.lane.b32.xlu0 %v9074_v7, %s8750_s11  ;;  %v9092_v11 = vpack.i.bf16 %v9080_v9, %v9077_v8  ;;  %s8758_s17 = smov 111   ;;  %v9165_v22 = vadd.s32 128, %v9162_v18  ;;  %vm11524_vm0 = vcmp.lt.s32.totalorder %v9162_v18, 16  ;;  %vm387_vm1 = vcmp.ge.s32.totalorder %v9162_v18, 16  ;;  %v4731_v15 = vld [vmem:[#allocation11 + $0x38] sm:$0xff]  ;;  %s11436_s12 = scalar_lea.vmem [#allocation12], %s5928_s19 }
  0xa0   : > { %v385_v27 = vand.u32 15, %v9162_v18  ;;  %vm11523_vm2 = vcmp.lt.s32.totalorder %v9162_v18, 17  ;;  %vm9187_vm3 = vmpackc.low %vm387_vm1, %vm387_vm1  ;;  %vm11519_vm9 = vcmp.lt.s32.totalorder %v9162_v18, 15  ;;  %vm11518_vm15 = vcmp.lt.s32.totalorder %v9162_v18, 1  ;;  %s5806_s19 = sshll.u32 %s11436_s12, 4  ;;  %s6414_s21 = sshll.u32 %s8828_s9, 10  ;;  %s11450_s19 = int_to_ptr.vmem [resolvable:$true] %s5806_s19 }
  0xa1   : > { %v386_v34 = vand.u32 15, %v9165_v22  ;;  %s8665_s9 = scalar_lea.vmem %s11450_s19, 1024 }
  0xa2   : > { %7385 = vrot.lane.b32.xlu1 %v9086_v10, %s8750_s11  ;;  %vm9193_vm4 = vcmp.ge.s32.totalorder %v385_v27, 1  ;;  %vm9257_vm12 = vcmp.lt.s32.totalorder %v385_v27, 15  ;;  %p8666_p3 = scmp.ne.s32.totalorder %s11450_s19, %s8665_s9 }
  0xa3   : > { %7375 = vrot.lane.b32.xlu0 %v9092_v11, %s8750_s11  ;;  %vm9201_vm5 = vcmp.ge.s32.totalorder %v386_v34, 1  ;;  %vm9219_vm6 = vmand %vm387_vm1, %vm9193_vm4  ;;  %vm9250_vm11 = vcmp.lt.s32.totalorder %v386_v34, 15 }
  0xa4   : > { %vm9226_vm7 = vmpackc.low %vm9201_vm5, %vm9201_vm5  ;;  %p8667_p5 = pnand %p8666_p3, %p8978_p10 }
  0xa5   : > { %vm9246_vm10 = vmpackc.low %vm9219_vm6, %vm9219_vm6 }
  0xa6   : > { %7395 = vrot.lane.b32.xlu1 %v9092_v11, %s8752_s13  ;;  %vm9277_vm13 = vmpackc.low %vm9250_vm11, %vm9250_vm11  ;;  %p8668_p7 = pneg %p8667_p5 }
  0xa7   : > { %7390 = vrot.lane.b32.xlu0 %v9074_v7, %s8752_s13  ;;  %vm395_vm14 = vmand %vm387_vm1, %vm9257_vm12 }
  0xa8   : > { %vm9300_vm1 = vmpackc.low %vm395_vm14, %vm395_vm14  ;;  %vm11521_vm14 = vcmp.lt.s32.totalorder %v9162_v18, 113 }
  0xa9   : > { %vm9328_vm6 = vmpackc.low %vm9193_vm4, %vm9193_vm4  ;;  %vm11520_vm4 = vcmp.lt.s32.totalorder %v9162_v18, 127 }
  0xaa   : > { %7405 = vrot.lane.b32.xlu1 %v9086_v10, %s8752_s13 }
  0xab   : > { %7400 = vrot.lane.b32.xlu0 %v9061_v3, %s8752_s13 }
  0xae   : > { %7415 = vrot.lane.b32.xlu1 %v9092_v11, %s8753_s14 }
  0xaf   : > { %7410 = vrot.lane.b32.xlu0 %v9074_v7, %s8753_s14 }
  0xb2   : > { %7425 = vrot.lane.b32.xlu1 %v9086_v10, %s8753_s14 }
  0xb3   : > { %7420 = vrot.lane.b32.xlu0 %v9061_v3, %s8753_s14 }
  0xb6   : > { %7435 = vrot.lane.b32.xlu1 %v9092_v11, %s8754_s15 }
  0xb7   : > { %7430 = vrot.lane.b32.xlu0 %v9074_v7, %s8754_s15 }
  0xba   : > { %7445 = vrot.lane.b32.xlu1 %v9086_v10, %s8754_s15 }
  0xbb   : > { %7440 = vrot.lane.b32.xlu0 %v9061_v3, %s8754_s15 }
  0xbe   : > { %7455 = vrot.lane.b32.xlu1 %v9092_v11, %s8755_s20 }
  0xbf   : > { %7450 = vrot.lane.b32.xlu0 %v9074_v7, %s8755_s20 }
  0xc2   : > { %7465 = vrot.lane.b32.xlu1 %v9086_v10, %s8755_s20 }
  0xc3   : > { %7460 = vrot.lane.b32.xlu0 %v9061_v3, %s8755_s20 }
  0xc6   : > { %7475 = vrot.lane.b32.xlu1 %v9092_v11, %s8756_s18 }
  0xc7   : > { %7470 = vrot.lane.b32.xlu0 %v9074_v7, %s8756_s18 }
  0xca   : > { %7485 = vrot.lane.b32.xlu1 %v9086_v10, %s8756_s18 }
  0xcb   : > { %7480 = vrot.lane.b32.xlu0 %v9061_v3, %s8756_s18 }
  0xce   : > { %7495 = vrot.lane.b32.xlu1 %v9092_v11, %s8757_s22 }
  0xcf   : > { %7490 = vrot.lane.b32.xlu0 %v9074_v7, %s8757_s22 }
  0xd2   : > { %7505 = vrot.lane.b32.xlu1 %v9086_v10, %s8757_s22 }
  0xd3   : > { %7500 = vrot.lane.b32.xlu0 %v9061_v3, %s8757_s22 }
  0xd6   : > { %7515 = vrot.lane.b32.xlu1 %v9092_v11, %s8758_s17 }
  0xd7   : > { %7510 = vrot.lane.b32.xlu0 %v9074_v7, %s8758_s17 }
  0xda   : > { %7525 = vrot.lane.b32.xlu1 %v9086_v10, %s8758_s17 }
  0xdb   : > { %7520 = vrot.lane.b32.xlu0 %v9061_v3, %s8758_s17 }
  0xde   : > { %1534 = vperm.xlu1 %7530, %v1526_v14  }
  0xdf   : > { %1529 = vperm.xlu0 %7529, %v1525_v13  }
  0xe2   : > { %7532 = vrot.lane.b32.xlu1 %v9074_v7, %s8750_s11 }
  0xe3   : > { %7537 = vrot.lane.b32.xlu0 %v9092_v11, %s8750_s11 }
  0xe6   : > { %7542 = vrot.lane.b32.xlu1 %v9061_v3, %s8750_s11 }
  0xe7   : > { %7547 = vrot.lane.b32.xlu0 %v9086_v10, %s8750_s11 }
 0x110   : > { %v7381_v17 = vpop.permute.xlu1 %7380 }
 0x111   : > { %v7371_v19 = vpop.permute.xlu0 %7370  ;;  %v7383_v20 = vunpack.i.h.bf16 %v7381_v17  ;;  %v7382_v21 = vunpack.i.l.bf16 %v7381_v17 }
 0x112   : > { %v7373_v28 = vunpack.i.h.bf16 %v7371_v19  ;;  %v7372_v29 = vunpack.i.l.bf16 %v7371_v19 }
 0x114   : > { %v7386_v23 = vpop.permute.xlu1 %7385 }
 0x115   : > { %v7388_v24 = vunpack.i.h.bf16 %v7386_v23  ;;  %v7387_v25 = vunpack.i.l.bf16 %v7386_v23  ;;  %v7376_v26 = vpop.permute.xlu0 %7375 }
 0x116   : > { %v7378_v30 = vunpack.i.h.bf16 %v7376_v26  ;;  %v7377_v31 = vunpack.i.l.bf16 %v7376_v26 }
 0x117   : > { %v485_v32 = vsel %vm11524_vm0, %v7382_v21, %v7387_v25  ;;  %v486_v33 = vsel %vm11524_vm0, %v7383_v20, %v7388_v24  ;;  %v489_v49 = vsel %vm11524_vm0, %v7387_v25, %v7382_v21  ;;  %v490_v50 = vsel %vm11524_vm0, %v7388_v24, %v7383_v20  ;;  %v504_v21 = vld [vmem:[#allocation6 + $0x10] sm:$0xff] }
 0x118   : > { %v483_v35 = vsel %vm11524_vm0, %v7372_v29, %v7377_v31  ;;  %v484_v36 = vsel %vm11524_vm0, %v7373_v28, %v7378_v30  ;;  %v487_v37 = vsel %vm11524_vm0, %v7377_v31, %v7372_v29  ;;  %v488_v38 = vsel %vm11524_vm0, %v7378_v30, %v7373_v28  ;;  %v7396_v39 = vpop.permute.xlu1 %7395 }
 0x119   : > { %v6415_v40 = vpack.c.bf16 %v484_v36, %v483_v35  ;;  %v6417_v41 = vpack.c.bf16 %v488_v38, %v487_v37  ;;  %v7398_v43 = vunpack.i.h.bf16 %v7396_v39  ;;  %v7397_v44 = vunpack.i.l.bf16 %v7396_v39  ;;  %v7391_v45 = vpop.permute.xlu0 %7390  ;;  %v505_v39 = vld [vmem:[#allocation6 + $0x18] sm:$0xff] }
 0x11a   : > { %v7393_v46 = vunpack.i.h.bf16 %v7391_v45  ;;  %v7392_v47 = vunpack.i.l.bf16 %v7391_v45  ;;  %v6420_v51 = vpack.c.bf16 %v486_v33, %v485_v32  ;;  %v6422_v63 = vpack.c.bf16 %v490_v50, %v489_v49 }
 0x11b   : > { %6416 = vmatprep.subr.bf16.mxu0 %v6415_v40 }
 0x11c   : > { %6419 = vmatpush1.bf16.msk.msra.mxu0 %vm9187_vm3, %v6417_v41  ;;  %v445_v53 = vsel %vm11523_vm2, %v7393_v46, %v7398_v43  ;;  %v449_v54 = vsel %vm11523_vm2, %v7398_v43, %v7393_v46  ;;  %v444_v55 = vsel %vm11523_vm2, %v7392_v47, %v7397_v44  ;;  %v7406_v56 = vpop.permute.xlu1 %7405  ;;  %v448_v57 = vsel %vm11523_vm2, %v7397_v44, %v7392_v47 }
 0x11d   : > { %6421 = vmatprep.subr.bf16.mxu0 %v6420_v51  ;;  %v7408_v58 = vunpack.i.h.bf16 %v7406_v56  ;;  %v7407_v59 = vunpack.i.l.bf16 %v7406_v56  ;;  %v7401_v60 = vpop.permute.xlu0 %7400  ;;  %v6425_v61 = vpack.c.bf16 %v445_v53, %v444_v55  ;;  %v6428_v16 = vpack.c.bf16 %v449_v54, %v448_v57  ;;  %v464_v55 = vld [vmem:[#allocation6] sm:$0xff] }
 0x11e   : > { %v7403_v13 = vunpack.i.h.bf16 %v7401_v60  ;;  %v7402_v14 = vunpack.i.l.bf16 %v7401_v60 }
 0x120   : > { %6424 = vmatpush1.bf16.msk.msra.mxu0 %vm9187_vm3, %v6422_v63  ;;  %v447_v17 = vsel %vm11523_vm2, %v7403_v13, %v7408_v58  ;;  %v451_v19 = vsel %vm11523_vm2, %v7408_v58, %v7403_v13  ;;  %v446_v20 = vsel %vm11523_vm2, %v7402_v14, %v7407_v59  ;;  %v7416_v23 = vpop.permute.xlu1 %7415  ;;  %v450_v24 = vsel %vm11523_vm2, %v7407_v59, %v7402_v14 }
 0x121   : > { %6427 = vmatprep.subr.msk.bf16.mxu0 %vm9226_vm7, %v6425_v61  ;;  %v7418_v26 = vunpack.i.h.bf16 %v7416_v23  ;;  %v7417_v28 = vunpack.i.l.bf16 %v7416_v23  ;;  %v7411_v29 = vpop.permute.xlu0 %7410  ;;  %v6431_v30 = vpack.c.bf16 %v447_v17, %v446_v20  ;;  %v6434_v36 = vpack.c.bf16 %v451_v19, %v450_v24  ;;  %v465_v20 = vld [vmem:[#allocation6 + $0x8] sm:$0xff] }
 0x122   : > { %v7413_v31 = vunpack.i.h.bf16 %v7411_v29  ;;  %v7412_v32 = vunpack.i.l.bf16 %v7411_v29  ;;  %v11562_v58 = vmov 0 }
 0x123   : > { %5938 = vmatmul.mubr.msk.f32.vlgmr.msra.gmra.mrb[0].mxu0 %vm506_vm8, %v504_v21  ;;  %v11563_v58 = vsel %vm9300_vm1, 4294967295, %v11562_v58 }
 0x124   : > { %6430 = vmatpush1.bf16.msk.msra.mxu0 %vm9246_vm10, %v6428_v16  ;;  %v691_v37 = vsel %vm11519_vm9, %v7413_v31, %v7418_v26  ;;  %v695_v34 = vsel %vm11519_vm9, %v7418_v26, %v7413_v31  ;;  %v690_v38 = vsel %vm11519_vm9, %v7412_v32, %v7417_v28  ;;  %v7426_v40 = vpop.permute.xlu1 %7425  ;;  %v694_v27 = vsel %vm11519_vm9, %v7417_v28, %v7412_v32 }
 0x125   : > { %583 = vmatprep.mubr.f32.mxu0 %v8751_v12  ;;  %6433 = vmatprep.subr.msk.bf16.mxu0 %vm9226_vm7, %v6431_v30  ;;  %v7428_v41 = vunpack.i.h.bf16 %v7426_v40  ;;  %v7427_v43 = vunpack.i.l.bf16 %v7426_v40  ;;  %v7421_v44 = vpop.permute.xlu0 %7420  ;;  %v6437_v45 = vpack.c.bf16 %v691_v37, %v690_v38  ;;  %v6440_v50 = vpack.c.bf16 %v695_v34, %v694_v27  ;;  %v711_v34 = vld [vmem:[#allocation6 + $0x20] sm:$0xff] }
 0x126   : > { %v7423_v47 = vunpack.i.h.bf16 %v7421_v44  ;;  %v7422_v49 = vunpack.i.l.bf16 %v7421_v44  ;;  %v712_v44 = vld [vmem:[#allocation6 + $0x28] sm:$0xff] }
 0x127   : > { %5939 = vmatmul.mubr.msk.f32.gmra.mrb[2].mxu0 %vm506_vm8, %v505_v39 }
 0x128   : > { %6436 = vmatpush1.bf16.msk.msra.mxu0 %vm9246_vm10, %v6434_v36  ;;  %v693_v51 = vsel %vm11519_vm9, %v7423_v47, %v7428_v41  ;;  %v697_v53 = vsel %vm11519_vm9, %v7428_v41, %v7423_v47  ;;  %v692_v54 = vsel %vm11519_vm9, %v7422_v49, %v7427_v43  ;;  %v7436_v56 = vpop.permute.xlu1 %7435  ;;  %v696_v57 = vsel %vm11519_vm9, %v7427_v43, %v7422_v49  ;;  %vm9395_vm9 = vmpackc.low %vm9257_vm12, %vm9257_vm12 }
 0x129   : > { %660 = vmatprep.mubr.f32.mxu0 %v8751_v12  ;;  %6439 = vmatprep.subr.msk.bf16.mxu0 %vm9277_vm13, %v6437_v45  ;;  %v7438_v59 = vunpack.i.h.bf16 %v7436_v56  ;;  %v7437_v60 = vunpack.i.l.bf16 %v7436_v56  ;;  %v7431_v61 = vpop.permute.xlu0 %7430  ;;  %v6443_v62 = vpack.c.bf16 %v693_v51, %v692_v54  ;;  %v6446_v14 = vpack.c.bf16 %v697_v53, %v696_v57 }
 0x12a   : > { %v7433_v63 = vunpack.i.h.bf16 %v7431_v61  ;;  %v7432_v13 = vunpack.i.l.bf16 %v7431_v61  ;;  %v9345_v45 = vpack.c.bf16 %v9080_v9, %v9077_v8  ;;  %v838_v8 = vld [vmem:[#allocation6 + $0x30] sm:$0xff]  ;;  %v9356_v9 = vpack.c.bf16 %v9064_v4, %v9057_v2 }
 0x12b   : > { %5948 = vmatmul.mubr.msk.f32.vlgmr.msra.gmra.mrb[0].mxu0 %vm506_vm8, %v464_v55  ;;  %v9370_v2 = vpack.c.bf16 %v9054_v1, %v9051_v0 }
 0x12c   : > { %6442 = vmatpush1.bf16.msk.msra.mxu0 %vm9300_vm1, %v6440_v50  ;;  %v818_v16 = vsel %vm11518_vm15, %v7433_v63, %v7438_v59  ;;  %v822_v17 = vsel %vm11518_vm15, %v7438_v59, %v7433_v63  ;;  %v817_v19 = vsel %vm11518_vm15, %v7432_v13, %v7437_v60  ;;  %v7446_v21 = vpop.permute.xlu1 %7445  ;;  %v821_v23 = vsel %vm11518_vm15, %v7437_v60, %v7432_v13 }
 0x12d   : > { %666 = vmatprep.mubr.f32.mxu0 %v8751_v12  ;;  %6445 = vmatprep.subr.msk.bf16.mxu0 %vm9277_vm13, %v6443_v62  ;;  %v7448_v24 = vunpack.i.h.bf16 %v7446_v21  ;;  %v7447_v26 = vunpack.i.l.bf16 %v7446_v21  ;;  %v7441_v28 = vpop.permute.xlu0 %7440  ;;  %v6449_v29 = vpack.c.bf16 %v818_v16, %v817_v19  ;;  %v6452_v32 = vpack.c.bf16 %v822_v17, %v821_v23 }
 0x12e   : > { %v7443_v30 = vunpack.i.h.bf16 %v7441_v28  ;;  %v7442_v31 = vunpack.i.l.bf16 %v7441_v28  ;;  %v9365_v59 = vpack.c.bf16 %v9070_v6, %v9067_v5  ;;  %v839_v6 = vld [vmem:[#allocation6 + $0x38] sm:$0xff] }
 0x12f   : > { %5949 = vmatmul.mubr.msk.f32.gmra.mrb[2].mxu0 %vm506_vm8, %v465_v20 }
 0x130   : > { %6448 = vmatpush1.bf16.msk.msra.mxu0 %vm9300_vm1, %v6446_v14  ;;  %v820_v36 = vsel %vm11518_vm15, %v7443_v30, %v7448_v24  ;;  %v819_v37 = vsel %vm11518_vm15, %v7442_v31, %v7447_v26  ;;  %v7456_v38 = vpop.permute.xlu1 %7455  ;;  %v824_v40 = vsel %vm11518_vm15, %v7448_v24, %v7443_v30  ;;  %v823_v27 = vsel %vm11518_vm15, %v7447_v26, %v7442_v31 }
 0x131   : > { %783 = vmatprep.mubr.f32.mxu0 %v8751_v12  ;;  %6451 = vmatprep.subr.msk.bf16.mxu0 %vm9226_vm7, %v6449_v29  ;;  %v6455_v41 = vpack.c.bf16 %v820_v36, %v819_v37  ;;  %v7451_v43 = vpop.permute.xlu0 %7450  ;;  %v6458_v48 = vpack.c.bf16 %v824_v40, %v823_v27  ;;  %v7458_v49 = vunpack.i.h.bf16 %v7456_v38  ;;  %v7457_v50 = vunpack.i.l.bf16 %v7456_v38  ;;  %v928_v29 = vld [vmem:[#allocation6 + $0x40] sm:$0xff] }
 0x132   : > { %v7453_v51 = vunpack.i.h.bf16 %v7451_v43  ;;  %v7452_v53 = vunpack.i.l.bf16 %v7451_v43  ;;  %vm398_vm15 = vcmp.lt.s32.totalorder %v9165_v22, 240 }
 0x133   : > { %5958 = vmatmul.mubr.msk.f32.vlgmr.msra.gmra.mrb[0].mxu0 %vm506_vm8, %v711_v34  ;;  %vm9410_vm12 = vmand %vm398_vm15, %vm9201_vm5 }
 0x134   : > { %6454 = vmatpush1.bf16.msk.msra.mxu0 %vm9328_vm6, %v6452_v32  ;;  %789 = vmatprep.mubr.f32.mxu0 %v8751_v12  ;;  %v7466_v47 = vpop.permute.xlu1 %7465  ;;  %v1039_v56 = vsel %vm11520_vm4, %v7458_v49, %v7453_v51  ;;  %v1038_v57 = vsel %vm11520_vm4, %v7457_v50, %v7452_v53  ;;  %v1035_v4 = vsel %vm11520_vm4, %v7453_v51, %v7458_v49  ;;  %vm9430_vm5 = vmpackc.low %vm9410_vm12, %vm9410_vm12 }
 0x135   : > { %6457 = vmatprep.subr.msk.bf16.mxu0 %vm9226_vm7, %v6455_v41  ;;  %v7461_v54 = vpop.permute.xlu0 %7460  ;;  %v7468_v61 = vunpack.i.h.bf16 %v7466_v47  ;;  %v7467_v62 = vunpack.i.l.bf16 %v7466_v47  ;;  %v1034_v5 = vsel %vm11520_vm4, %v7452_v53, %v7457_v50  ;;  %v6469_v14 = vpack.c.bf16 %v1039_v56, %v1038_v57  ;;  %v929_v47 = vld [vmem:[#allocation6 + $0x48] sm:$0xff]  ;;  %vm9466_vm12 = vmpackc.low %vm398_vm15, %vm398_vm15 }
 0x136   : > { %v7463_v63 = vunpack.i.h.bf16 %v7461_v54  ;;  %v7462_v13 = vunpack.i.l.bf16 %v7461_v54  ;;  %v6472_v24 = vpack.c.bf16 %v1035_v4, %v1034_v5 }
 0x137   : > { %5959 = vmatmul.mubr.msk.f32.gmra.mrb[2].mxu0 %vm506_vm8, %v712_v44 }
 0x138   : > { %6460 = vmatpush1.bf16.msk.msra.mxu0 %vm9328_vm6, %v6458_v48  ;;  %910 = vmatprep.mubr.f32.mxu0 %v8751_v12  ;;  %v7476_v55 = vpop.permute.xlu1 %7475  ;;  %v1041_v21 = vsel %vm11520_vm4, %v7468_v61, %v7463_v63  ;;  %v1040_v23 = vsel %vm11520_vm4, %v7467_v62, %v7462_v13  ;;  %v1037_v26 = vsel %vm11520_vm4, %v7463_v63, %v7468_v61  ;;  %v1055_v63 = vld [vmem:[#allocation6 + $0x50] sm:$0xff] }
 0x139   : > { %6462 = vmatprep.subr.bf16.mxu0 %v9345_v45  ;;  %v7471_v60 = vpop.permute.xlu0 %7470  ;;  %v7478_v17 = vunpack.i.h.bf16 %v7476_v55  ;;  %v7477_v19 = vunpack.i.l.bf16 %v7476_v55  ;;  %v1036_v28 = vsel %vm11520_vm4, %v7462_v13, %v7467_v62  ;;  %v6475_v37 = vpack.c.bf16 %v1041_v21, %v1040_v23  ;;  %v1056_v23 = vld [vmem:[#allocation6 + $0x58] sm:$0xff] }
 0x13a   : > { %v7473_v20 = vunpack.i.h.bf16 %v7471_v60  ;;  %v7472_v0 = vunpack.i.l.bf16 %v7471_v60  ;;  %v6478_v41 = vpack.c.bf16 %v1037_v26, %v1036_v28  ;;  %vm11522_vm4 = vcmp.lt.s32.totalorder %v9162_v18, 112 }
 0x13b   : > { %5968 = vmatmul.mubr.msk.f32.vlgmr.msra.gmra.mrb[0].mxu0 %vm506_vm8, %v838_v8 }
 0x13c   : > { %6464 = vmatpush1.bf16.msra.mxu0 %v9356_v9  ;;  %916 = vmatprep.mubr.f32.mxu0 %v8751_v12  ;;  %v7486_v16 = vpop.permute.xlu1 %7485  ;;  %v1166_v32 = vsel %vm11521_vm14, %v7478_v17, %v7473_v20  ;;  %v1165_v36 = vsel %vm11521_vm14, %v7477_v19, %v7472_v0  ;;  %v1162_v48 = vsel %vm11521_vm14, %v7473_v20, %v7478_v17 }
 0x13d   : > { %6466 = vmatprep.subr.bf16.mxu0 %v9365_v59  ;;  %v7481_v1 = vpop.permute.xlu0 %7480  ;;  %v7488_v38 = vunpack.i.h.bf16 %v7486_v16  ;;  %v7487_v40 = vunpack.i.l.bf16 %v7486_v16  ;;  %v1161_v44 = vsel %vm11521_vm14, %v7472_v0, %v7477_v19  ;;  %v6481_v49 = vpack.c.bf16 %v1166_v32, %v1165_v36 }
 0x13e   : > { %v7483_v27 = vunpack.i.h.bf16 %v7481_v1  ;;  %v7482_v35 = vunpack.i.l.bf16 %v7481_v1  ;;  %v6484_v60 = vpack.c.bf16 %v1162_v48, %v1161_v44 }
 0x13f   : > { %5969 = vmatmul.mubr.msk.f32.gmra.mrb[2].mxu0 %vm506_vm8, %v839_v6 }
 0x140   : > { %6468 = vmatpush1.bf16.msra.mxu0 %v9370_v2  ;;  %1000 = vmatprep.mubr.f32.mxu0 %v8751_v12  ;;  %v7496_v30 = vpop.permute.xlu1 %7495  ;;  %v1168_v55 = vsel %vm11521_vm14, %v7488_v38, %v7483_v27  ;;  %v1167_v56 = vsel %vm11521_vm14, %v7487_v40, %v7482_v35  ;;  %v1164_v61 = vsel %vm11521_vm14, %v7483_v27, %v7488_v38  ;;  %v1182_v27 = vld [vmem:[#allocation6 + $0x60] sm:$0xff] }
 0x141   : > { %6471 = vmatprep.subr.msk.bf16.mxu0 %vm9277_vm13, %v6469_v14  ;;  %v7491_v34 = vpop.permute.xlu0 %7490  ;;  %v7498_v50 = vunpack.i.h.bf16 %v7496_v30  ;;  %v7497_v51 = vunpack.i.l.bf16 %v7496_v30  ;;  %v1163_v62 = vsel %vm11521_vm14, %v7482_v35, %v7487_v40  ;;  %v6487_v5 = vpack.c.bf16 %v1168_v55, %v1167_v56 }
 0x142   : > { %v7493_v53 = vunpack.i.h.bf16 %v7491_v34  ;;  %v7492_v54 = vunpack.i.l.bf16 %v7491_v34  ;;  %v6490_v0 = vpack.c.bf16 %v1164_v61, %v1163_v62  ;;  %vm11525_vm14 = vcmp.lt.s32.totalorder %v9162_v18, 111  ;;  %v1309_v61 = vld [vmem:[#allocation6 + $0x70] sm:$0xff] }
 0x143   : > { %5970 = vmatmul.mubr.msk.f32.vlgmr.msra.gmra.mrb[0].mxu0 %vm506_vm8, %v928_v29 }
 0x144   : > { %6474 = vmatpush1.bf16.msk.msra.mxu0 %vm9395_vm9, %v6472_v24  ;;  %1006 = vmatprep.mubr.f32.mxu0 %v8751_v12  ;;  %v7506_v52 = vpop.permute.xlu1 %7505  ;;  %v1293_v13 = vsel %vm11522_vm4, %v7498_v50, %v7493_v53  ;;  %v1292_v4 = vsel %vm11522_vm4, %v7497_v51, %v7492_v54  ;;  %v1289_v1 = vsel %vm11522_vm4, %v7493_v53, %v7498_v50 }
 0x145   : > { %6477 = vmatprep.subr.msk.bf16.mxu0 %vm9277_vm13, %v6475_v37  ;;  %v7501_v8 = vpop.permute.xlu0 %7500  ;;  %v7508_v16 = vunpack.i.h.bf16 %v7506_v52  ;;  %v7507_v17 = vunpack.i.l.bf16 %v7506_v52  ;;  %v1288_v21 = vsel %vm11522_vm4, %v7492_v54, %v7497_v51  ;;  %v6493_v24 = vpack.c.bf16 %v1293_v13, %v1292_v4  ;;  %v1183_v51 = vld [vmem:[#allocation6 + $0x68] sm:$0xff] }
 0x146   : > { %v7503_v19 = vunpack.i.h.bf16 %v7501_v8  ;;  %v7502_v20 = vunpack.i.l.bf16 %v7501_v8  ;;  %v6496_v35 = vpack.c.bf16 %v1289_v1, %v1288_v21 }
 0x147   : > { %5971 = vmatmul.mubr.msk.f32.gmra.mrb[2].mxu0 %vm506_vm8, %v929_v47 }
 0x148   : > { %6480 = vmatpush1.bf16.msk.msra.mxu0 %vm9395_vm9, %v6478_v41  ;;  %1127 = vmatprep.mubr.f32.mxu0 %v8751_v12  ;;  %v7516_v6 = vpop.permute.xlu1 %7515  ;;  %v1295_v32 = vsel %vm11522_vm4, %v7508_v16, %v7503_v19  ;;  %v1294_v36 = vsel %vm11522_vm4, %v7507_v17, %v7502_v20  ;;  %v1291_v40 = vsel %vm11522_vm4, %v7503_v19, %v7508_v16 }
 0x149   : > { %6483 = vmatprep.subr.msk.bf16.mxu0 %vm9430_vm5, %v6481_v49  ;;  %v7511_v14 = vpop.permute.xlu0 %7510  ;;  %v7518_v26 = vunpack.i.h.bf16 %v7516_v6  ;;  %v7517_v28 = vunpack.i.l.bf16 %v7516_v6  ;;  %v1290_v41 = vsel %vm11522_vm4, %v7502_v20, %v7507_v17  ;;  %v6498_v44 = vpack.c.bf16 %v1295_v32, %v1294_v36  ;;  %vm402_vm4 = vmand %vm398_vm15, %vm9250_vm11  ;;  %v1436_v6 = vld [vmem:[#allocation6 + $0x80] sm:$0xff] }
 0x14a   : > { %v7513_v29 = vunpack.i.h.bf16 %v7511_v14  ;;  %v7512_v30 = vunpack.i.l.bf16 %v7511_v14  ;;  %v6501_v53 = vpack.c.bf16 %v1291_v40, %v1290_v41  ;;  %vm9501_vm11 = vmpackc.low %vm402_vm4, %vm402_vm4  ;;  %v1437_v14 = vld [vmem:[#allocation6 + $0x88] sm:$0xff]  ;;  %vm11576_vm15 = vcmp.lt.s32.totalorder %v9162_v18, 15 }
 0x14b   : > { %5980 = vmatmul.mubr.msk.f32.vlgmr.msra.gmra.mrb[0].mxu0 %vm506_vm8, %v1055_v63  ;;  %vm11577_vm4 = vmmov %vm11576_vm15 }
 0x14c   : > { %6486 = vmatpush1.bf16.msk.msra.mxu0 %vm9328_vm6, %v6484_v60  ;;  %1133 = vmatprep.mubr.f32.mxu0 %v8751_v12  ;;  %v7526_v34 = vpop.permute.xlu1 %7525  ;;  %v1420_v43 = vsel %vm11525_vm14, %v7518_v26, %v7513_v29  ;;  %v1419_v48 = vsel %vm11525_vm14, %v7517_v28, %v7512_v30  ;;  %v1416_v54 = vsel %vm11525_vm14, %v7513_v29, %v7518_v26 }
 0x14d   : > { %6489 = vmatprep.subr.msk.bf16.mxu0 %vm9430_vm5, %v6487_v5  ;;  %v7521_v38 = vpop.permute.xlu0 %7520  ;;  %v7528_v47 = vunpack.i.h.bf16 %v7526_v34  ;;  %v7527_v49 = vunpack.i.l.bf16 %v7526_v34  ;;  %v1415_v8 = vsel %vm11525_vm14, %v7512_v30, %v7517_v28  ;;  %v6503_v55 = vpack.c.bf16 %v1420_v43, %v1419_v48  ;;  %v1310_v5 = vld [vmem:[#allocation6 + $0x78] sm:$0xff] }
 0x14e   : > { %v7523_v52 = vunpack.i.h.bf16 %v7521_v38  ;;  %v7522_v50 = vunpack.i.l.bf16 %v7521_v38  ;;  %v6506_v60 = vpack.c.bf16 %v1416_v54, %v1415_v8 }
 0x14f   : > { %5981 = vmatmul.mubr.msk.f32.gmra.mrb[2].mxu0 %vm506_vm8, %v1056_v23 }
 0x150   : > { %6492 = vmatpush1.bf16.msk.msra.mxu0 %vm9328_vm6, %v6490_v0  ;;  %1254 = vmatprep.mubr.f32.mxu0 %v8751_v12  ;;  %v1422_v33 = vsel %vm11525_vm14, %v7528_v47, %v7523_v52  ;;  %v1421_v22 = vsel %vm11525_vm14, %v7527_v49, %v7522_v50  ;;  %v1418_v62 = vsel %vm11525_vm14, %v7523_v52, %v7528_v47 }
 0x151   : > { %6495 = vmatprep.subr.msk.bf16.mxu0 %vm9466_vm12, %v6493_v24  ;;  %v1417_v63 = vsel %vm11525_vm14, %v7522_v50, %v7527_v49  ;;  %v6509_v13 = vpack.c.bf16 %v1422_v33, %v1421_v22 }
 0x152   : > { %v6512_v4 = vpack.c.bf16 %v1418_v62, %v1417_v63 }
 0x153   : > { %5990 = vmatmul.mubr.msk.f32.vlgmr.msra.gmra.mrb[0].mxu0 %vm506_vm8, %v1182_v27 }
 0x154   : > { %6497 = vmatpush1.bf16.msra.mxu0 %v6496_v35  ;;  %1260 = vmatprep.mubr.f32.mxu0 %v8751_v12 }
 0x155   : > { %6500 = vmatprep.subr.msk.bf16.mxu0 %vm9466_vm12, %v6498_v44 }
 0x157   : > { %5991 = vmatmul.mubr.msk.f32.gmra.mrb[2].mxu0 %vm506_vm8, %v1183_v51 }
 0x158   : > { %6502 = vmatpush1.bf16.msra.mxu0 %v6501_v53  ;;  %1381 = vmatprep.mubr.f32.mxu0 %v8751_v12 }
 0x159   : > { %6505 = vmatprep.subr.msk.bf16.mxu0 %vm9501_vm11, %v6503_v55 }
 0x15b   : > { %5996 = vmatmul.mubr.msk.f32.vlgmr.msra.gmra.mrb[0].mxu0 %vm506_vm8, %v1309_v61 }
 0x15c   : > { %6508 = vmatpush1.bf16.msk.msra.mxu0 %vm9395_vm9, %v6506_v60  ;;  %1387 = vmatprep.mubr.f32.mxu0 %v8751_v12 }
 0x15d   : > { %6511 = vmatprep.subr.msk.bf16.mxu0 %vm9501_vm11, %v6509_v13  ;;  %v1535_v17 = vpop.permute.xlu1 %1534 }
 0x15e   : > { %v1530_v16 = vpop.permute.xlu0 %1529 }
 0x15f   : > { %5997 = vmatmul.mubr.msk.f32.gmra.mrb[2].mxu0 %vm506_vm8, %v1310_v5 }
 0x160   : > { %6514 = vmatpush1.bf16.msk.msra.mxu0 %vm9395_vm9, %v6512_v4  ;;  %1508 = vmatprep.mubr.f32.mxu0 %v8751_v12 }
 0x161   : > { %v7533_v19 = vpop.permute.xlu1 %7532 }
 0x162   : > { %v7538_v20 = vpop.permute.xlu0 %7537  ;;  %v7535_v0 = vunpack.i.h.bf16 %v7533_v19  ;;  %v7534_v1 = vunpack.i.l.bf16 %v7533_v19  ;;  %v8496_v19 = vld [vmem:[%s9036_s25 + $0x30] sm:$0xff] }
 0x163   : > { %6006 = vmatmul.mubr.msk.f32.vlgmr.msra.gmra.mrb[0].mxu0 %vm506_vm8, %v1436_v6  ;;  %v7540_v21 = vunpack.i.h.bf16 %v7538_v20  ;;  %v7539_v23 = vunpack.i.l.bf16 %v7538_v20  ;;  %v8491_v6 = vld [vmem:[%s9036_s25] sm:$0xff]  ;;  %v8497_v20 = vld [vmem:[%s9036_s25 + $0x28] sm:$0xff] }
 0x164   : > { %1514 = vmatprep.mubr.f32.mxu0 %v8751_v12 }
 0x165   : > { %v1635_v24 = vsel %vm11524_vm0, %v7534_v1, %v7539_v23  ;;  %v1636_v26 = vsel %vm11524_vm0, %v7535_v0, %v7540_v21  ;;  %v1641_v28 = vsel %vm11524_vm0, %v7539_v23, %v7534_v1  ;;  %v1642_v29 = vsel %vm11524_vm0, %v7540_v21, %v7535_v0  ;;  %v7543_v30 = vpop.permute.xlu1 %7542  ;;  %v8498_v0 = vld [vmem:[%s9036_s25 + $0x38] sm:$0xff]  ;;  %v6110_v21 = vld [vmem:[%s11509_s5 + $0x10] sm:$0xff] }
 0x166   : > { %v7548_v32 = vpop.permute.xlu0 %7547  ;;  %v6515_v36 = vpack.c.bf16 %v1636_v26, %v1635_v24  ;;  %v6517_v34 = vpack.c.bf16 %v1642_v29, %v1641_v28  ;;  %v7545_v38 = vunpack.i.h.bf16 %v7543_v30  ;;  %v7544_v40 = vunpack.i.l.bf16 %v7543_v30  ;;  %v6111_v23 = vld [vmem:[%s11509_s5 + $0x18] sm:$0xff] }
 0x167   : > { %6007 = vmatmul.mubr.msk.f32.gmra.mrb[2].mxu0 %vm506_vm8, %v1437_v14  ;;  %v7550_v27 = vunpack.i.h.bf16 %v7548_v32  ;;  %v7549_v35 = vunpack.i.l.bf16 %v7548_v32  ;;  %v8492_v14 = vld [vmem:[%s9036_s25 + $0x10] sm:$0xff]  ;;  %v7606_v1 = vpack.i.bf16 %v8498_v0, %v8497_v20  ;;  %vm1662_vm8 = vcmask 392192  }
 0x168   : > { %2992 = vmatprep.mubr.f32.mxu0 %v8751_v12  ;;  %6516 = vmatprep.subr.bf16.mxu1 %v6515_v36 }
 0x169   : > { %6519 = vmatpush1.bf16.msk.msra.mxu1 %vm9187_vm3, %v6517_v34  ;;  %v1644_v41 = vsel %vm11524_vm0, %v7550_v27, %v7545_v38  ;;  %v1643_v43 = vsel %vm11524_vm0, %v7549_v35, %v7544_v40  ;;  %v1637_v44 = vsel %vm11524_vm0, %v7544_v40, %v7549_v35  ;;  %v1638_v47 = vsel %vm11524_vm0, %v7545_v38, %v7550_v27 }
 0x16a   : > { %v6520_v52 = vpack.c.bf16 %v1638_v47, %v1637_v44  ;;  %v6522_v50 = vpack.c.bf16 %v1644_v41, %v1643_v43 }
 0x16c   : > { %6521 = vmatprep.subr.bf16.mxu1 %v6520_v52 }
 0x16d   : > { %6524 = vmatpush1.bf16.msk.msra.mxu1 %vm9187_vm3, %v6522_v50 }
 0x236   : > { %v1510_v48 = vpop.f32.mrb[0].mxu0 }
 0x237   : > { %v1512_v49 = vpop.f32.mrb[1].mxu0  ;;  %v1537_v51 = vadd.f32 %v1530_v16, %v1510_v48 }
 0x238   : > { %v1538_v53 = vadd.f32 %v1530_v16, %v1512_v49  ;;  %v9579_v16 = vpack.i.bf16 %v8492_v14, %v8491_v6 }
 0x239   : > { %v1541_v22 = vmax.f32 %v1537_v51, 0.0 }
 0x23a   : > { %v1516_v54 = vpop.f32.mrb[2].mxu0  ;;  %v1542_v61 = vmax.f32 %v1538_v53, 0.0 }
 0x23b   : > { %v1539_v8 = vadd.f32 %v1535_v17, %v1516_v54  ;;  %v1518_v55 = vpop.f32.mrb[3].mxu0 }
 0x23c   : > { %v1540_v33 = vadd.f32 %v1535_v17, %v1518_v55 }
 0x23d   : > { %v1543_v60 = vmax.f32 %v1539_v8, 0.0  ;;  %v1660_v8 = vld [vmem:[#allocation8 + $0x10] sm:$0xff] }
 0x23e   : > { %v1544_v62 = vmax.f32 %v1540_v33, 0.0 }
 0x23f   : > { %v9555_v63 = vpack.i.bf16 %v1543_v60, %v1541_v22  ;;  %v9565_v5 = vpack.c.bf16 %v1543_v60, %v1541_v22 }
 0x240   : > { %v9557_v13 = vpack.i.bf16 %v1544_v62, %v1542_v61  ;;  %v9563_v4 = vpack.c.bf16 %v1544_v62, %v1542_v61 }
 0x241   : > { %7552 = vrot.lane.b32.xlu1 %v9555_v63, %s8750_s11 }
 0x242   : > { %7562 = vrot.lane.b32.xlu0 %v9557_v13, %s8750_s11 }
 0x245   : > { %7557 = vrot.lane.b32.xlu1 %v9074_v7, %s8752_s13  ;;  %v8493_v7 = vld [vmem:[%s9036_s25 + $0x8] sm:$0xff] }
 0x246   : > { %7567 = vrot.lane.b32.xlu0 %v9092_v11, %s8752_s13  ;;  %v8494_v11 = vld [vmem:[%s9036_s25 + $0x18] sm:$0xff] }
 0x247   : > { %v9585_v17 = vpack.i.bf16 %v8494_v11, %v8493_v7 }
 0x249   : > { %7572 = vrot.lane.b32.xlu1 %v9061_v3, %s8752_s13  ;;  %v8495_v3 = vld [vmem:[%s9036_s25 + $0x20] sm:$0xff] }
 0x24a   : > { %7577 = vrot.lane.b32.xlu0 %v9086_v10, %s8752_s13  ;;  %v7601_v10 = vpack.i.bf16 %v8496_v19, %v8495_v3 }
 0x24d   : > { %7582 = vrot.lane.b32.xlu1 %v9555_v63, %s8752_s13 }
 0x24e   : > { %7592 = vrot.lane.b32.xlu0 %v9557_v13, %s8752_s13 }
 0x251   : > { %7587 = vrot.lane.b32.xlu1 %v9579_v16, %s8753_s14 }
 0x252   : > { %7597 = vrot.lane.b32.xlu0 %v9585_v17, %s8753_s14 }
 0x255   : > { %7602 = vrot.lane.b32.xlu1 %v7601_v10, %s8753_s14 }
 0x256   : > { %7607 = vrot.lane.b32.xlu0 %v7606_v1, %s8753_s14 }
 0x259   : > { %7612 = vrot.lane.b32.xlu1 %v9555_v63, %s8753_s14 }
 0x25a   : > { %7622 = vrot.lane.b32.xlu0 %v9557_v13, %s8753_s14 }
 0x25d   : > { %7617 = vrot.lane.b32.xlu1 %v9579_v16, %s8754_s15 }
 0x25e   : > { %7627 = vrot.lane.b32.xlu0 %v9585_v17, %s8754_s15 }
 0x261   : > { %7632 = vrot.lane.b32.xlu1 %v7601_v10, %s8754_s15 }
 0x262   : > { %7637 = vrot.lane.b32.xlu0 %v7606_v1, %s8754_s15 }
 0x265   : > { %7642 = vrot.lane.b32.xlu1 %v9555_v63, %s8754_s15 }
 0x266   : > { %7647 = vrot.lane.b32.xlu0 %v9557_v13, %s8754_s15 }
 0x269   : > { %7652 = vrot.lane.b32.xlu1 %v9579_v16, %s8755_s20 }
 0x26a   : > { %7657 = vrot.lane.b32.xlu0 %v9585_v17, %s8755_s20 }
 0x26d   : > { %7662 = vrot.lane.b32.xlu1 %v7601_v10, %s8755_s20 }
 0x26e   : > { %7667 = vrot.lane.b32.xlu0 %v7606_v1, %s8755_s20 }
 0x271   : > { %7672 = vrot.lane.b32.xlu1 %v9555_v63, %s8755_s20 }
 0x272   : > { %7682 = vrot.lane.b32.xlu0 %v9557_v13, %s8755_s20 }
 0x275   : > { %7677 = vrot.lane.b32.xlu1 %v9579_v16, %s8756_s18 }
 0x276   : > { %7687 = vrot.lane.b32.xlu0 %v9585_v17, %s8756_s18 }
 0x279   : > { %7692 = vrot.lane.b32.xlu1 %v7601_v10, %s8756_s18 }
 0x27a   : > { %7697 = vrot.lane.b32.xlu0 %v7606_v1, %s8756_s18 }
 0x27d   : > { %7702 = vrot.lane.b32.xlu1 %v9555_v63, %s8756_s18 }
 0x27e   : > { %7712 = vrot.lane.b32.xlu0 %v9557_v13, %s8756_s18 }
 0x281   : > { %7707 = vrot.lane.b32.xlu1 %v9579_v16, %s8757_s22 }
 0x282   : > { %7717 = vrot.lane.b32.xlu0 %v9585_v17, %s8757_s22 }
 0x285   : > { %7722 = vrot.lane.b32.xlu1 %v7601_v10, %s8757_s22 }
 0x286   : > { %7727 = vrot.lane.b32.xlu0 %v7606_v1, %s8757_s22 }
 0x289   : > { %7732 = vrot.lane.b32.xlu1 %v9555_v63, %s8757_s22 }
 0x28a   : > { %7742 = vrot.lane.b32.xlu0 %v9557_v13, %s8757_s22 }
 0x28d   : > { %7737 = vrot.lane.b32.xlu1 %v9579_v16, %s8758_s17 }
 0x28e   : > { %7747 = vrot.lane.b32.xlu0 %v9585_v17, %s8758_s17 }
 0x291   : > { %7752 = vrot.lane.b32.xlu1 %v7601_v10, %s8758_s17 }
 0x292   : > { %7757 = vrot.lane.b32.xlu0 %v7606_v1, %s8758_s17 }
 0x295   : > { %7762 = vrot.lane.b32.xlu1 %v9555_v63, %s8758_s17 }
 0x296   : > { %7767 = vrot.lane.b32.xlu0 %v9557_v13, %s8758_s17 }
 0x299   : > { %2752 = vperm.xlu1 %7530, %v6110_v21  }
 0x29a   : > { %2757 = vperm.xlu0 %7529, %v6111_v23  }
 0x29d   : > { %7772 = vrot.lane.b32.xlu1 %v9579_v16, %s8750_s11 }
 0x29e   : > { %7777 = vrot.lane.b32.xlu0 %v9585_v17, %s8750_s11 }
 0x2a1   : > { %7782 = vrot.lane.b32.xlu1 %v7601_v10, %s8750_s11  ;;  %v1661_v10 = vld [vmem:[#allocation8 + $0x18] sm:$0xff] }
 0x2a2   : > { %7787 = vrot.lane.b32.xlu0 %v7606_v1, %s8750_s11 }
 0x2a5   : > { %7792 = vrot.lane.b32.xlu1 %v9555_v63, %s8750_s11 }
 0x2a6   : > { %7797 = vrot.lane.b32.xlu0 %v9557_v13, %s8750_s11 }
 0x2b3   : > { %v7553_v24 = vpop.permute.xlu1 %7552 }
 0x2b4   : > { %v7555_v26 = vunpack.i.h.bf16 %v7553_v24  ;;  %v7554_v28 = vunpack.i.l.bf16 %v7553_v24  ;;  %v7563_v29 = vpop.permute.xlu0 %7562 }
 0x2b5   : > { %v7565_v30 = vunpack.i.h.bf16 %v7563_v29  ;;  %v7564_v32 = vunpack.i.l.bf16 %v7563_v29 }
 0x2b7   : > { %v1646_v36 = vsel %vm11524_vm0, %v7565_v30, %v7555_v26  ;;  %v1645_v34 = vsel %vm11524_vm0, %v7564_v32, %v7554_v28  ;;  %v7558_v38 = vpop.permute.xlu1 %7557  ;;  %v1639_v40 = vsel %vm11524_vm0, %v7554_v28, %v7564_v32  ;;  %v1640_v27 = vsel %vm11524_vm0, %v7555_v26, %v7565_v30 }
 0x2b8   : > { %v7560_v35 = vunpack.i.h.bf16 %v7558_v38  ;;  %v7559_v41 = vunpack.i.l.bf16 %v7558_v38  ;;  %v7568_v43 = vpop.permute.xlu0 %7567  ;;  %v6525_v48 = vpack.c.bf16 %v1640_v27, %v1639_v40  ;;  %v6527_v44 = vpack.c.bf16 %v1646_v36, %v1645_v34 }
 0x2b9   : > { %v7570_v47 = vunpack.i.h.bf16 %v7568_v43  ;;  %v7569_v49 = vunpack.i.l.bf16 %v7568_v43 }
 0x2ba   : > { %6526 = vmatprep.subr.bf16.mxu1 %v6525_v48 }
 0x2bb   : > { %v1586_v52 = vsel %vm11523_vm2, %v7560_v35, %v7570_v47  ;;  %v1592_v50 = vsel %vm11523_vm2, %v7570_v47, %v7560_v35  ;;  %v1585_v51 = vsel %vm11523_vm2, %v7559_v41, %v7569_v49  ;;  %v1591_v53 = vsel %vm11523_vm2, %v7569_v49, %v7559_v41  ;;  %v7573_v54 = vpop.permute.xlu1 %7572  ;;  %6529 = vmatpush1.bf16.msk.msra.mxu1 %vm9187_vm3, %v6527_v44 }
 0x2bc   : > { %v6533_v55 = vpack.c.bf16 %v1592_v50, %v1591_v53  ;;  %v7575_v33 = vunpack.i.h.bf16 %v7573_v54  ;;  %v7574_v22 = vunpack.i.l.bf16 %v7573_v54  ;;  %v7578_v60 = vpop.permute.xlu0 %7577  ;;  %v6530_v61 = vpack.c.bf16 %v1586_v52, %v1585_v51  ;;  %v1609_v50 = vld [vmem:[#allocation8] sm:$0xff] }
 0x2bd   : > { %v7580_v62 = vunpack.i.h.bf16 %v7578_v60  ;;  %v7579_v6 = vunpack.i.l.bf16 %v7578_v60 }
 0x2be   : > { %6532 = vmatprep.subr.msk.bf16.mxu1 %vm9226_vm7, %v6530_v61  ;;  %6014 = vmatmul.mubr.msk.f32.vlgmr.msra.gmra.mrb[0].mxu1 %vm1662_vm8, %v1660_v8 }
 0x2bf   : > { %v1588_v14 = vsel %vm11523_vm2, %v7575_v33, %v7580_v62  ;;  %v1594_v7 = vsel %vm11523_vm2, %v7580_v62, %v7575_v33  ;;  %v1587_v11 = vsel %vm11523_vm2, %v7574_v22, %v7579_v6  ;;  %v1593_v3 = vsel %vm11523_vm2, %v7579_v6, %v7574_v22  ;;  %v7583_v19 = vpop.permute.xlu1 %7582  ;;  %6535 = vmatpush1.bf16.msk.msra.mxu1 %vm9246_vm10, %v6533_v55 }
 0x2c0   : > { %v6539_v20 = vpack.c.bf16 %v1594_v7, %v1593_v3  ;;  %v7585_v0 = vunpack.i.h.bf16 %v7583_v19  ;;  %v7584_v1 = vunpack.i.l.bf16 %v7583_v19  ;;  %v7593_v21 = vpop.permute.xlu0 %7592  ;;  %v6536_v23 = vpack.c.bf16 %v1588_v14, %v1587_v11  ;;  %1739 = vmatprep.mubr.f32.mxu1 %v8751_v12  ;;  %v1610_v7 = vld [vmem:[#allocation8 + $0x8] sm:$0xff] }
 0x2c1   : > { %v7595_v24 = vunpack.i.h.bf16 %v7593_v21  ;;  %v7594_v26 = vunpack.i.l.bf16 %v7593_v21 }
 0x2c2   : > { %6538 = vmatprep.subr.msk.bf16.mxu1 %vm9226_vm7, %v6536_v23  ;;  %6015 = vmatmul.mubr.msk.f32.gmra.mrb[2].mxu1 %vm1662_vm8, %v1661_v10 }
 0x2c3   : > { %v1590_v28 = vsel %vm11523_vm2, %v7585_v0, %v7595_v24  ;;  %v1596_v29 = vsel %vm11523_vm2, %v7595_v24, %v7585_v0  ;;  %v1589_v30 = vsel %vm11523_vm2, %v7584_v1, %v7594_v26  ;;  %v1595_v32 = vsel %vm11523_vm2, %v7594_v26, %v7584_v1  ;;  %v7588_v36 = vpop.permute.xlu1 %7587  ;;  %6541 = vmatpush1.bf16.msk.msra.mxu1 %vm9246_vm10, %v6539_v20  ;;  %vm11578_vm2 = vmmov %vm11577_vm4 }
 0x2c4   : > { %v6545_v34 = vpack.c.bf16 %v1596_v29, %v1595_v32  ;;  %v7590_v38 = vunpack.i.h.bf16 %v7588_v36  ;;  %v7589_v40 = vunpack.i.l.bf16 %v7588_v36  ;;  %v7598_v27 = vpop.permute.xlu0 %7597  ;;  %v6542_v35 = vpack.c.bf16 %v1590_v28, %v1589_v30  ;;  %1816 = vmatprep.mubr.f32.mxu1 %v8751_v12  ;;  %vm11579_vm0 = vmmov %vm11578_vm2 }
 0x2c5   : > { %v7600_v41 = vunpack.i.h.bf16 %v7598_v27  ;;  %v7599_v43 = vunpack.i.l.bf16 %v7598_v27 }
 0x2c6   : > { %6544 = vmatprep.subr.msk.bf16.mxu1 %vm9226_vm7, %v6542_v35 }
 0x2c7   : > { %v1854_v48 = vsel %vm11576_vm15, %v7590_v38, %v7600_v41  ;;  %v1860_v44 = vsel %vm11577_vm4, %v7600_v41, %v7590_v38  ;;  %v1853_v47 = vsel %vm11578_vm2, %v7589_v40, %v7599_v43  ;;  %v1859_v49 = vsel %vm11579_vm0, %v7599_v43, %v7589_v40  ;;  %v7603_v52 = vpop.permute.xlu1 %7602  ;;  %6547 = vmatpush1.bf16.msk.msra.mxu1 %vm9246_vm10, %v6545_v34  ;;  %vm11580_vm2 = vmmov %vm11579_vm0 }
 0x2c8   : > { %v6551_v51 = vpack.c.bf16 %v1860_v44, %v1859_v49  ;;  %v7605_v53 = vunpack.i.h.bf16 %v7603_v52  ;;  %v7604_v54 = vunpack.i.l.bf16 %v7603_v52  ;;  %v7608_v8 = vpop.permute.xlu0 %7607  ;;  %v6548_v55 = vpack.c.bf16 %v1854_v48, %v1853_v47  ;;  %vm11581_vm15 = vmmov %vm11579_vm0  ;;  %v1878_v44 = vld [vmem:[#allocation8 + $0x20] sm:$0xff] }
 0x2c9   : > { %v7610_v33 = vunpack.i.h.bf16 %v7608_v8  ;;  %v7609_v22 = vunpack.i.l.bf16 %v7608_v8  ;;  %vm11582_vm4 = vmmov %vm11579_vm0 }
 0x2ca   : > { %6550 = vmatprep.subr.msk.bf16.mxu1 %vm9277_vm13, %v6548_v55  ;;  %6028 = vmatmul.mubr.msk.f32.vlgmr.msra.gmra.mrb[0].mxu1 %vm1662_vm8, %v1609_v50 }
 0x2cb   : > { %v1856_v60 = vsel %vm11580_vm2, %v7605_v53, %v7610_v33  ;;  %v1862_v61 = vsel %vm11579_vm0, %v7610_v33, %v7605_v53  ;;  %v1855_v62 = vsel %vm11581_vm15, %v7604_v54, %v7609_v22  ;;  %v1861_v6 = vsel %vm11582_vm4, %v7609_v22, %v7604_v54  ;;  %v7613_v14 = vpop.permute.xlu1 %7612  ;;  %6553 = vmatpush1.bf16.msk.msra.mxu1 %vm9300_vm1, %v6551_v51  ;;  %vm11583_vm2 = vmmov %vm11579_vm0 }
 0x2cc   : > { %v6557_v11 = vpack.c.bf16 %v1862_v61, %v1861_v6  ;;  %v7615_v3 = vunpack.i.h.bf16 %v7613_v14  ;;  %v7614_v19 = vunpack.i.l.bf16 %v7613_v14  ;;  %v7623_v10 = vpop.permute.xlu0 %7622  ;;  %v6554_v20 = vpack.c.bf16 %v1856_v60, %v1855_v62  ;;  %1822 = vmatprep.mubr.f32.mxu1 %v8751_v12  ;;  %vm11584_vm15 = vmmov %vm11579_vm0  ;;  %v1879_v61 = vld [vmem:[#allocation8 + $0x28] sm:$0xff] }
 0x2cd   : > { %v7625_v0 = vunpack.i.h.bf16 %v7623_v10  ;;  %v7624_v1 = vunpack.i.l.bf16 %v7623_v10  ;;  %vm11585_vm4 = vmmov %vm11579_vm0 }
 0x2ce   : > { %6556 = vmatprep.subr.msk.bf16.mxu1 %vm9277_vm13, %v6554_v20  ;;  %6029 = vmatmul.mubr.msk.f32.gmra.mrb[2].mxu1 %vm1662_vm8, %v1610_v7 }
 0x2cf   : > { %v1858_v21 = vsel %vm11583_vm2, %v7615_v3, %v7625_v0  ;;  %v1864_v23 = vsel %vm11579_vm0, %v7625_v0, %v7615_v3  ;;  %v1857_v24 = vsel %vm11584_vm15, %v7614_v19, %v7624_v1  ;;  %v1863_v26 = vsel %vm11585_vm4, %v7624_v1, %v7614_v19  ;;  %v7618_v28 = vpop.permute.xlu1 %7617  ;;  %6559 = vmatpush1.bf16.msk.msra.mxu1 %vm9300_vm1, %v6557_v11 }
 0x2d0   : > { %v6563_v29 = vpack.c.bf16 %v1864_v23, %v1863_v26  ;;  %v7620_v30 = vunpack.i.h.bf16 %v7618_v28  ;;  %v7619_v32 = vunpack.i.l.bf16 %v7618_v28  ;;  %v7628_v36 = vpop.permute.xlu0 %7627  ;;  %v6560_v34 = vpack.c.bf16 %v1858_v21, %v1857_v24  ;;  %1950 = vmatprep.mubr.f32.mxu1 %v8751_v12 }
 0x2d1   : > { %v7630_v38 = vunpack.i.h.bf16 %v7628_v36  ;;  %v7629_v40 = vunpack.i.l.bf16 %v7628_v36  ;;  %vm11586_vm2 = vcmp.lt.s32.totalorder %v9162_v18, 1 }
 0x2d2   : > { %6562 = vmatprep.subr.msk.bf16.mxu1 %vm9277_vm13, %v6560_v34  ;;  %vm11587_vm0 = vmmov %vm11586_vm2 }
 0x2d3   : > { %v1992_v27 = vsel %vm11586_vm2, %v7620_v30, %v7630_v38  ;;  %v1998_v35 = vsel %vm11587_vm0, %v7630_v38, %v7620_v30  ;;  %vm11588_vm15 = vmmov %vm11587_vm0  ;;  %v7633_v48 = vpop.permute.xlu1 %7632  ;;  %6565 = vmatpush1.bf16.msk.msra.mxu1 %vm9300_vm1, %v6563_v29  ;;  %v2016_v29 = vld [vmem:[#allocation8 + $0x30] sm:$0xff] }
 0x2d4   : > { %v1991_v41 = vsel %vm11588_vm15, %v7619_v32, %v7629_v40  ;;  %vm11589_vm4 = vmmov %vm11587_vm0  ;;  %v7635_v49 = vunpack.i.h.bf16 %v7633_v48  ;;  %v7634_v52 = vunpack.i.l.bf16 %v7633_v48  ;;  %v7638_v50 = vpop.permute.xlu0 %7637 }
 0x2d5   : > { %v1997_v43 = vsel %vm11589_vm4, %v7629_v40, %v7619_v32  ;;  %v6566_v51 = vpack.c.bf16 %v1992_v27, %v1991_v41  ;;  %v7640_v53 = vunpack.i.h.bf16 %v7638_v50  ;;  %v7639_v54 = vunpack.i.l.bf16 %v7638_v50  ;;  %vm11590_vm2 = vmmov %vm11587_vm0  ;;  %v2017_v27 = vld [vmem:[#allocation8 + $0x38] sm:$0xff] }
 0x2d6   : > { %v6569_v47 = vpack.c.bf16 %v1998_v35, %v1997_v43  ;;  %6042 = vmatmul.mubr.msk.f32.vlgmr.msra.gmra.mrb[0].mxu1 %vm1662_vm8, %v1878_v44  ;;  %vm11591_vm15 = vmmov %vm11587_vm0 }
 0x2d7   : > { %6568 = vmatprep.subr.msk.bf16.mxu1 %vm9226_vm7, %v6566_v51  ;;  %v1994_v8 = vsel %vm11590_vm2, %v7635_v49, %v7640_v53  ;;  %v2000_v55 = vsel %vm11587_vm0, %v7640_v53, %v7635_v49  ;;  %v1993_v33 = vsel %vm11591_vm15, %v7634_v52, %v7639_v54  ;;  %vm11592_vm4 = vmmov %vm11587_vm0  ;;  %v7643_v60 = vpop.permute.xlu1 %7642  ;;  %1956 = vmatprep.mubr.f32.mxu1 %v8751_v12 }
 0x2d8   : > { %v1999_v22 = vsel %vm11592_vm4, %v7639_v54, %v7634_v52  ;;  %6571 = vmatpush1.bf16.msk.msra.mxu1 %vm9328_vm6, %v6569_v47  ;;  %v7645_v6 = vunpack.i.h.bf16 %v7643_v60  ;;  %v7644_v14 = vunpack.i.l.bf16 %v7643_v60  ;;  %v7648_v7 = vpop.permute.xlu0 %7647  ;;  %v6572_v11 = vpack.c.bf16 %v1994_v8, %v1993_v33  ;;  %vm11593_vm2 = vmmov %vm11587_vm0 }
 0x2d9   : > { %v6575_v62 = vpack.c.bf16 %v2000_v55, %v1999_v22  ;;  %v7650_v3 = vunpack.i.h.bf16 %v7648_v7  ;;  %v7649_v19 = vunpack.i.l.bf16 %v7648_v7  ;;  %vm11594_vm15 = vmmov %vm11587_vm0 }
 0x2da   : > { %6574 = vmatprep.subr.msk.bf16.mxu1 %vm9226_vm7, %v6572_v11  ;;  %6043 = vmatmul.mubr.msk.f32.gmra.mrb[2].mxu1 %vm1662_vm8, %v1879_v61  ;;  %vm11595_vm4 = vmmov %vm11587_vm0  ;;  %v2106_v11 = vld [vmem:[#allocation8 + $0x40] sm:$0xff] }
 0x2db   : > { %v1996_v10 = vsel %vm11593_vm2, %v7645_v6, %v7650_v3  ;;  %v2002_v20 = vsel %vm11587_vm0, %v7650_v3, %v7645_v6  ;;  %v1995_v0 = vsel %vm11594_vm15, %v7644_v14, %v7649_v19  ;;  %v2001_v1 = vsel %vm11595_vm4, %v7649_v19, %v7644_v14  ;;  %v7653_v21 = vpop.permute.xlu1 %7652  ;;  %2088 = vmatprep.mubr.f32.mxu1 %v8751_v12 }
 0x2dc   : > { %6577 = vmatpush1.bf16.msk.msra.mxu1 %vm9328_vm6, %v6575_v62  ;;  %v6581_v23 = vpack.c.bf16 %v2002_v20, %v2001_v1  ;;  %v7658_v24 = vpop.permute.xlu0 %7657  ;;  %v6578_v26 = vpack.c.bf16 %v1996_v10, %v1995_v0  ;;  %v7655_v32 = vunpack.i.h.bf16 %v7653_v21  ;;  %v7654_v36 = vunpack.i.l.bf16 %v7653_v21 }
 0x2dd   : > { %v7660_v34 = vunpack.i.h.bf16 %v7658_v24  ;;  %v7659_v38 = vunpack.i.l.bf16 %v7658_v24  ;;  %vm11596_vm2 = vcmp.lt.s32.totalorder %v9162_v18, 127 }
 0x2de   : > { %6580 = vmatprep.subr.msk.bf16.mxu1 %vm9226_vm7, %v6578_v26  ;;  %vm11597_vm0 = vmmov %vm11596_vm2 }
 0x2df   : > { %v7663_v28 = vpop.permute.xlu1 %7662  ;;  %v2226_v47 = vsel %vm11596_vm2, %v7660_v34, %v7655_v32  ;;  %v2225_v49 = vsel %vm11597_vm0, %v7659_v38, %v7654_v36  ;;  %vm11598_vm15 = vmmov %vm11597_vm0 }
 0x2e0   : > { %6583 = vmatpush1.bf16.msk.msra.mxu1 %vm9328_vm6, %v6581_v23  ;;  %v7668_v30 = vpop.permute.xlu0 %7667  ;;  %v7665_v35 = vunpack.i.h.bf16 %v7663_v28  ;;  %v7664_v41 = vunpack.i.l.bf16 %v7663_v28  ;;  %v2220_v52 = vsel %vm11598_vm15, %v7655_v32, %v7660_v34  ;;  %vm11599_vm4 = vmmov %vm11597_vm0  ;;  %v6596_v55 = vpack.c.bf16 %v2226_v47, %v2225_v49  ;;  %v2107_v28 = vld [vmem:[#allocation8 + $0x48] sm:$0xff] }
 0x2e1   : > { %6585 = vmatprep.subr.bf16.mxu1 %v9345_v45  ;;  %v7670_v43 = vunpack.i.h.bf16 %v7668_v30  ;;  %v7669_v48 = vunpack.i.l.bf16 %v7668_v30  ;;  %v2219_v50 = vsel %vm11599_vm4, %v7654_v36, %v7659_v38  ;;  %vm11600_vm14 = vmmov %vm11597_vm0  ;;  %vm11605_vm15 = vcmp.lt.s32.totalorder %v9162_v18, 113 }
 0x2e2   : > { %vm11601_vm1 = vmmov %vm11597_vm0  ;;  %v6599_v33 = vpack.c.bf16 %v2220_v52, %v2219_v50 }
 0x2e3   : > { %6056 = vmatmul.mubr.msk.f32.vlgmr.msra.gmra.mrb[0].mxu1 %vm1662_vm8, %v2016_v29  ;;  %v7673_v40 = vpop.permute.xlu1 %7672  ;;  %v2228_v53 = vsel %vm11600_vm14, %v7670_v43, %v7665_v35  ;;  %v2227_v54 = vsel %vm11601_vm1, %v7669_v48, %v7664_v41  ;;  %vm11602_vm2 = vmmov %vm11597_vm0  ;;  %v2221_v60 = vsel %vm11597_vm0, %v7664_v41, %v7669_v48 }
 0x2e4   : > { %6587 = vmatpush1.bf16.msra.mxu1 %v9356_v9  ;;  %v7683_v44 = vpop.permute.xlu0 %7682  ;;  %2094 = vmatprep.mubr.f32.mxu1 %v8751_v12  ;;  %v2222_v22 = vsel %vm11602_vm2, %v7665_v35, %v7670_v43  ;;  %v7675_v61 = vunpack.i.h.bf16 %v7673_v40  ;;  %v7674_v62 = vunpack.i.l.bf16 %v7673_v40  ;;  %v6602_v3 = vpack.c.bf16 %v2228_v53, %v2227_v54  ;;  %vm11603_vm1 = vmmov %vm11597_vm0 }
 0x2e5   : > { %6589 = vmatprep.subr.bf16.mxu1 %v9365_v59  ;;  %v7685_v6 = vunpack.i.h.bf16 %v7683_v44  ;;  %v7684_v14 = vunpack.i.l.bf16 %v7683_v44  ;;  %v6605_v21 = vpack.c.bf16 %v2222_v22, %v2221_v60  ;;  %vm11604_vm14 = vmmov %vm11597_vm0  ;;  %v2244_v60 = vld [vmem:[#allocation8 + $0x50] sm:$0xff] }
 0x2e6   : > { %vm11606_vm4 = vmmov %vm11605_vm15 }
 0x2e7   : > { %6057 = vmatmul.mubr.msk.f32.gmra.mrb[2].mxu1 %vm1662_vm8, %v2017_v27  ;;  %v7678_v51 = vpop.permute.xlu1 %7677  ;;  %v2230_v23 = vsel %vm11603_vm1, %v7685_v6, %v7675_v61  ;;  %v2229_v24 = vsel %vm11604_vm14, %v7684_v14, %v7674_v62  ;;  %vm11607_vm2 = vmmov %vm11597_vm0  ;;  %v2223_v35 = vsel %vm11597_vm0, %v7674_v62, %v7684_v14 }
 0x2e8   : > { %6591 = vmatpush1.bf16.msra.mxu1 %v9370_v2  ;;  %v7688_v8 = vpop.permute.xlu0 %7687  ;;  %2178 = vmatprep.mubr.f32.mxu1 %v8751_v12  ;;  %v7680_v19 = vunpack.i.h.bf16 %v7678_v51  ;;  %v7679_v10 = vunpack.i.l.bf16 %v7678_v51  ;;  %v2224_v27 = vsel %vm11607_vm2, %v7675_v61, %v7685_v6  ;;  %v6608_v41 = vpack.c.bf16 %v2230_v23, %v2229_v24  ;;  %vm11608_vm1 = vmmov %vm11606_vm4 }
 0x2e9   : > { %6593 = vmatprep.subr.bf16.mxu1 %v9563_v4  ;;  %v7690_v20 = vunpack.i.h.bf16 %v7688_v8  ;;  %v7689_v0 = vunpack.i.l.bf16 %v7688_v8  ;;  %vm11609_vm14 = vmmov %vm11608_vm1  ;;  %v6611_v52 = vpack.c.bf16 %v2224_v27, %v2223_v35 }
 0x2ea   : > { %vm11612_vm2 = vmmov %vm11608_vm1 }
 0x2eb   : > { %v7693_v7 = vpop.permute.xlu1 %7692  ;;  %v2364_v29 = vsel %vm11605_vm15, %v7690_v20, %v7680_v19  ;;  %v2363_v30 = vsel %vm11606_vm4, %v7689_v0, %v7679_v10  ;;  %v2358_v43 = vsel %vm11608_vm1, %v7680_v19, %v7690_v20  ;;  %v2357_v48 = vsel %vm11609_vm14, %v7679_v10, %v7689_v0  ;;  %vm11610_vm15 = vmmov %vm11608_vm1 }
 0x2ec   : > { %6595 = vmatpush1.bf16.msra.mxu1 %v9565_v5  ;;  %v7698_v1 = vpop.permute.xlu0 %7697  ;;  %v7695_v36 = vunpack.i.h.bf16 %v7693_v7  ;;  %v7694_v34 = vunpack.i.l.bf16 %v7693_v7  ;;  %v6614_v49 = vpack.c.bf16 %v2364_v29, %v2363_v30  ;;  %vm11611_vm4 = vmmov %vm11608_vm1  ;;  %v6617_v53 = vpack.c.bf16 %v2358_v43, %v2357_v48 }
 0x2ed   : > { %6598 = vmatprep.subr.msk.bf16.mxu1 %vm9277_vm13, %v6596_v55  ;;  %v7700_v38 = vunpack.i.h.bf16 %v7698_v1  ;;  %v7699_v40 = vunpack.i.l.bf16 %v7698_v1  ;;  %vm11613_vm0 = vmmov %vm11608_vm1 }
 0x2ee   : > { %vm11614_vm1 = vmmov %vm11613_vm0 }
 0x2ef   : > { %6058 = vmatmul.mubr.msk.f32.vlgmr.msra.gmra.mrb[0].mxu1 %vm1662_vm8, %v2106_v11  ;;  %v9830_v26 = vpop.permute.xlu1 %7702  ;;  %v2366_v50 = vsel %vm11610_vm15, %v7700_v38, %v7695_v36  ;;  %v2365_v51 = vsel %vm11611_vm4, %v7699_v40, %v7694_v34  ;;  %v2360_v61 = vsel %vm11612_vm2, %v7695_v36, %v7700_v38  ;;  %v2359_v62 = vsel %vm11613_vm0, %v7694_v34, %v7699_v40  ;;  %vm11615_vm14 = vmmov %vm11613_vm0 }
 0x2f0   : > { %6601 = vmatpush1.bf16.msk.msra.mxu1 %vm9395_vm9, %v6599_v33  ;;  %v7713_v32 = vpop.permute.xlu0 %7712  ;;  %2184 = vmatprep.mubr.f32.mxu1 %v8751_v12  ;;  %v7705_v54 = vunpack.i.h.bf16 %v9830_v26  ;;  %v7704_v8 = vunpack.i.l.bf16 %v9830_v26  ;;  %v6620_v14 = vpack.c.bf16 %v2366_v50, %v2365_v51  ;;  %v6623_v10 = vpack.c.bf16 %v2360_v61, %v2359_v62  ;;  %vm11618_vm2 = vmmov %vm11613_vm0 }
 0x2f1   : > { %6604 = vmatprep.subr.msk.bf16.mxu1 %vm9277_vm13, %v6602_v3  ;;  %v7715_v55 = vunpack.i.h.bf16 %v7713_v32  ;;  %v7714_v33 = vunpack.i.l.bf16 %v7713_v32  ;;  %vm11616_vm15 = vcmp.lt.s32.totalorder %v9162_v18, 112 }
 0x2f2   : > { %vm11617_vm4 = vmmov %vm11616_vm15 }
 0x2f3   : > { %6059 = vmatmul.mubr.msk.f32.gmra.mrb[2].mxu1 %vm1662_vm8, %v2107_v28  ;;  %v7708_v44 = vpop.permute.xlu1 %7707  ;;  %v2368_v20 = vsel %vm11614_vm1, %v7715_v55, %v7705_v54  ;;  %v2367_v0 = vsel %vm11615_vm14, %v7714_v33, %v7704_v8  ;;  %v2362_v36 = vsel %vm11618_vm2, %v7705_v54, %v7715_v55  ;;  %v2361_v34 = vsel %vm11613_vm0, %v7704_v8, %v7714_v33  ;;  %vm11619_vm1 = vmmov %vm11617_vm4  ;;  %v2382_v55 = vld [vmem:[#allocation8 + $0x60] sm:$0xff] }
 0x2f4   : > { %6607 = vmatpush1.bf16.msk.msra.mxu1 %vm9395_vm9, %v6605_v21  ;;  %v7718_v47 = vpop.permute.xlu0 %7717  ;;  %2316 = vmatprep.mubr.f32.mxu1 %v8751_v12  ;;  %v7710_v7 = vunpack.i.h.bf16 %v7708_v44  ;;  %v7709_v11 = vunpack.i.l.bf16 %v7708_v44  ;;  %v2245_v21 = vld [vmem:[#allocation8 + $0x58] sm:$0xff]  ;;  %v6626_v38 = vpack.c.bf16 %v2368_v20, %v2367_v0  ;;  %vm11620_vm14 = vmmov %vm11619_vm1 }
 0x2f5   : > { %6610 = vmatprep.subr.msk.bf16.mxu1 %vm9277_vm13, %v6608_v41  ;;  %v7720_v3 = vunpack.i.h.bf16 %v7718_v47  ;;  %v7719_v19 = vunpack.i.l.bf16 %v7718_v47  ;;  %v6629_v47 = vpack.c.bf16 %v2362_v36, %v2361_v34  ;;  %vm11623_vm2 = vmmov %vm11619_vm1 }
 0x2f6   : > { %vm11624_vm0 = vmmov %vm11619_vm1 }
 0x2f7   : > { %v7723_v22 = vpop.permute.xlu1 %7722  ;;  %v2502_v30 = vsel %vm11616_vm15, %v7720_v3, %v7710_v7  ;;  %v2501_v32 = vsel %vm11617_vm4, %v7719_v19, %v7709_v11  ;;  %v2496_v40 = vsel %vm11619_vm1, %v7710_v7, %v7720_v3  ;;  %v2495_v27 = vsel %vm11620_vm14, %v7709_v11, %v7719_v19  ;;  %vm11621_vm15 = vmmov %vm11619_vm1  ;;  %v2383_v19 = vld [vmem:[#allocation8 + $0x68] sm:$0xff] }
 0x2f8   : > { %6613 = vmatpush1.bf16.msk.msra.mxu1 %vm9395_vm9, %v6611_v52  ;;  %v7728_v6 = vpop.permute.xlu0 %7727  ;;  %v7725_v23 = vunpack.i.h.bf16 %v7723_v22  ;;  %v7724_v24 = vunpack.i.l.bf16 %v7723_v22  ;;  %vm11622_vm4 = vmmov %vm11619_vm1  ;;  %v6632_v44 = vpack.c.bf16 %v2502_v30, %v2501_v32  ;;  %v6635_v51 = vpack.c.bf16 %v2496_v40, %v2495_v27 }
 0x2f9   : > { %6616 = vmatprep.subr.msk.bf16.mxu1 %vm9430_vm5, %v6614_v49  ;;  %v7730_v26 = vunpack.i.h.bf16 %v7728_v6  ;;  %v7729_v28 = vunpack.i.l.bf16 %v7728_v6  ;;  %vm11625_vm1 = vmmov %vm11624_vm0 }
 0x2fa   : > { %vm11626_vm14 = vmmov %vm11624_vm0 }
 0x2fb   : > { %6072 = vmatmul.mubr.msk.f32.vlgmr.msra.gmra.mrb[0].mxu1 %vm1662_vm8, %v2244_v60  ;;  %v7733_v1 = vpop.permute.xlu1 %7732  ;;  %v2504_v35 = vsel %vm11621_vm15, %v7730_v26, %v7725_v23  ;;  %v2503_v41 = vsel %vm11622_vm4, %v7729_v28, %v7724_v24  ;;  %v2498_v49 = vsel %vm11623_vm2, %v7725_v23, %v7730_v26  ;;  %v2497_v52 = vsel %vm11624_vm0, %v7724_v24, %v7729_v28  ;;  %vm11629_vm2 = vmmov %vm11624_vm0 }
 0x2fc   : > { %6619 = vmatpush1.bf16.msk.msra.mxu1 %vm9328_vm6, %v6617_v53  ;;  %v7743_v29 = vpop.permute.xlu0 %7742  ;;  %2322 = vmatprep.mubr.f32.mxu1 %v8751_v12  ;;  %v7735_v50 = vunpack.i.h.bf16 %v7733_v1  ;;  %v7734_v53 = vunpack.i.l.bf16 %v7733_v1  ;;  %v6637_v33 = vpack.c.bf16 %v2504_v35, %v2503_v41  ;;  %v6640_v3 = vpack.c.bf16 %v2498_v49, %v2497_v52 }
 0x2fd   : > { %6622 = vmatprep.subr.msk.bf16.mxu1 %vm9430_vm5, %v6620_v14  ;;  %v7745_v54 = vunpack.i.h.bf16 %v7743_v29  ;;  %v7744_v8 = vunpack.i.l.bf16 %v7743_v29  ;;  %vm11627_vm15 = vcmp.lt.s32.totalorder %v9162_v18, 111 }
 0x2fe   : > { %vm11628_vm4 = vmmov %vm11627_vm15 }
 0x2ff   : > { %6073 = vmatmul.mubr.msk.f32.gmra.mrb[2].mxu1 %vm1662_vm8, %v2245_v21  ;;  %v7738_v43 = vpop.permute.xlu1 %7737  ;;  %v2506_v7 = vsel %vm11625_vm1, %v7745_v54, %v7735_v50  ;;  %v2505_v11 = vsel %vm11626_vm14, %v7744_v8, %v7734_v53  ;;  %v2500_v24 = vsel %vm11629_vm2, %v7735_v50, %v7745_v54  ;;  %v2499_v26 = vsel %vm11624_vm0, %v7734_v53, %v7744_v8  ;;  %vm11630_vm1 = vmmov %vm11628_vm4  ;;  %v2521_v8 = vld [vmem:[#allocation8 + $0x78] sm:$0xff] }
 0x300   : > { %6625 = vmatpush1.bf16.msk.msra.mxu1 %vm9328_vm6, %v6623_v10  ;;  %v7748_v48 = vpop.permute.xlu0 %7747  ;;  %2454 = vmatprep.mubr.f32.mxu1 %v8751_v12  ;;  %v7740_v22 = vunpack.i.h.bf16 %v7738_v43  ;;  %v7739_v60 = vunpack.i.l.bf16 %v7738_v43  ;;  %v6642_v28 = vpack.c.bf16 %v2506_v7, %v2505_v11  ;;  %vm11631_vm14 = vmmov %vm11630_vm1  ;;  %v6645_v27 = vpack.c.bf16 %v2500_v24, %v2499_v26 }
 0x301   : > { %6628 = vmatprep.subr.msk.bf16.mxu1 %vm9430_vm5, %v6626_v38  ;;  %v7750_v61 = vunpack.i.h.bf16 %v7748_v48  ;;  %v7749_v62 = vunpack.i.l.bf16 %v7748_v48  ;;  %vm11634_vm2 = vmmov %vm11630_vm1 }
 0x302   : > { %vm11635_vm0 = vmmov %vm11630_vm1 }
 0x303   : > { %v7753_v6 = vpop.permute.xlu1 %7752  ;;  %v2640_v10 = vsel %vm11627_vm15, %v7750_v61, %v7740_v22  ;;  %v2639_v20 = vsel %vm11628_vm4, %v7749_v62, %v7739_v60  ;;  %v2634_v29 = vsel %vm11630_vm1, %v7740_v22, %v7750_v61  ;;  %v2633_v30 = vsel %vm11631_vm14, %v7739_v60, %v7749_v62  ;;  %vm11632_vm15 = vmmov %vm11630_vm1 }
 0x304   : > { %6631 = vmatpush1.bf16.msk.msra.mxu1 %vm9328_vm6, %v6629_v47  ;;  %v7758_v14 = vpop.permute.xlu0 %7757  ;;  %v7755_v0 = vunpack.i.h.bf16 %v7753_v6  ;;  %v7754_v1 = vunpack.i.l.bf16 %v7753_v6  ;;  %v6647_v34 = vpack.c.bf16 %v2640_v10, %v2639_v20  ;;  %vm11633_vm4 = vmmov %vm11630_vm1  ;;  %v6650_v35 = vpack.c.bf16 %v2634_v29, %v2633_v30  ;;  %v2520_v47 = vld [vmem:[#allocation8 + $0x70] sm:$0xff]  ;;  %v2658_v6 = vld [vmem:[#allocation8 + $0x80] sm:$0xff] }
 0x305   : > { %6634 = vmatprep.subr.msk.bf16.mxu1 %vm9466_vm12, %v6632_v44  ;;  %v7760_v21 = vunpack.i.h.bf16 %v7758_v14  ;;  %v7759_v23 = vunpack.i.l.bf16 %v7758_v14  ;;  %vm11636_vm1 = vmmov %vm11635_vm0  ;;  %v2659_v20 = vld [vmem:[#allocation8 + $0x88] sm:$0xff] }
 0x306   : > { %vm11637_vm14 = vmmov %vm11635_vm0 }
 0x307   : > { %6086 = vmatmul.mubr.msk.f32.vlgmr.msra.gmra.mrb[0].mxu1 %vm1662_vm8, %v2382_v55  ;;  %v7763_v32 = vpop.permute.xlu1 %7762  ;;  %v2642_v38 = vsel %vm11632_vm15, %v7760_v21, %v7755_v0  ;;  %v2641_v40 = vsel %vm11633_vm4, %v7759_v23, %v7754_v1  ;;  %v2636_v49 = vsel %vm11634_vm2, %v7755_v0, %v7760_v21  ;;  %v2635_v52 = vsel %vm11635_vm0, %v7754_v1, %v7759_v23  ;;  %vm11638_vm15 = vmmov %vm11635_vm0 }
 0x308   : > { %6636 = vmatpush1.bf16.msra.mxu1 %v6635_v51  ;;  %2460 = vmatprep.mubr.f32.mxu1 %v8751_v12  ;;  %v7768_v36 = vpop.permute.xlu0 %7767  ;;  %v7765_v41 = vunpack.i.h.bf16 %v7763_v32  ;;  %v7764_v43 = vunpack.i.l.bf16 %v7763_v32  ;;  %v6653_v50 = vpack.c.bf16 %v2642_v38, %v2641_v40  ;;  %v6656_v51 = vpack.c.bf16 %v2636_v49, %v2635_v52  ;;  %vm11639_vm4 = vmmov %vm11635_vm0 }
 0x309   : > { %6639 = vmatprep.subr.msk.bf16.mxu1 %vm9466_vm12, %v6637_v33  ;;  %v7770_v48 = vunpack.i.h.bf16 %v7768_v36  ;;  %v7769_v44 = vunpack.i.l.bf16 %v7768_v36  ;;  %vm11640_vm2 = vcmp.lt.s32.totalorder %v9162_v18, 16 }
 0x30a   : > { %vm11641_vm0 = vmmov %vm11640_vm2 }
 0x30b   : > { %6087 = vmatmul.mubr.msk.f32.gmra.mrb[2].mxu1 %vm1662_vm8, %v2383_v19  ;;  %v2644_v53 = vsel %vm11636_vm1, %v7770_v48, %v7765_v41  ;;  %v2643_v54 = vsel %vm11637_vm14, %v7769_v44, %v7764_v43  ;;  %v2638_v55 = vsel %vm11638_vm15, %v7765_v41, %v7770_v48  ;;  %v2637_v33 = vsel %vm11639_vm4, %v7764_v43, %v7769_v44  ;;  %vm11642_vm1 = vmmov %vm11641_vm0 }
 0x30c   : > { %6641 = vmatpush1.bf16.msra.mxu1 %v6640_v3  ;;  %2592 = vmatprep.mubr.f32.mxu1 %v8751_v12  ;;  %v6659_v22 = vpack.c.bf16 %v2644_v53, %v2643_v54  ;;  %v6662_v61 = vpack.c.bf16 %v2638_v55, %v2637_v33  ;;  %vm11643_vm14 = vmmov %vm11641_vm0 }
 0x30d   : > { %6644 = vmatprep.subr.msk.bf16.mxu1 %vm9466_vm12, %v6642_v28  ;;  %vm11644_vm15 = vmmov %vm11641_vm0 }
 0x30e   : > { %vm11645_vm4 = vmmov %vm11641_vm0 }
 0x310   : > { %6646 = vmatpush1.bf16.msra.mxu1 %v6645_v27 }
 0x311   : > { %6649 = vmatprep.subr.msk.bf16.mxu1 %vm9501_vm11, %v6647_v34 }
 0x313   : > { %6094 = vmatmul.mubr.msk.f32.vlgmr.msra.gmra.mrb[0].mxu1 %vm1662_vm8, %v2520_v47 }
 0x314   : > { %6652 = vmatpush1.bf16.msk.msra.mxu1 %vm9395_vm9, %v6650_v35  ;;  %2598 = vmatprep.mubr.f32.mxu1 %v8751_v12 }
 0x315   : > { %6655 = vmatprep.subr.msk.bf16.mxu1 %vm9501_vm11, %v6653_v50 }
 0x317   : > { %6095 = vmatmul.mubr.msk.f32.gmra.mrb[2].mxu1 %vm1662_vm8, %v2521_v8 }
 0x318   : > { %6658 = vmatpush1.bf16.msk.msra.mxu1 %vm9395_vm9, %v6656_v51  ;;  %2730 = vmatprep.mubr.f32.mxu1 %v8751_v12  ;;  %v2753_v60 = vpop.permute.xlu1 %2752 }
 0x319   : > { %6661 = vmatprep.subr.msk.bf16.mxu1 %vm9501_vm11, %v6659_v22  ;;  %v2758_v62 = vpop.permute.xlu0 %2757 }
 0x31c   : > { %6664 = vmatpush1.bf16.msk.msra.mxu1 %vm9395_vm9, %v6662_v61  ;;  %v7773_v14 = vpop.permute.xlu1 %7772 }
 0x31d   : > { %v7775_v7 = vunpack.i.h.bf16 %v7773_v14  ;;  %v7774_v11 = vunpack.i.l.bf16 %v7773_v14  ;;  %v7778_v3 = vpop.permute.xlu0 %7777 }
 0x31e   : > { %v7780_v19 = vunpack.i.h.bf16 %v7778_v3  ;;  %v7779_v10 = vunpack.i.l.bf16 %v7778_v3 }
 0x31f   : > { %6108 = vmatmul.mubr.msk.f32.vlgmr.msra.gmra.mrb[0].mxu1 %vm1662_vm8, %v2658_v6 }
 0x320   : > { %2736 = vmatprep.mubr.f32.mxu1 %v8751_v12  ;;  %v2895_v0 = vsel %vm11640_vm2, %v7780_v19, %v7775_v7  ;;  %v2894_v1 = vsel %vm11641_vm0, %v7779_v10, %v7774_v11  ;;  %v7783_v21 = vpop.permute.xlu1 %7782  ;;  %v2886_v23 = vsel %vm11642_vm1, %v7774_v11, %v7779_v10  ;;  %v2887_v24 = vsel %vm11643_vm14, %v7775_v7, %v7780_v19  ;;  %vm11646_vm2 = vmmov %vm11641_vm0 }
 0x321   : > { %v6667_v26 = vpack.c.bf16 %v2895_v0, %v2894_v1  ;;  %v7785_v28 = vunpack.i.h.bf16 %v7783_v21  ;;  %v7784_v29 = vunpack.i.l.bf16 %v7783_v21  ;;  %v7788_v30 = vpop.permute.xlu0 %7787  ;;  %v6665_v32 = vpack.c.bf16 %v2887_v24, %v2886_v23  ;;  %vm11648_vm1 = vmmov %vm11641_vm0  ;;  %v8500_v24 = vld [vmem:[%s9036_s25 + $0x30] sm:$0xff] }
 0x322   : > { %v7790_v36 = vunpack.i.h.bf16 %v7788_v30  ;;  %v7789_v34 = vunpack.i.l.bf16 %v7788_v30  ;;  %vm11649_vm14 = vmmov %vm11641_vm0 }
 0x323   : > { %6109 = vmatmul.mubr.msk.f32.gmra.mrb[2].mxu1 %vm1662_vm8, %v2659_v20  ;;  %6666 = vmatprep.subr.bf16.mxu0 %v6665_v32  ;;  %vm11647_vm8 = vmmov %vm11641_vm0 }
 0x324   : > { %4466 = vmatprep.mubr.f32.mxu1 %v8751_v12  ;;  %v2897_v38 = vsel %vm11644_vm15, %v7790_v36, %v7785_v28  ;;  %v2896_v40 = vsel %vm11645_vm4, %v7789_v34, %v7784_v29  ;;  %v7793_v27 = vpop.permute.xlu1 %7792  ;;  %6669 = vmatpush1.bf16.msk.msra.mxu0 %vm9187_vm3, %v6667_v26  ;;  %v2888_v35 = vsel %vm11646_vm2, %v7784_v29, %v7789_v34  ;;  %vm11650_vm15 = vmmov %vm11641_vm0 }
 0x325   : > { %v2889_v41 = vsel %vm11641_vm0, %v7785_v28, %v7790_v36  ;;  %v6672_v43 = vpack.c.bf16 %v2897_v38, %v2896_v40  ;;  %v7795_v48 = vunpack.i.h.bf16 %v7793_v27  ;;  %v7794_v44 = vunpack.i.l.bf16 %v7793_v27  ;;  %v7798_v47 = vpop.permute.xlu0 %7797  ;;  %v8502_v28 = vld [vmem:[%s9036_s25 + $0x38] sm:$0xff]  ;;  %v8503_v36 = vld [vmem:[%s9036_s25] sm:$0xff]  ;;  %vm11651_vm4 = vmmov %vm11641_vm0 }
 0x326   : > { %v6670_v49 = vpack.c.bf16 %v2889_v41, %v2888_v35  ;;  %v7800_v52 = vunpack.i.h.bf16 %v7798_v47  ;;  %v7799_v50 = vunpack.i.l.bf16 %v7798_v47  ;;  %v8506_v38 = vld [vmem:[%s9036_s25 + $0x18] sm:$0xff]  ;;  %v6242_v27 = vld [vmem:[%s11509_s5 + $0x20] sm:$0xff]  ;;  %v6243_v41 = vld [vmem:[%s11509_s5 + $0x28] sm:$0xff] }
 0x327   : > { %vm11652_vm2 = vmmov %vm11641_vm0 }
 0x328   : > { %6671 = vmatprep.subr.bf16.mxu0 %v6670_v49  ;;  %v2899_v51 = vsel %vm11647_vm8, %v7800_v52, %v7795_v48  ;;  %v2898_v53 = vsel %vm11648_vm1, %v7799_v50, %v7794_v44  ;;  %v2890_v54 = vsel %vm11649_vm14, %v7794_v44, %v7799_v50  ;;  %v2891_v8 = vsel %vm11650_vm15, %v7795_v48, %v7800_v52  ;;  %vm11653_vm8 = vmmov %vm11641_vm0 }
 0x329   : > { %6674 = vmatpush1.bf16.msk.msra.mxu0 %vm9187_vm3, %v6672_v43  ;;  %v6677_v55 = vpack.c.bf16 %v2899_v51, %v2898_v53  ;;  %v6675_v33 = vpack.c.bf16 %v2891_v8, %v2890_v54  ;;  %vm2921_vm1 = vcmask 523264   ;;  %vm11654_vm14 = vcmp.lt.s32.totalorder %v9162_v18, 17 }
 0x32a   : > { %vm11655_vm15 = vmmov %vm11654_vm14 }
 0x32b   : > { %6676 = vmatprep.subr.bf16.mxu0 %v6675_v33 }
 0x32d   : > { %6679 = vmatpush1.bf16.msk.msra.mxu0 %vm9187_vm3, %v6677_v55 }
 0x3f2   : > { %v2732_v22 = vpop.f32.mrb[0].mxu1 }
 0x3f3   : > { %v2734_v61 = vpop.f32.mrb[1].mxu1  ;;  %v2760_v6 = vadd.f32 %v2753_v60, %v2732_v22 }
 0x3f4   : > { %v2761_v14 = vadd.f32 %v2753_v60, %v2734_v61  ;;  %v8499_v60 = vld [vmem:[%s9036_s25 + $0x20] sm:$0xff] }
 0x3f5   : > { %v2764_v10 = vmax.f32 %v2760_v6, 0.0  ;;  %v10009_v26 = vpack.i.bf16 %v8500_v24, %v8499_v60 }
 0x3f6   : > { %v2738_v7 = vpop.f32.mrb[2].mxu1  ;;  %v2765_v0 = vmax.f32 %v2761_v14, 0.0 }
 0x3f7   : > { %v2762_v11 = vadd.f32 %v2758_v62, %v2738_v7  ;;  %v2740_v3 = vpop.f32.mrb[3].mxu1 }
 0x3f8   : > { %v2763_v19 = vadd.f32 %v2758_v62, %v2740_v3  ;;  %v8501_v62 = vld [vmem:[%s9036_s25 + $0x28] sm:$0xff] }
 0x3f9   : > { %v2766_v20 = vmax.f32 %v2762_v11, 0.0  ;;  %v10013_v29 = vpack.i.bf16 %v8502_v28, %v8501_v62  ;;  %v2919_v62 = vld [vmem:[#allocation9 + $0x10] sm:$0xff] }
 0x3fa   : > { %v2767_v1 = vmax.f32 %v2763_v19, 0.0 }
 0x3fb   : > { %v9999_v21 = vpack.i.bf16 %v2766_v20, %v2764_v10  ;;  %v10017_v32 = vpack.c.bf16 %v2766_v20, %v2764_v10 }
 0x3fc   : > { %v10001_v23 = vpack.i.bf16 %v2767_v1, %v2765_v0  ;;  %v10015_v30 = vpack.c.bf16 %v2767_v1, %v2765_v0 }
 0x3fd   : > { %7802 = vrot.lane.b32.xlu1 %v9999_v21, %s8750_s11 }
 0x3fe   : > { %7812 = vrot.lane.b32.xlu0 %v10001_v23, %s8750_s11 }
 0x401   : > { %7807 = vrot.lane.b32.xlu1 %v9579_v16, %s8752_s13  ;;  %v8504_v16 = vld [vmem:[%s9036_s25 + $0x10] sm:$0xff] }
 0x402   : > { %7817 = vrot.lane.b32.xlu0 %v9585_v17, %s8752_s13  ;;  %v10035_v34 = vpack.i.bf16 %v8504_v16, %v8503_v36  ;;  %v8505_v17 = vld [vmem:[%s9036_s25 + $0x8] sm:$0xff] }
 0x403   : > { %v10041_v40 = vpack.i.bf16 %v8506_v38, %v8505_v17 }
 0x405   : > { %7822 = vrot.lane.b32.xlu1 %v10009_v26, %s8752_s13 }
 0x406   : > { %7827 = vrot.lane.b32.xlu0 %v10013_v29, %s8752_s13 }
 0x409   : > { %7832 = vrot.lane.b32.xlu1 %v9555_v63, %s8752_s13 }
 0x40a   : > { %7837 = vrot.lane.b32.xlu0 %v9557_v13, %s8752_s13 }
 0x40d   : > { %7842 = vrot.lane.b32.xlu1 %v9999_v21, %s8752_s13 }
 0x40e   : > { %7852 = vrot.lane.b32.xlu0 %v10001_v23, %s8752_s13 }
 0x411   : > { %7847 = vrot.lane.b32.xlu1 %v10035_v34, %s8753_s14 }
 0x412   : > { %7857 = vrot.lane.b32.xlu0 %v10041_v40, %s8753_s14 }
 0x415   : > { %7862 = vrot.lane.b32.xlu1 %v10009_v26, %s8753_s14 }
 0x416   : > { %7867 = vrot.lane.b32.xlu0 %v10013_v29, %s8753_s14 }
 0x419   : > { %7872 = vrot.lane.b32.xlu1 %v9555_v63, %s8753_s14 }
 0x41a   : > { %7877 = vrot.lane.b32.xlu0 %v9557_v13, %s8753_s14 }
 0x41d   : > { %7882 = vrot.lane.b32.xlu1 %v9999_v21, %s8753_s14 }
 0x41e   : > { %7892 = vrot.lane.b32.xlu0 %v10001_v23, %s8753_s14 }
 0x421   : > { %7887 = vrot.lane.b32.xlu1 %v10035_v34, %s8754_s15 }
 0x422   : > { %7897 = vrot.lane.b32.xlu0 %v10041_v40, %s8754_s15 }
 0x425   : > { %7902 = vrot.lane.b32.xlu1 %v10009_v26, %s8754_s15 }
 0x426   : > { %7907 = vrot.lane.b32.xlu0 %v10013_v29, %s8754_s15 }
 0x429   : > { %7912 = vrot.lane.b32.xlu1 %v9555_v63, %s8754_s15 }
 0x42a   : > { %7917 = vrot.lane.b32.xlu0 %v9557_v13, %s8754_s15 }
 0x42d   : > { %7922 = vrot.lane.b32.xlu1 %v9999_v21, %s8754_s15 }
 0x42e   : > { %7927 = vrot.lane.b32.xlu0 %v10001_v23, %s8754_s15 }
 0x431   : > { %7932 = vrot.lane.b32.xlu1 %v10035_v34, %s8755_s20 }
 0x432   : > { %7937 = vrot.lane.b32.xlu0 %v10041_v40, %s8755_s20 }
 0x435   : > { %7942 = vrot.lane.b32.xlu1 %v10009_v26, %s8755_s20 }
 0x436   : > { %7947 = vrot.lane.b32.xlu0 %v10013_v29, %s8755_s20 }
 0x439   : > { %7952 = vrot.lane.b32.xlu1 %v9555_v63, %s8755_s20 }
 0x43a   : > { %7957 = vrot.lane.b32.xlu0 %v9557_v13, %s8755_s20 }
 0x43d   : > { %7962 = vrot.lane.b32.xlu1 %v9999_v21, %s8755_s20 }
 0x43e   : > { %7972 = vrot.lane.b32.xlu0 %v10001_v23, %s8755_s20 }
 0x441   : > { %7967 = vrot.lane.b32.xlu1 %v10035_v34, %s8756_s18 }
 0x442   : > { %7977 = vrot.lane.b32.xlu0 %v10041_v40, %s8756_s18 }
 0x445   : > { %7982 = vrot.lane.b32.xlu1 %v10009_v26, %s8756_s18 }
 0x446   : > { %7987 = vrot.lane.b32.xlu0 %v10013_v29, %s8756_s18 }
 0x449   : > { %7992 = vrot.lane.b32.xlu1 %v9555_v63, %s8756_s18 }
 0x44a   : > { %7997 = vrot.lane.b32.xlu0 %v9557_v13, %s8756_s18 }
 0x44d   : > { %8002 = vrot.lane.b32.xlu1 %v9999_v21, %s8756_s18 }
 0x44e   : > { %8012 = vrot.lane.b32.xlu0 %v10001_v23, %s8756_s18 }
 0x451   : > { %8007 = vrot.lane.b32.xlu1 %v10035_v34, %s8757_s22 }
 0x452   : > { %8017 = vrot.lane.b32.xlu0 %v10041_v40, %s8757_s22 }
 0x455   : > { %8022 = vrot.lane.b32.xlu1 %v10009_v26, %s8757_s22 }
 0x456   : > { %8027 = vrot.lane.b32.xlu0 %v10013_v29, %s8757_s22 }
 0x459   : > { %8032 = vrot.lane.b32.xlu1 %v9555_v63, %s8757_s22 }
 0x45a   : > { %8037 = vrot.lane.b32.xlu0 %v9557_v13, %s8757_s22 }
 0x45d   : > { %8042 = vrot.lane.b32.xlu1 %v9999_v21, %s8757_s22 }
 0x45e   : > { %8052 = vrot.lane.b32.xlu0 %v10001_v23, %s8757_s22 }
 0x461   : > { %8047 = vrot.lane.b32.xlu1 %v10035_v34, %s8758_s17 }
 0x462   : > { %8057 = vrot.lane.b32.xlu0 %v10041_v40, %s8758_s17 }
 0x465   : > { %8062 = vrot.lane.b32.xlu1 %v10009_v26, %s8758_s17 }
 0x466   : > { %8067 = vrot.lane.b32.xlu0 %v10013_v29, %s8758_s17 }
 0x469   : > { %8072 = vrot.lane.b32.xlu1 %v9555_v63, %s8758_s17 }
 0x46a   : > { %8077 = vrot.lane.b32.xlu0 %v9557_v13, %s8758_s17 }
 0x46d   : > { %8082 = vrot.lane.b32.xlu1 %v9999_v21, %s8758_s17 }
 0x46e   : > { %8087 = vrot.lane.b32.xlu0 %v10001_v23, %s8758_s17 }
 0x46f   : > { %v7803_v35 = vpop.permute.xlu1 %7802 }
 0x470   : > { %v7805_v43 = vunpack.i.h.bf16 %v7803_v35  ;;  %v7804_v48 = vunpack.i.l.bf16 %v7803_v35  ;;  %v7813_v44 = vpop.permute.xlu0 %7812 }
 0x471   : > { %v7815_v47 = vunpack.i.h.bf16 %v7813_v44  ;;  %v7814_v49 = vunpack.i.l.bf16 %v7813_v44  ;;  %4107 = vperm.xlu1 %7530, %v6242_v27  }
 0x472   : > { %4112 = vperm.xlu0 %7529, %v6243_v41  }
 0x473   : > { %v2901_v52 = vsel %vm11651_vm4, %v7815_v47, %v7805_v43  ;;  %v2900_v50 = vsel %vm11652_vm2, %v7814_v49, %v7804_v48  ;;  %v7808_v51 = vpop.permute.xlu1 %7807  ;;  %v2892_v53 = vsel %vm11641_vm0, %v7804_v48, %v7814_v49  ;;  %v2893_v54 = vsel %vm11653_vm8, %v7805_v43, %v7815_v47  ;;  %vm11656_vm4 = vmmov %vm11654_vm14  ;;  %v2920_v43 = vld [vmem:[#allocation9 + $0x18] sm:$0xff] }
 0x474   : > { %v6682_v8 = vpack.c.bf16 %v2901_v52, %v2900_v50  ;;  %v7810_v55 = vunpack.i.h.bf16 %v7808_v51  ;;  %v7809_v33 = vunpack.i.l.bf16 %v7808_v51  ;;  %v7818_v22 = vpop.permute.xlu0 %7817  ;;  %v6680_v61 = vpack.c.bf16 %v2893_v54, %v2892_v53  ;;  %vm11657_vm2 = vmmov %vm11656_vm4 }
 0x475   : > { %v7820_v6 = vunpack.i.h.bf16 %v7818_v22  ;;  %v7819_v14 = vunpack.i.l.bf16 %v7818_v22  ;;  %8092 = vrot.lane.b32.xlu1 %v10035_v34, %s8752_s13  ;;  %vm11658_vm0 = vmmov %vm11657_vm2 }
 0x476   : > { %8097 = vrot.lane.b32.xlu0 %v10041_v40, %s8752_s13  ;;  %6681 = vmatprep.subr.bf16.mxu0 %v6680_v61  ;;  %vm11659_vm8 = vmmov %vm11658_vm0 }
 0x477   : > { %v2821_v7 = vsel %vm11654_vm14, %v7810_v55, %v7820_v6  ;;  %v2829_v11 = vsel %vm11655_vm15, %v7820_v6, %v7810_v55  ;;  %v2820_v3 = vsel %vm11656_vm4, %v7809_v33, %v7819_v14  ;;  %v2828_v19 = vsel %vm11657_vm2, %v7819_v14, %v7809_v33  ;;  %v7823_v10 = vpop.permute.xlu1 %7822  ;;  %6684 = vmatpush1.bf16.msk.msra.mxu0 %vm9187_vm3, %v6682_v8  ;;  %vm11660_vm14 = vmmov %vm11658_vm0 }
 0x478   : > { %v6688_v20 = vpack.c.bf16 %v2829_v11, %v2828_v19  ;;  %v7825_v0 = vunpack.i.h.bf16 %v7823_v10  ;;  %v7824_v1 = vunpack.i.l.bf16 %v7823_v10  ;;  %v7828_v60 = vpop.permute.xlu0 %7827  ;;  %v6685_v24 = vpack.c.bf16 %v2821_v7, %v2820_v3  ;;  %vm11661_vm15 = vmmov %vm11658_vm0 }
 0x479   : > { %v7830_v28 = vunpack.i.h.bf16 %v7828_v60  ;;  %v7829_v36 = vunpack.i.l.bf16 %v7828_v60  ;;  %8102 = vrot.lane.b32.xlu1 %v10009_v26, %s8752_s13  ;;  %vm11662_vm4 = vmmov %vm11658_vm0 }
 0x47a   : > { %8107 = vrot.lane.b32.xlu0 %v10013_v29, %s8752_s13  ;;  %6687 = vmatprep.subr.msk.bf16.mxu0 %vm9226_vm7, %v6685_v24  ;;  %vm11663_vm2 = vmmov %vm11658_vm0 }
 0x47b   : > { %v2823_v16 = vsel %vm11658_vm0, %v7825_v0, %v7830_v28  ;;  %v2831_v34 = vsel %vm11659_vm8, %v7830_v28, %v7825_v0  ;;  %v2822_v17 = vsel %vm11660_vm14, %v7824_v1, %v7829_v36  ;;  %v2830_v38 = vsel %vm11661_vm15, %v7829_v36, %v7824_v1  ;;  %v7833_v40 = vpop.permute.xlu1 %7832  ;;  %6120 = vmatmul.mubr.msk.f32.vlgmr.msra.gmra.mrb[4].mxu0 %vm2921_vm1, %v2919_v62  ;;  %vm11664_vm8 = vmmov %vm11658_vm0 }
 0x47c   : > { %v6694_v26 = vpack.c.bf16 %v2831_v34, %v2830_v38  ;;  %v7835_v29 = vunpack.i.h.bf16 %v7833_v40  ;;  %v7834_v27 = vunpack.i.l.bf16 %v7833_v40  ;;  %6690 = vmatpush1.bf16.msk.msra.mxu0 %vm9246_vm10, %v6688_v20  ;;  %v7838_v35 = vpop.permute.xlu0 %7837  ;;  %v6691_v41 = vpack.c.bf16 %v2823_v16, %v2822_v17  ;;  %2998 = vmatprep.mubr.f32.mxu0 %v8751_v12  ;;  %vm11665_vm14 = vmmov %vm11658_vm0 }
 0x47d   : > { %v7840_v48 = vunpack.i.h.bf16 %v7838_v35  ;;  %v7839_v44 = vunpack.i.l.bf16 %v7838_v35  ;;  %8112 = vrot.lane.b32.xlu1 %v9555_v63, %s8752_s13  ;;  %vm11666_vm15 = vmmov %vm11658_vm0 }
 0x47e   : > { %8117 = vrot.lane.b32.xlu0 %v9557_v13, %s8752_s13  ;;  %6693 = vmatprep.subr.msk.bf16.mxu0 %vm9226_vm7, %v6691_v41 }
 0x47f   : > { %v2825_v47 = vsel %vm11662_vm4, %v7835_v29, %v7840_v48  ;;  %v2833_v49 = vsel %vm11663_vm2, %v7840_v48, %v7835_v29  ;;  %v2824_v52 = vsel %vm11658_vm0, %v7834_v27, %v7839_v44  ;;  %v2832_v50 = vsel %vm11664_vm8, %v7839_v44, %v7834_v27  ;;  %v7843_v51 = vpop.permute.xlu1 %7842  ;;  %6121 = vmatmul.mubr.msk.f32.gmra.mrb[6].mxu0 %vm2921_vm1, %v2920_v43  ;;  %vm11667_vm4 = vmmov %vm11658_vm0  ;;  %v2852_v27 = vld [vmem:[#allocation9] sm:$0xff] }
 0x480   : > { %v6700_v53 = vpack.c.bf16 %v2833_v49, %v2832_v50  ;;  %v7845_v54 = vunpack.i.h.bf16 %v7843_v51  ;;  %v7844_v8 = vunpack.i.l.bf16 %v7843_v51  ;;  %6696 = vmatpush1.bf16.msk.msra.mxu0 %vm9246_vm10, %v6694_v26  ;;  %v7853_v55 = vpop.permute.xlu0 %7852  ;;  %v6697_v33 = vpack.c.bf16 %v2825_v47, %v2824_v52  ;;  %3075 = vmatprep.mubr.f32.mxu0 %v8751_v12  ;;  %vm11668_vm2 = vmmov %vm11658_vm0 }
 0x481   : > { %v7855_v22 = vunpack.i.h.bf16 %v7853_v55  ;;  %v7854_v61 = vunpack.i.l.bf16 %v7853_v55  ;;  %8122 = vrot.lane.b32.xlu1 %v9999_v21, %s8752_s13  ;;  %vm11669_vm0 = vcmp.lt.s32.totalorder %v9162_v18, 15 }
 0x482   : > { %8127 = vrot.lane.b32.xlu0 %v10001_v23, %s8752_s13  ;;  %6699 = vmatprep.subr.msk.bf16.mxu0 %vm9226_vm7, %v6697_v33  ;;  %vm11670_vm8 = vmmov %vm11669_vm0 }
 0x483   : > { %v2827_v6 = vsel %vm11665_vm14, %v7845_v54, %v7855_v22  ;;  %v2835_v14 = vsel %vm11666_vm15, %v7855_v22, %v7845_v54  ;;  %v2826_v7 = vsel %vm11667_vm4, %v7844_v8, %v7854_v61  ;;  %v2834_v11 = vsel %vm11668_vm2, %v7854_v61, %v7844_v8  ;;  %v7848_v3 = vpop.permute.xlu1 %7847  ;;  %vm11671_vm14 = vmmov %vm11669_vm0  ;;  %v2853_v8 = vld [vmem:[#allocation9 + $0x8] sm:$0xff] }
 0x484   : > { %v6706_v19 = vpack.c.bf16 %v2835_v14, %v2834_v11  ;;  %v7850_v10 = vunpack.i.h.bf16 %v7848_v3  ;;  %v7849_v20 = vunpack.i.l.bf16 %v7848_v3  ;;  %6702 = vmatpush1.bf16.msk.msra.mxu0 %vm9246_vm10, %v6700_v53  ;;  %v7858_v0 = vpop.permute.xlu0 %7857  ;;  %v6703_v1 = vpack.c.bf16 %v2827_v6, %v2826_v7  ;;  %vm11672_vm15 = vmmov %vm11669_vm0 }
 0x485   : > { %v7860_v60 = vunpack.i.h.bf16 %v7858_v0  ;;  %v7859_v24 = vunpack.i.l.bf16 %v7858_v0  ;;  %vm11673_vm4 = vmmov %vm11669_vm0 }
 0x486   : > { %6705 = vmatprep.subr.msk.bf16.mxu0 %vm9226_vm7, %v6703_v1  ;;  %vm11674_vm2 = vmmov %vm11669_vm0 }
 0x487   : > { %v3121_v62 = vsel %vm11669_vm0, %v7850_v10, %v7860_v60  ;;  %v3129_v28 = vsel %vm11670_vm8, %v7860_v60, %v7850_v10  ;;  %v3120_v36 = vsel %vm11671_vm14, %v7849_v20, %v7859_v24  ;;  %v3128_v16 = vsel %vm11672_vm15, %v7859_v24, %v7849_v20  ;;  %v7863_v34 = vpop.permute.xlu1 %7862  ;;  %vm11675_vm8 = vmmov %vm11669_vm0 }
 0x488   : > { %v6712_v17 = vpack.c.bf16 %v3129_v28, %v3128_v16  ;;  %v7865_v38 = vunpack.i.h.bf16 %v7863_v34  ;;  %v7864_v40 = vunpack.i.l.bf16 %v7863_v34  ;;  %6708 = vmatpush1.bf16.msk.msra.mxu0 %vm9246_vm10, %v6706_v19  ;;  %v7868_v26 = vpop.permute.xlu0 %7867  ;;  %v6709_v29 = vpack.c.bf16 %v3121_v62, %v3120_v36  ;;  %vm11677_vm15 = vmmov %vm11669_vm0 }
 0x489   : > { %v7870_v35 = vunpack.i.h.bf16 %v7868_v26  ;;  %v7869_v41 = vunpack.i.l.bf16 %v7868_v26  ;;  %vm11676_vm14 = vnez %v11563_v58 }
 0x48a   : > { %6711 = vmatprep.subr.msk.bf16.mxu0 %vm9277_vm13, %v6709_v29 }
 0x48b   : > { %v3123_v43 = vsel %vm11673_vm4, %v7865_v38, %v7870_v35  ;;  %v3131_v48 = vsel %vm11674_vm2, %v7870_v35, %v7865_v38  ;;  %v3122_v44 = vsel %vm11669_vm0, %v7864_v40, %v7869_v41  ;;  %v3130_v47 = vsel %vm11675_vm8, %v7869_v41, %v7864_v40  ;;  %v7873_v49 = vpop.permute.xlu1 %7872  ;;  %6138 = vmatmul.mubr.msk.f32.vlgmr.msra.gmra.mrb[4].mxu0 %vm2921_vm1, %v2852_v27  ;;  %vm11678_vm4 = vmmov %vm11669_vm0 }
 0x48c   : > { %v6718_v52 = vpack.c.bf16 %v3131_v48, %v3130_v47  ;;  %v7875_v50 = vunpack.i.h.bf16 %v7873_v49  ;;  %v7874_v51 = vunpack.i.l.bf16 %v7873_v49  ;;  %6714 = vmatpush1.bf16.msk.msra.mxu0 %vm11676_vm14, %v6712_v17  ;;  %v7878_v53 = vpop.permute.xlu0 %7877  ;;  %v6715_v54 = vpack.c.bf16 %v3123_v43, %v3122_v44  ;;  %3081 = vmatprep.mubr.f32.mxu0 %v8751_v12  ;;  %vm11679_vm2 = vmmov %vm11669_vm0 }
 0x48d   : > { %v7880_v55 = vunpack.i.h.bf16 %v7878_v53  ;;  %v7879_v33 = vunpack.i.l.bf16 %v7878_v53  ;;  %vm11680_vm8 = vmmov %vm11669_vm0 }
 0x48e   : > { %6717 = vmatprep.subr.msk.bf16.mxu0 %vm9277_vm13, %v6715_v54 }
 0x48f   : > { %v3125_v22 = vsel %vm11677_vm15, %v7875_v50, %v7880_v55  ;;  %v3133_v61 = vsel %vm11678_vm4, %v7880_v55, %v7875_v50  ;;  %v3124_v6 = vsel %vm11679_vm2, %v7874_v51, %v7879_v33  ;;  %v3132_v14 = vsel %vm11669_vm0, %v7879_v33, %v7874_v51  ;;  %v7883_v7 = vpop.permute.xlu1 %7882  ;;  %6139 = vmatmul.mubr.msk.f32.gmra.mrb[6].mxu0 %vm2921_vm1, %v2853_v8  ;;  %vm11681_vm15 = vmmov %vm11669_vm0  ;;  %v3153_v51 = vld [vmem:[#allocation9 + $0x20] sm:$0xff] }
 0x490   : > { %v6724_v11 = vpack.c.bf16 %v3133_v61, %v3132_v14  ;;  %v7885_v3 = vunpack.i.h.bf16 %v7883_v7  ;;  %v7884_v19 = vunpack.i.l.bf16 %v7883_v7  ;;  %6720 = vmatpush1.bf16.msk.msra.mxu0 %vm11676_vm14, %v6718_v52  ;;  %v7893_v10 = vpop.permute.xlu0 %7892  ;;  %v6721_v20 = vpack.c.bf16 %v3125_v22, %v3124_v6  ;;  %3225 = vmatprep.mubr.f32.mxu0 %v8751_v12  ;;  %vm11682_vm4 = vmmov %vm11669_vm0 }
 0x491   : > { %v7895_v0 = vunpack.i.h.bf16 %v7893_v10  ;;  %v7894_v1 = vunpack.i.l.bf16 %v7893_v10  ;;  %vm11683_vm2 = vmmov %vm11669_vm0  ;;  %vm11684_vm0 = vcmp.lt.s32.totalorder %v9162_v18, 1 }
 0x492   : > { %6723 = vmatprep.subr.msk.bf16.mxu0 %vm9277_vm13, %v6721_v20 }
 0x493   : > { %v3127_v60 = vsel %vm11680_vm8, %v7885_v3, %v7895_v0  ;;  %v3135_v24 = vsel %vm11681_vm15, %v7895_v0, %v7885_v3  ;;  %v3126_v62 = vsel %vm11682_vm4, %v7884_v19, %v7894_v1  ;;  %v3134_v28 = vsel %vm11683_vm2, %v7894_v1, %v7884_v19  ;;  %v7888_v36 = vpop.permute.xlu1 %7887  ;;  %vm11685_vm8 = vmmov %vm11684_vm0  ;;  %v3154_v19 = vld [vmem:[#allocation9 + $0x28] sm:$0xff] }
 0x494   : > { %v6730_v16 = vpack.c.bf16 %v3135_v24, %v3134_v28  ;;  %v7890_v34 = vunpack.i.h.bf16 %v7888_v36  ;;  %v7889_v17 = vunpack.i.l.bf16 %v7888_v36  ;;  %6726 = vmatpush1.bf16.msk.msra.mxu0 %vm11676_vm14, %v6724_v11  ;;  %v7898_v38 = vpop.permute.xlu0 %7897  ;;  %v6727_v40 = vpack.c.bf16 %v3127_v60, %v3126_v62  ;;  %vm11686_vm15 = vmmov %vm11684_vm0 }
 0x495   : > { %v7900_v26 = vunpack.i.h.bf16 %v7898_v38  ;;  %v7899_v29 = vunpack.i.l.bf16 %v7898_v38  ;;  %vm11687_vm4 = vmmov %vm11684_vm0 }
 0x496   : > { %6729 = vmatprep.subr.msk.bf16.mxu0 %vm9277_vm13, %v6727_v40  ;;  %vm11688_vm2 = vmmov %vm11684_vm0 }
 0x497   : > { %v3275_v27 = vsel %vm11684_vm0, %v7890_v34, %v7900_v26  ;;  %v3283_v35 = vsel %vm11685_vm8, %v7900_v26, %v7890_v34  ;;  %v3274_v41 = vsel %vm11686_vm15, %v7889_v17, %v7899_v29  ;;  %v3282_v43 = vsel %vm11687_vm4, %v7899_v29, %v7889_v17  ;;  %v7903_v48 = vpop.permute.xlu1 %7902  ;;  %vm11689_vm8 = vmmov %vm11684_vm0 }
 0x498   : > { %v6736_v44 = vpack.c.bf16 %v3283_v35, %v3282_v43  ;;  %v7905_v47 = vunpack.i.h.bf16 %v7903_v48  ;;  %v7904_v49 = vunpack.i.l.bf16 %v7903_v48  ;;  %6732 = vmatpush1.bf16.msk.msra.mxu0 %vm11676_vm14, %v6730_v16  ;;  %v7908_v52 = vpop.permute.xlu0 %7907  ;;  %v6733_v50 = vpack.c.bf16 %v3275_v27, %v3274_v41  ;;  %vm11690_vm15 = vmmov %vm11684_vm0 }
 0x499   : > { %v7910_v53 = vunpack.i.h.bf16 %v7908_v52  ;;  %v7909_v54 = vunpack.i.l.bf16 %v7908_v52  ;;  %vm11691_vm4 = vmmov %vm11684_vm0  ;;  %v3307_v52 = vld [vmem:[#allocation9 + $0x30] sm:$0xff] }
 0x49a   : > { %6735 = vmatprep.subr.msk.bf16.mxu0 %vm9226_vm7, %v6733_v50 }
 0x49b   : > { %v3277_v8 = vsel %vm11688_vm2, %v7905_v47, %v7910_v53  ;;  %v3285_v55 = vsel %vm11684_vm0, %v7910_v53, %v7905_v47  ;;  %v3276_v33 = vsel %vm11689_vm8, %v7904_v49, %v7909_v54  ;;  %v3284_v22 = vsel %vm11690_vm15, %v7909_v54, %v7904_v49  ;;  %v7913_v61 = vpop.permute.xlu1 %7912  ;;  %6156 = vmatmul.mubr.msk.f32.vlgmr.msra.gmra.mrb[4].mxu0 %vm2921_vm1, %v3153_v51  ;;  %vm11692_vm2 = vmmov %vm11684_vm0  ;;  %v3308_v53 = vld [vmem:[#allocation9 + $0x38] sm:$0xff] }
 0x49c   : > { %v6742_v6 = vpack.c.bf16 %v3285_v55, %v3284_v22  ;;  %v7915_v14 = vunpack.i.h.bf16 %v7913_v61  ;;  %v7914_v7 = vunpack.i.l.bf16 %v7913_v61  ;;  %6738 = vmatpush1.bf16.msk.msra.mxu0 %vm9328_vm6, %v6736_v44  ;;  %v7918_v11 = vpop.permute.xlu0 %7917  ;;  %v6739_v3 = vpack.c.bf16 %v3277_v8, %v3276_v33  ;;  %3231 = vmatprep.mubr.f32.mxu0 %v8751_v12  ;;  %vm11693_vm8 = vmmov %vm11684_vm0 }
 0x49d   : > { %v7920_v10 = vunpack.i.h.bf16 %v7918_v11  ;;  %v7919_v20 = vunpack.i.l.bf16 %v7918_v11  ;;  %vm11694_vm15 = vmmov %vm11684_vm0 }
 0x49e   : > { %6741 = vmatprep.subr.msk.bf16.mxu0 %vm9226_vm7, %v6739_v3 }
 0x49f   : > { %v3279_v0 = vsel %vm11691_vm4, %v7915_v14, %v7920_v10  ;;  %v3287_v1 = vsel %vm11692_vm2, %v7920_v10, %v7915_v14  ;;  %v3278_v60 = vsel %vm11684_vm0, %v7914_v7, %v7919_v20  ;;  %v3286_v24 = vsel %vm11693_vm8, %v7919_v20, %v7914_v7  ;;  %v7923_v62 = vpop.permute.xlu1 %7922  ;;  %6157 = vmatmul.mubr.msk.f32.gmra.mrb[6].mxu0 %vm2921_vm1, %v3154_v19  ;;  %vm11695_vm4 = vmmov %vm11684_vm0 }
 0x4a0   : > { %v6748_v28 = vpack.c.bf16 %v3287_v1, %v3286_v24  ;;  %v7925_v36 = vunpack.i.h.bf16 %v7923_v62  ;;  %v7924_v16 = vunpack.i.l.bf16 %v7923_v62  ;;  %6744 = vmatpush1.bf16.msk.msra.mxu0 %vm9328_vm6, %v6742_v6  ;;  %v7928_v34 = vpop.permute.xlu0 %7927  ;;  %v6745_v17 = vpack.c.bf16 %v3279_v0, %v3278_v60  ;;  %3379 = vmatprep.mubr.f32.mxu0 %v8751_v12  ;;  %vm11696_vm2 = vmmov %vm11684_vm0 }
 0x4a1   : > { %v7930_v38 = vunpack.i.h.bf16 %v7928_v34  ;;  %v7929_v40 = vunpack.i.l.bf16 %v7928_v34  ;;  %vm11697_vm8 = vcmp.lt.s32.totalorder %v9162_v18, 127 }
 0x4a2   : > { %6747 = vmatprep.subr.msk.bf16.mxu0 %vm9226_vm7, %v6745_v17 }
 0x4a3   : > { %v3281_v26 = vsel %vm11694_vm15, %v7925_v36, %v7930_v38  ;;  %v3289_v29 = vsel %vm11695_vm4, %v7930_v38, %v7925_v36  ;;  %v3280_v27 = vsel %vm11696_vm2, %v7924_v16, %v7929_v40  ;;  %v3288_v35 = vsel %vm11684_vm0, %v7929_v40, %v7924_v16  ;;  %v7933_v41 = vpop.permute.xlu1 %7932  ;;  %vm11698_vm15 = vmmov %vm11697_vm8 }
 0x4a4   : > { %v6754_v43 = vpack.c.bf16 %v3289_v29, %v3288_v35  ;;  %6750 = vmatpush1.bf16.msk.msra.mxu0 %vm9328_vm6, %v6748_v28  ;;  %v7938_v48 = vpop.permute.xlu0 %7937  ;;  %v6751_v44 = vpack.c.bf16 %v3281_v26, %v3280_v27  ;;  %v7935_v54 = vunpack.i.h.bf16 %v7933_v41  ;;  %v7934_v8 = vunpack.i.l.bf16 %v7933_v41  ;;  %vm11699_vm4 = vmmov %vm11697_vm8  ;;  %v3397_v27 = vld [vmem:[#allocation9 + $0x40] sm:$0xff] }
 0x4a5   : > { %v7940_v55 = vunpack.i.h.bf16 %v7938_v48  ;;  %v7939_v33 = vunpack.i.l.bf16 %v7938_v48  ;;  %vm11700_vm2 = vmmov %vm11699_vm4 }
 0x4a6   : > { %6753 = vmatprep.subr.msk.bf16.mxu0 %vm9226_vm7, %v6751_v44  ;;  %vm11701_vm0 = vmmov %vm11700_vm2 }
 0x4a7   : > { %v7943_v47 = vpop.permute.xlu1 %7942  ;;  %v3527_v6 = vsel %vm11697_vm8, %v7940_v55, %v7935_v54  ;;  %v3526_v14 = vsel %vm11698_vm15, %v7939_v33, %v7934_v8  ;;  %v3519_v0 = vsel %vm11699_vm4, %v7935_v54, %v7940_v55  ;;  %v3518_v1 = vsel %vm11700_vm2, %v7934_v8, %v7939_v33  ;;  %vm11702_vm8 = vmmov %vm11701_vm0 }
 0x4a8   : > { %6756 = vmatpush1.bf16.msk.msra.mxu0 %vm9328_vm6, %v6754_v43  ;;  %v7948_v49 = vpop.permute.xlu0 %7947  ;;  %v7945_v7 = vunpack.i.h.bf16 %v7943_v47  ;;  %v7944_v11 = vunpack.i.l.bf16 %v7943_v47  ;;  %v6773_v60 = vpack.c.bf16 %v3527_v6, %v3526_v14  ;;  %v6776_v38 = vpack.c.bf16 %v3519_v0, %v3518_v1  ;;  %vm11703_vm15 = vmmov %vm11701_vm0 }
 0x4a9   : > { %6758 = vmatprep.subr.bf16.mxu0 %v9345_v45  ;;  %v7950_v3 = vunpack.i.h.bf16 %v7948_v49  ;;  %v7949_v19 = vunpack.i.l.bf16 %v7948_v49  ;;  %vm11704_vm4 = vmmov %vm11701_vm0 }
 0x4aa   : > { %vm11705_vm2 = vmmov %vm11701_vm0 }
 0x4ab   : > { %v10328_v50 = vpop.permute.xlu1 %7952  ;;  %6174 = vmatmul.mubr.msk.f32.vlgmr.msra.gmra.mrb[4].mxu0 %vm2921_vm1, %v3307_v52  ;;  %v3529_v24 = vsel %vm11701_vm0, %v7950_v3, %v7945_v7  ;;  %v3528_v62 = vsel %vm11702_vm8, %v7949_v19, %v7944_v11  ;;  %v3521_v40 = vsel %vm11703_vm15, %v7945_v7, %v7950_v3  ;;  %v3520_v26 = vsel %vm11704_vm4, %v7944_v11, %v7949_v19  ;;  %vm11706_vm8 = vmmov %vm11701_vm0 }
 0x4ac   : > { %6760 = vmatpush1.bf16.msra.mxu0 %v9356_v9  ;;  %v10332_v51 = vpop.permute.xlu0 %7957  ;;  %3385 = vmatprep.mubr.f32.mxu0 %v8751_v12  ;;  %v7955_v28 = vunpack.i.h.bf16 %v10328_v50  ;;  %v7954_v36 = vunpack.i.l.bf16 %v10328_v50  ;;  %v6779_v35 = vpack.c.bf16 %v3529_v24, %v3528_v62  ;;  %v6782_v41 = vpack.c.bf16 %v3521_v40, %v3520_v26  ;;  %vm11707_vm15 = vmmov %vm11701_vm0 }
 0x4ad   : > { %6762 = vmatprep.subr.bf16.mxu0 %v9365_v59  ;;  %v7960_v16 = vunpack.i.h.bf16 %v10332_v51  ;;  %v7959_v34 = vunpack.i.l.bf16 %v10332_v51  ;;  %vm11708_vm4 = vmmov %vm11701_vm0 }
 0x4af   : > { %v10336_v22 = vpop.permute.xlu1 %7962  ;;  %6175 = vmatmul.mubr.msk.f32.gmra.mrb[6].mxu0 %vm2921_vm1, %v3308_v53  ;;  %v3531_v43 = vsel %vm11705_vm2, %v7960_v16, %v7955_v28  ;;  %v3530_v48 = vsel %vm11701_vm0, %v7959_v34, %v7954_v36  ;;  %v3398_v53 = vld [vmem:[#allocation9 + $0x48] sm:$0xff]  ;;  %vm11709_vm2 = vmmov %vm11701_vm0  ;;  %vm11710_vm0 = vcmp.lt.s32.totalorder %v9162_v18, 113 }
 0x4b0   : > { %6764 = vmatpush1.bf16.msra.mxu0 %v9370_v2  ;;  %v10340_v61 = vpop.permute.xlu0 %7972  ;;  %3469 = vmatprep.mubr.f32.mxu0 %v8751_v12  ;;  %v7965_v47 = vunpack.i.h.bf16 %v10336_v22  ;;  %v7964_v49 = vunpack.i.l.bf16 %v10336_v22  ;;  %v3523_v22 = vsel %vm11706_vm8, %v7955_v28, %v7960_v16  ;;  %v6785_v14 = vpack.c.bf16 %v3531_v43, %v3530_v48  ;;  %vm11711_vm8 = vmmov %vm11710_vm0 }
 0x4b1   : > { %6766 = vmatprep.subr.bf16.mxu0 %v9563_v4  ;;  %v7975_v52 = vunpack.i.h.bf16 %v10340_v61  ;;  %v7974_v50 = vunpack.i.l.bf16 %v10340_v61  ;;  %v3522_v61 = vsel %vm11707_vm15, %v7954_v36, %v7959_v34  ;;  %vm11712_vm15 = vmmov %vm11709_vm2 }
 0x4b2   : > { %v6788_v19 = vpack.c.bf16 %v3523_v22, %v3522_v61 }
 0x4b3   : > { %v10348_v10 = vpop.permute.xlu1 %7967  ;;  %v3533_v7 = vsel %vm11708_vm4, %v7975_v52, %v7965_v47  ;;  %v3532_v11 = vsel %vm11709_vm2, %v7974_v50, %v7964_v49  ;;  %v3525_v62 = vsel %vm11712_vm15, %v7965_v47, %v7975_v52  ;;  %vm11713_vm4 = vmmov %vm11709_vm2 }
 0x4b4   : > { %6768 = vmatpush1.bf16.msra.mxu0 %v9565_v5  ;;  %v10351_v20 = vpop.permute.xlu0 %7977  ;;  %v7970_v54 = vunpack.i.h.bf16 %v10348_v10  ;;  %v7969_v8 = vunpack.i.l.bf16 %v10348_v10  ;;  %v3524_v28 = vsel %vm11713_vm4, %v7964_v49, %v7974_v50  ;;  %v6791_v16 = vpack.c.bf16 %v3533_v7, %v3532_v11  ;;  %vm11714_vm2 = vmmov %vm11710_vm0 }
 0x4b5   : > { %6770 = vmatprep.subr.bf16.mxu0 %v10015_v30  ;;  %v7980_v55 = vunpack.i.h.bf16 %v10351_v20  ;;  %v7979_v33 = vunpack.i.l.bf16 %v10351_v20  ;;  %v6794_v26 = vpack.c.bf16 %v3525_v62, %v3524_v28  ;;  %vm11716_vm15 = vmmov %vm11710_vm0 }
 0x4b6   : > { %vm11717_vm4 = vmmov %vm11710_vm0 }
 0x4b7   : > { %v10366_v17 = vpop.permute.xlu1 %7982  ;;  %v3681_v10 = vsel %vm11710_vm0, %v7980_v55, %v7970_v54  ;;  %v3680_v20 = vsel %vm11711_vm8, %v7979_v33, %v7969_v8  ;;  %vm11715_vm8 = vmmov %vm11710_vm0 }
 0x4b8   : > { %6772 = vmatpush1.bf16.msra.mxu0 %v10017_v32  ;;  %v7988_v29 = vpop.permute.xlu0 %7987  ;;  %v7985_v0 = vunpack.i.h.bf16 %v10366_v17  ;;  %v7984_v1 = vunpack.i.l.bf16 %v10366_v17  ;;  %v3672_v17 = vsel %vm11710_vm0, %v7969_v8, %v7979_v33  ;;  %v6797_v40 = vpack.c.bf16 %v3681_v10, %v3680_v20 }
 0x4b9   : > { %6775 = vmatprep.subr.msk.bf16.mxu0 %vm9277_vm13, %v6773_v60  ;;  %v7990_v60 = vunpack.i.h.bf16 %v7988_v29  ;;  %v7989_v24 = vunpack.i.l.bf16 %v7988_v29 }
 0x4bb   : > { %v10379_v44 = vpop.permute.xlu1 %7992  ;;  %6176 = vmatmul.mubr.msk.f32.vlgmr.msra.gmra.mrb[4].mxu0 %vm2921_vm1, %v3397_v27  ;;  %v3683_v29 = vsel %vm11715_vm8, %v7990_v60, %v7985_v0  ;;  %v3682_v27 = vsel %vm11716_vm15, %v7989_v24, %v7984_v1  ;;  %v3675_v52 = vsel %vm11717_vm4, %v7985_v0, %v7990_v60  ;;  %vm11719_vm8 = vmmov %vm11710_vm0 }
 0x4bc   : > { %6778 = vmatpush1.bf16.msk.msra.mxu0 %vm9395_vm9, %v6776_v38  ;;  %v10388_v51 = vpop.permute.xlu0 %7997  ;;  %3475 = vmatprep.mubr.f32.mxu0 %v8751_v12  ;;  %v3673_v38 = vsel %vm11714_vm2, %v7970_v54, %v7980_v55  ;;  %vm11718_vm2 = vmmov %vm11710_vm0  ;;  %v3551_v54 = vld [vmem:[#allocation9 + $0x50] sm:$0xff] }
 0x4bd   : > { %6781 = vmatprep.subr.msk.bf16.mxu0 %vm9277_vm13, %v6779_v35  ;;  %v7995_v35 = vunpack.i.h.bf16 %v10379_v44  ;;  %v8000_v43 = vunpack.i.h.bf16 %v10388_v51  ;;  %v7999_v48 = vunpack.i.l.bf16 %v10388_v51  ;;  %v6800_v49 = vpack.c.bf16 %v3673_v38, %v3672_v17  ;;  %vm11720_vm15 = vmmov %vm11710_vm0 }
 0x4be   : > { %v3674_v50 = vsel %vm11718_vm2, %v7984_v1, %v7989_v24  ;;  %vm11721_vm4 = vmmov %vm11710_vm0 }
 0x4bf   : > { %v10401_v6 = vpop.permute.xlu1 %8002  ;;  %6177 = vmatmul.mubr.msk.f32.gmra.mrb[6].mxu0 %vm2921_vm1, %v3398_v53  ;;  %v6806_v8 = vpack.c.bf16 %v3675_v52, %v3674_v50  ;;  %v3685_v51 = vsel %vm11710_vm0, %v8000_v43, %v7995_v35  ;;  %vm11722_vm2 = vmmov %vm11710_vm0 }
 0x4c0   : > { %6784 = vmatpush1.bf16.msk.msra.mxu0 %vm9395_vm9, %v6782_v41  ;;  %v10410_v3 = vpop.permute.xlu0 %8012  ;;  %3623 = vmatprep.mubr.f32.mxu0 %v8751_v12  ;;  %v7994_v41 = vunpack.i.l.bf16 %v10379_v44  ;;  %v6803_v44 = vpack.c.bf16 %v3683_v29, %v3682_v27  ;;  %v8005_v22 = vunpack.i.h.bf16 %v10401_v6  ;;  %v8004_v61 = vunpack.i.l.bf16 %v10401_v6 }
 0x4c1   : > { %6787 = vmatprep.subr.msk.bf16.mxu0 %vm9277_vm13, %v6785_v14  ;;  %v8015_v14 = vunpack.i.h.bf16 %v10410_v3  ;;  %v8014_v7 = vunpack.i.l.bf16 %v10410_v3  ;;  %v3677_v3 = vsel %vm11720_vm15, %v7995_v35, %v8000_v43 }
 0x4c2   : > { %v3684_v55 = vsel %vm11719_vm8, %v7999_v48, %v7994_v41  ;;  %v3676_v1 = vsel %vm11721_vm4, %v7994_v41, %v7999_v48  ;;  %vm11723_vm8 = vcmp.lt.s32.totalorder %v9162_v18, 112  ;;  %vm11725_vm4 = vmmov %vm11710_vm0 }
 0x4c3   : > { %v10425_v36 = vpop.permute.xlu1 %8007  ;;  %v6809_v60 = vpack.c.bf16 %v3685_v51, %v3684_v55  ;;  %v3687_v24 = vsel %vm11722_vm2, %v8015_v14, %v8005_v22  ;;  %v3686_v62 = vsel %vm11710_vm0, %v8014_v7, %v8004_v61  ;;  %v6812_v28 = vpack.c.bf16 %v3677_v3, %v3676_v1  ;;  %vm11724_vm15 = vmmov %vm11723_vm8  ;;  %v3706_v1 = vld [vmem:[#allocation9 + $0x68] sm:$0xff] }
 0x4c4   : > { %6790 = vmatpush1.bf16.msk.msra.mxu0 %vm9395_vm9, %v6788_v19  ;;  %v10429_v34 = vpop.permute.xlu0 %8017  ;;  %v3552_v19 = vld [vmem:[#allocation9 + $0x58] sm:$0xff]  ;;  %v8010_v10 = vunpack.i.h.bf16 %v10425_v36  ;;  %v8009_v20 = vunpack.i.l.bf16 %v10425_v36  ;;  %v3679_v27 = vsel %vm11725_vm4, %v8005_v22, %v8015_v14  ;;  %vm11726_vm2 = vmmov %vm11710_vm0  ;;  %v6815_v41 = vpack.c.bf16 %v3687_v24, %v3686_v62  ;;  %v3705_v14 = vld [vmem:[#allocation9 + $0x60] sm:$0xff] }
 0x4c5   : > { %6793 = vmatprep.subr.msk.bf16.mxu0 %vm9277_vm13, %v6791_v16  ;;  %v8020_v0 = vunpack.i.h.bf16 %v10429_v34  ;;  %v8019_v6 = vunpack.i.l.bf16 %v10429_v34  ;;  %v3678_v35 = vsel %vm11726_vm2, %v8004_v61, %v8014_v7  ;;  %vm11727_vm0 = vmmov %vm11723_vm8 }
 0x4c6   : > { %vm11730_vm4 = vmmov %vm11727_vm0 }
 0x4c7   : > { %v10445_v47 = vpop.permute.xlu1 %8022  ;;  %v3835_v36 = vsel %vm11723_vm8, %v8020_v0, %v8010_v10  ;;  %v3834_v16 = vsel %vm11724_vm15, %v8019_v6, %v8009_v20  ;;  %v3827_v43 = vsel %vm11727_vm0, %v8010_v10, %v8020_v0  ;;  %vm11728_vm8 = vmmov %vm11727_vm0 }
 0x4c8   : > { %6796 = vmatpush1.bf16.msk.msra.mxu0 %vm9395_vm9, %v6794_v26  ;;  %v8028_v53 = vpop.permute.xlu0 %8027  ;;  %v8025_v17 = vunpack.i.h.bf16 %v10445_v47  ;;  %v3826_v48 = vsel %vm11728_vm8, %v8009_v20, %v8019_v6  ;;  %vm11729_vm15 = vmmov %vm11727_vm0 }
 0x4c9   : > { %6799 = vmatprep.subr.msk.bf16.mxu0 %vm9430_vm5, %v6797_v40  ;;  %v8024_v40 = vunpack.i.l.bf16 %v10445_v47  ;;  %v8030_v26 = vunpack.i.h.bf16 %v8028_v53  ;;  %v8029_v29 = vunpack.i.l.bf16 %v8028_v53  ;;  %v6821_v47 = vpack.c.bf16 %v3835_v36, %v3834_v16  ;;  %vm11731_vm2 = vmmov %vm11727_vm0 }
 0x4ca   : > { %v6824_v7 = vpack.c.bf16 %v3827_v43, %v3826_v48  ;;  %vm11732_vm8 = vmmov %vm11727_vm0 }
 0x4cb   : > { %v10459_v33 = vpop.permute.xlu1 %8032  ;;  %6194 = vmatmul.mubr.msk.f32.vlgmr.msra.gmra.mrb[4].mxu0 %vm2921_vm1, %v3551_v54  ;;  %v3837_v52 = vsel %vm11729_vm15, %v8030_v26, %v8025_v17  ;;  %v3836_v50 = vsel %vm11730_vm4, %v8029_v29, %v8024_v40  ;;  %v3829_v22 = vsel %vm11731_vm2, %v8025_v17, %v8030_v26  ;;  %v3828_v61 = vsel %vm11727_vm0, %v8024_v40, %v8029_v29  ;;  %vm11733_vm15 = vmmov %vm11727_vm0 }
 0x4cc   : > { %6802 = vmatpush1.bf16.msk.msra.mxu0 %vm9328_vm6, %v6800_v49  ;;  %v10468_v11 = vpop.permute.xlu0 %8037  ;;  %3629 = vmatprep.mubr.f32.mxu0 %v8751_v12  ;;  %v6818_v49 = vpack.c.bf16 %v3679_v27, %v3678_v35  ;;  %v8035_v53 = vunpack.i.h.bf16 %v10459_v33  ;;  %v8034_v54 = vunpack.i.l.bf16 %v10459_v33  ;;  %v6826_v33 = vpack.c.bf16 %v3837_v52, %v3836_v50  ;;  %vm11734_vm4 = vmmov %vm11727_vm0 }
 0x4cd   : > { %6805 = vmatprep.subr.msk.bf16.mxu0 %vm9430_vm5, %v6803_v44  ;;  %v8040_v44 = vunpack.i.h.bf16 %v10468_v11  ;;  %v6829_v10 = vpack.c.bf16 %v3829_v22, %v3828_v61  ;;  %vm11735_vm2 = vmmov %vm11727_vm0 }
 0x4cf   : > { %6195 = vmatmul.mubr.msk.f32.gmra.mrb[6].mxu0 %vm2921_vm1, %v3552_v19  ;;  %v10493_v34 = vpop.permute.xlu1 %8042 }
 0x4d0   : > { %6808 = vmatpush1.bf16.msk.msra.mxu0 %vm9328_vm6, %v6806_v8  ;;  %3777 = vmatprep.mubr.f32.mxu0 %v8751_v12  ;;  %v10495_v38 = vpop.permute.xlu0 %8052  ;;  %v8039_v8 = vunpack.i.l.bf16 %v10468_v11  ;;  %v3839_v11 = vsel %vm11732_vm8, %v8040_v44, %v8035_v53  ;;  %v8045_v20 = vunpack.i.h.bf16 %v10493_v34  ;;  %v8044_v0 = vunpack.i.l.bf16 %v10493_v34  ;;  %vm11736_vm8 = vmmov %vm11727_vm0 }
 0x4d1   : > { %6811 = vmatprep.subr.msk.bf16.mxu0 %vm9430_vm5, %v6809_v60  ;;  %v8055_v6 = vunpack.i.h.bf16 %v10495_v38  ;;  %v8054_v3 = vunpack.i.l.bf16 %v10495_v38  ;;  %v3831_v34 = vsel %vm11734_vm4, %v8035_v53, %v8040_v44 }
 0x4d2   : > { %v3838_v19 = vsel %vm11733_vm15, %v8039_v8, %v8034_v54  ;;  %v3830_v17 = vsel %vm11735_vm2, %v8034_v54, %v8039_v8  ;;  %vm11737_vm15 = vcmp.lt.s32.totalorder %v9162_v18, 111  ;;  %vm11739_vm2 = vmmov %vm11727_vm0 }
 0x4d3   : > { %v8048_v51 = vpop.permute.xlu1 %8047  ;;  %v6831_v38 = vpack.c.bf16 %v3839_v11, %v3838_v19  ;;  %v3841_v40 = vsel %vm11727_vm0, %v8055_v6, %v8045_v20  ;;  %v3840_v26 = vsel %vm11736_vm8, %v8054_v3, %v8044_v0  ;;  %vm11738_vm4 = vmmov %vm11737_vm15  ;;  %v6834_v35 = vpack.c.bf16 %v3831_v34, %v3830_v17  ;;  %v3860_v17 = vld [vmem:[#allocation9 + $0x78] sm:$0xff] }
 0x4d4   : > { %6814 = vmatpush1.bf16.msk.msra.mxu0 %vm9328_vm6, %v6812_v28  ;;  %v8058_v55 = vpop.permute.xlu0 %8057  ;;  %v8050_v60 = vunpack.i.h.bf16 %v8048_v51  ;;  %v8049_v24 = vunpack.i.l.bf16 %v8048_v51  ;;  %v3832_v52 = vsel %vm11727_vm0, %v8044_v0, %v8054_v3  ;;  %v6836_v50 = vpack.c.bf16 %v3841_v40, %v3840_v26  ;;  %vm11740_vm8 = vmmov %vm11738_vm4  ;;  %v3859_v0 = vld [vmem:[#allocation9 + $0x70] sm:$0xff] }
 0x4d5   : > { %6817 = vmatprep.subr.msk.bf16.mxu0 %vm9430_vm5, %v6815_v41  ;;  %v8060_v62 = vunpack.i.h.bf16 %v8058_v55  ;;  %v8059_v28 = vunpack.i.l.bf16 %v8058_v55 }
 0x4d7   : > { %v8063_v36 = vpop.permute.xlu1 %8062  ;;  %v3989_v29 = vsel %vm11737_vm15, %v8060_v62, %v8050_v60  ;;  %v3988_v27 = vsel %vm11738_vm4, %v8059_v28, %v8049_v24  ;;  %v3981_v44 = vsel %vm11740_vm8, %v8050_v60, %v8060_v62  ;;  %vm11741_vm15 = vmmov %vm11738_vm4 }
 0x4d8   : > { %6820 = vmatpush1.bf16.msk.msra.mxu0 %vm9328_vm6, %v6818_v49  ;;  %v8068_v16 = vpop.permute.xlu0 %8067  ;;  %v8065_v41 = vunpack.i.h.bf16 %v8063_v36  ;;  %v8064_v43 = vunpack.i.l.bf16 %v8063_v36  ;;  %v3833_v49 = vsel %vm11739_vm2, %v8045_v20, %v8055_v6  ;;  %v3980_v8 = vsel %vm11741_vm15, %v8049_v24, %v8059_v28  ;;  %vm11742_vm2 = vmmov %vm11738_vm4 }
 0x4d9   : > { %6823 = vmatprep.subr.msk.bf16.mxu0 %vm9466_vm12, %v6821_v47  ;;  %v8070_v48 = vunpack.i.h.bf16 %v8068_v16  ;;  %v8069_v47 = vunpack.i.l.bf16 %v8068_v16  ;;  %v6841_v51 = vpack.c.bf16 %v3989_v29, %v3988_v27  ;;  %v6839_v55 = vpack.c.bf16 %v3833_v49, %v3832_v52  ;;  %vm11743_vm0 = vmmov %vm11742_vm2 }
 0x4da   : > { %v6844_v19 = vpack.c.bf16 %v3981_v44, %v3980_v8  ;;  %vm11744_vm8 = vmmov %vm11743_vm0 }
 0x4db   : > { %6212 = vmatmul.mubr.msk.f32.vlgmr.msra.gmra.mrb[4].mxu0 %vm2921_vm1, %v3705_v14  ;;  %v8073_v53 = vpop.permute.xlu1 %8072  ;;  %v3991_v22 = vsel %vm11738_vm4, %v8070_v48, %v8065_v41  ;;  %v3990_v61 = vsel %vm11742_vm2, %v8069_v47, %v8064_v43  ;;  %v3982_v20 = vsel %vm11744_vm8, %v8064_v43, %v8069_v47  ;;  %vm11745_vm15 = vmmov %vm11743_vm0 }
 0x4dc   : > { %6825 = vmatpush1.bf16.msra.mxu0 %v6824_v7  ;;  %3783 = vmatprep.mubr.f32.mxu0 %v8751_v12  ;;  %v8078_v54 = vpop.permute.xlu0 %8077  ;;  %v8075_v14 = vunpack.i.h.bf16 %v8073_v53  ;;  %v8074_v7 = vunpack.i.l.bf16 %v8073_v53  ;;  %v6847_v6 = vpack.c.bf16 %v3991_v22, %v3990_v61  ;;  %vm11746_vm4 = vmmov %vm11743_vm0 }
 0x4dd   : > { %6828 = vmatprep.subr.msk.bf16.mxu0 %vm9466_vm12, %v6826_v33  ;;  %v8080_v33 = vunpack.i.h.bf16 %v8078_v54  ;;  %v8079_v11 = vunpack.i.l.bf16 %v8078_v54  ;;  %vm11747_vm2 = vmmov %vm11743_vm0 }
 0x4de   : > { %vm11748_vm8 = vmmov %vm11743_vm0 }
 0x4df   : > { %6213 = vmatmul.mubr.msk.f32.gmra.mrb[6].mxu0 %vm2921_vm1, %v3706_v1  ;;  %v8083_v3 = vpop.permute.xlu1 %8082  ;;  %v3993_v24 = vsel %vm11745_vm15, %v8080_v33, %v8075_v14  ;;  %v3992_v62 = vsel %vm11746_vm4, %v8079_v11, %v8074_v7  ;;  %v3984_v40 = vsel %vm11743_vm0, %v8074_v7, %v8079_v11  ;;  %vm11749_vm15 = vmmov %vm11743_vm0 }
 0x4e0   : > { %6830 = vmatpush1.bf16.msra.mxu0 %v6829_v10  ;;  %3931 = vmatprep.mubr.f32.mxu0 %v8751_v12  ;;  %v3983_v10 = vsel %vm11743_vm0, %v8065_v41, %v8070_v48  ;;  %v8088_v1 = vpop.permute.xlu0 %8087  ;;  %v8085_v28 = vunpack.i.h.bf16 %v8083_v3  ;;  %v8084_v36 = vunpack.i.l.bf16 %v8083_v3  ;;  %v6853_v26 = vpack.c.bf16 %v3993_v24, %v3992_v62  ;;  %vm11750_vm4 = vmmov %vm11743_vm0 }
 0x4e1   : > { %6833 = vmatprep.subr.msk.bf16.mxu0 %vm9466_vm12, %v6831_v38  ;;  %v6850_v60 = vpack.c.bf16 %v3983_v10, %v3982_v20  ;;  %v8090_v16 = vunpack.i.h.bf16 %v8088_v1  ;;  %v8089_v34 = vunpack.i.l.bf16 %v8088_v1  ;;  %v3985_v38 = vsel %vm11747_vm2, %v8075_v14, %v8080_v33  ;;  %vm11751_vm2 = vmmov %vm11743_vm0  ;;  %v4013_v33 = vld [vmem:[#allocation9 + $0x80] sm:$0xff] }
 0x4e2   : > { %v6856_v43 = vpack.c.bf16 %v3985_v38, %v3984_v40  ;;  %vm11752_vm0 = vcmp.lt.s32.totalorder %v9162_v18, 17 }
 0x4e3   : > { %v3995_v29 = vsel %vm11748_vm8, %v8090_v16, %v8085_v28  ;;  %v3994_v27 = vsel %vm11749_vm15, %v8089_v34, %v8084_v36  ;;  %v3987_v48 = vsel %vm11750_vm4, %v8085_v28, %v8090_v16  ;;  %v3986_v47 = vsel %vm11751_vm2, %v8084_v36, %v8089_v34  ;;  %vm11753_vm8 = vmmov %vm11752_vm0  ;;  %v4014_v36 = vld [vmem:[#allocation9 + $0x88] sm:$0xff] }
 0x4e4   : > { %6835 = vmatpush1.bf16.msra.mxu0 %v6834_v35  ;;  %v6859_v49 = vpack.c.bf16 %v3995_v29, %v3994_v27  ;;  %v6862_v44 = vpack.c.bf16 %v3987_v48, %v3986_v47  ;;  %vm11754_vm15 = vmmov %vm11752_vm0 }
 0x4e5   : > { %6838 = vmatprep.subr.msk.bf16.mxu0 %vm9466_vm12, %v6836_v50  ;;  %vm11755_vm4 = vmmov %vm11752_vm0 }
 0x4e6   : > { %vm11756_vm2 = vmmov %vm11752_vm0 }
 0x4e8   : > { %6840 = vmatpush1.bf16.msra.mxu0 %v6839_v55 }
 0x4e9   : > { %6843 = vmatprep.subr.msk.bf16.mxu0 %vm9501_vm11, %v6841_v51 }
 0x4eb   : > { %6222 = vmatmul.mubr.msk.f32.vlgmr.msra.gmra.mrb[4].mxu0 %vm2921_vm1, %v3859_v0 }
 0x4ec   : > { %6846 = vmatpush1.bf16.msk.msra.mxu0 %vm9395_vm9, %v6844_v19  ;;  %3937 = vmatprep.mubr.f32.mxu0 %v8751_v12 }
 0x4ed   : > { %6849 = vmatprep.subr.msk.bf16.mxu0 %vm9501_vm11, %v6847_v6 }
 0x4ef   : > { %6223 = vmatmul.mubr.msk.f32.gmra.mrb[6].mxu0 %vm2921_vm1, %v3860_v17 }
 0x4f0   : > { %6852 = vmatpush1.bf16.msk.msra.mxu0 %vm9395_vm9, %v6850_v60  ;;  %v10598_v35 = vpop.permute.xlu1 %4107  ;;  %4085 = vmatprep.mubr.f32.mxu0 %v8751_v12 }
 0x4f1   : > { %6855 = vmatprep.subr.msk.bf16.mxu0 %vm9501_vm11, %v6853_v26  ;;  %v10603_v41 = vpop.permute.xlu0 %4112 }
 0x4f4   : > { %6858 = vmatpush1.bf16.msk.msra.mxu0 %vm9395_vm9, %v6856_v43  ;;  %v8093_v52 = vpop.permute.xlu1 %8092 }
 0x4f5   : > { %v8095_v50 = vunpack.i.h.bf16 %v8093_v52  ;;  %v8094_v53 = vunpack.i.l.bf16 %v8093_v52  ;;  %6861 = vmatprep.subr.msk.bf16.mxu0 %vm9501_vm11, %v6859_v49  ;;  %v8098_v54 = vpop.permute.xlu0 %8097 }
 0x4f6   : > { %v8100_v8 = vunpack.i.h.bf16 %v8098_v54  ;;  %v8099_v51 = vunpack.i.l.bf16 %v8098_v54 }
 0x4f8   : > { %v4188_v55 = vsel %vm11752_vm0, %v8095_v50, %v8100_v8  ;;  %v4198_v22 = vsel %vm11753_vm8, %v8100_v8, %v8095_v50  ;;  %v4187_v61 = vsel %vm11754_vm15, %v8094_v53, %v8099_v51  ;;  %v4197_v14 = vsel %vm11755_vm4, %v8099_v51, %v8094_v53  ;;  %6864 = vmatpush1.bf16.msk.msra.mxu0 %vm9395_vm9, %v6862_v44  ;;  %v8103_v7 = vpop.permute.xlu1 %8102  ;;  %vm11757_vm8 = vmmov %vm11752_vm0 }
 0x4f9   : > { %v6890_v11 = vpack.c.bf16 %v4188_v55, %v4187_v61  ;;  %v6893_v19 = vpack.c.bf16 %v4198_v22, %v4197_v14  ;;  %v8105_v10 = vunpack.i.h.bf16 %v8103_v7  ;;  %v8104_v20 = vunpack.i.l.bf16 %v8103_v7  ;;  %v8108_v0 = vpop.permute.xlu0 %8107  ;;  %vm11758_vm15 = vmmov %vm11752_vm0 }
 0x4fa   : > { %v8110_v6 = vunpack.i.h.bf16 %v8108_v0  ;;  %v8109_v3 = vunpack.i.l.bf16 %v8108_v0  ;;  %vm11759_vm4 = vmmov %vm11752_vm0 }
 0x4fb   : > { %6240 = vmatmul.mubr.msk.f32.vlgmr.msra.gmra.mrb[4].mxu0 %vm2921_vm1, %v4013_v33  ;;  %6892 = vmatprep.subr.msk.bf16.mxu1 %vm9226_vm7, %v6890_v11 }
 0x4fc   : > { %v4190_v1 = vsel %vm11756_vm2, %v8105_v10, %v8110_v6  ;;  %v4200_v60 = vsel %vm11752_vm0, %v8110_v6, %v8105_v10  ;;  %v4189_v24 = vsel %vm11757_vm8, %v8104_v20, %v8109_v3  ;;  %v4199_v62 = vsel %vm11758_vm15, %v8109_v3, %v8104_v20  ;;  %v8113_v28 = vpop.permute.xlu1 %8112  ;;  %6895 = vmatpush1.bf16.msk.msra.mxu1 %vm9246_vm10, %v6893_v19  ;;  %vm11760_vm2 = vmmov %vm11752_vm0 }
 0x4fd   : > { %v6896_v16 = vpack.c.bf16 %v4190_v1, %v4189_v24  ;;  %v6899_v34 = vpack.c.bf16 %v4200_v60, %v4199_v62  ;;  %v8115_v17 = vunpack.i.h.bf16 %v8113_v28  ;;  %v8114_v38 = vunpack.i.l.bf16 %v8113_v28  ;;  %v8118_v40 = vpop.permute.xlu0 %8117  ;;  %4091 = vmatprep.mubr.f32.mxu0 %v8751_v12  ;;  %vm11761_vm8 = vmmov %vm11752_vm0 }
 0x4fe   : > { %v8120_v26 = vunpack.i.h.bf16 %v8118_v40  ;;  %v8119_v29 = vunpack.i.l.bf16 %v8118_v40  ;;  %vm11763_vm15 = vmmov %vm11752_vm0 }
 0x4ff   : > { %6241 = vmatmul.mubr.msk.f32.gmra.mrb[6].mxu0 %vm2921_vm1, %v4014_v36  ;;  %6898 = vmatprep.subr.msk.bf16.mxu1 %vm9226_vm7, %v6896_v16  ;;  %vm11762_vm1 = vmmov %vm11752_vm0  ;;  %v8507_v36 = vld [vmem:[%s9036_s25] sm:$0xff]  ;;  %v8508_v16 = vld [vmem:[%s9036_s25 + $0x10] sm:$0xff] }
 0x500   : > { %v4192_v27 = vsel %vm11759_vm4, %v8115_v17, %v8120_v26  ;;  %v4202_v43 = vsel %vm11760_vm2, %v8120_v26, %v8115_v17  ;;  %v4191_v48 = vsel %vm11752_vm0, %v8114_v38, %v8119_v29  ;;  %v4201_v47 = vsel %vm11761_vm8, %v8119_v29, %v8114_v38  ;;  %v8123_v49 = vpop.permute.xlu1 %8122  ;;  %6901 = vmatpush1.bf16.msk.msra.mxu1 %vm9246_vm10, %v6899_v34  ;;  %vm11764_vm4 = vmmov %vm11752_vm0  ;;  %v8510_v38 = vld [vmem:[%s9036_s25 + $0x18] sm:$0xff] }
 0x501   : > { %v6902_v52 = vpack.c.bf16 %v4192_v27, %v4191_v48  ;;  %v6905_v50 = vpack.c.bf16 %v4202_v43, %v4201_v47  ;;  %v8125_v53 = vunpack.i.h.bf16 %v8123_v49  ;;  %v8124_v54 = vunpack.i.l.bf16 %v8123_v49  ;;  %v8128_v44 = vpop.permute.xlu0 %8127  ;;  %4383 = vmatprep.mubr.f32.mxu0 %v8751_v12  ;;  %vm11765_vm2 = vmmov %vm11752_vm0  ;;  %v8511_v27 = vld [vmem:[%s9036_s25 + $0x20] sm:$0xff]  ;;  %v8512_v43 = vld [vmem:[%s9036_s25 + $0x30] sm:$0xff] }
 0x502   : > { %v8130_v8 = vunpack.i.h.bf16 %v8128_v44  ;;  %v8129_v51 = vunpack.i.l.bf16 %v8128_v44  ;;  %v10673_v34 = vpack.i.bf16 %v8508_v16, %v8507_v36  ;;  %v10693_v48 = vpack.i.bf16 %v8512_v43, %v8511_v27  ;;  %v8513_v47 = vld [vmem:[%s9036_s25 + $0x28] sm:$0xff]  ;;  %v8514_v49 = vld [vmem:[%s9036_s25 + $0x38] sm:$0xff]  ;;  %vm11766_vm8 = vmmov %vm11752_vm0 }
 0x503   : > { %6904 = vmatprep.subr.msk.bf16.mxu1 %vm9226_vm7, %v6902_v52  ;;  %v8156_v52 = vpack.i.bf16 %v8514_v49, %v8513_v47 }
 0x504   : > { %v4194_v55 = vsel %vm11762_vm1, %v8125_v53, %v8130_v8  ;;  %v4204_v22 = vsel %vm11763_vm15, %v8130_v8, %v8125_v53  ;;  %v4193_v61 = vsel %vm11764_vm4, %v8124_v54, %v8129_v51  ;;  %v4203_v14 = vsel %vm11765_vm2, %v8129_v51, %v8124_v54  ;;  %6907 = vmatpush1.bf16.msk.msra.mxu1 %vm9246_vm10, %v6905_v50  ;;  %vm11767_vm1 = vmmov %vm11752_vm0 }
 0x505   : > { %v6908_v7 = vpack.c.bf16 %v4194_v55, %v4193_v61  ;;  %v6911_v33 = vpack.c.bf16 %v4204_v22, %v4203_v14  ;;  %vm11768_vm15 = vmmov %vm11752_vm0  ;;  %vm4312_vm4 = vcmask 654336   ;;  %vm11769_vm2 = vcmp.lt.s32.totalorder %v9162_v18, 15 }
 0x507   : > { %6910 = vmatprep.subr.msk.bf16.mxu1 %vm9226_vm7, %v6908_v7 }
 0x508   : > { %6913 = vmatpush1.bf16.msk.msra.mxu1 %vm9246_vm10, %v6911_v33 }
 0x5ce   : > { %v4087_v11 = vpop.f32.mrb[4].mxu0 }
 0x5cf   : > { %v4089_v19 = vpop.f32.mrb[5].mxu0  ;;  %v4115_v10 = vadd.f32 %v10598_v35, %v4087_v11 }
 0x5d0   : > { %v4116_v20 = vadd.f32 %v10598_v35, %v4089_v19 }
 0x5d1   : > { %v4119_v60 = vmax.f32 %v4115_v10, 0.0 }
 0x5d2   : > { %v4093_v0 = vpop.f32.mrb[6].mxu0  ;;  %v4120_v62 = vmax.f32 %v4116_v20, 0.0 }
 0x5d3   : > { %v4117_v6 = vadd.f32 %v10603_v41, %v4093_v0  ;;  %v4095_v3 = vpop.f32.mrb[7].mxu0 }
 0x5d4   : > { %v4118_v1 = vadd.f32 %v10603_v41, %v4095_v3  ;;  %v8509_v41 = vld [vmem:[%s9036_s25 + $0x8] sm:$0xff] }
 0x5d5   : > { %v4121_v24 = vmax.f32 %v4117_v6, 0.0  ;;  %v8146_v40 = vpack.i.bf16 %v8510_v38, %v8509_v41  ;;  %v4227_v38 = vld [vmem:[#allocation11] sm:$0xff] }
 0x5d6   : > { %v4122_v28 = vmax.f32 %v4118_v1, 0.0 }
 0x5d7   : > { %v10675_v35 = vpack.i.bf16 %v4121_v24, %v4119_v60  ;;  %v10687_v29 = vpack.c.bf16 %v4121_v24, %v4119_v60 }
 0x5d8   : > { %v10677_v17 = vpack.i.bf16 %v4122_v28, %v4120_v62  ;;  %v10685_v26 = vpack.c.bf16 %v4122_v28, %v4120_v62 }
 0x5d9   : > { %8132 = vrot.lane.b32.xlu1 %v10675_v35, %s8752_s13 }
 0x5da   : > { %8142 = vrot.lane.b32.xlu0 %v10677_v17, %s8752_s13 }
 0x5dd   : > { %8137 = vrot.lane.b32.xlu1 %v10673_v34, %s8753_s14 }
 0x5de   : > { %8147 = vrot.lane.b32.xlu0 %v8146_v40, %s8753_s14 }
 0x5e1   : > { %8152 = vrot.lane.b32.xlu1 %v10693_v48, %s8753_s14 }
 0x5e2   : > { %8157 = vrot.lane.b32.xlu0 %v8156_v52, %s8753_s14 }
 0x5e5   : > { %8162 = vrot.lane.b32.xlu1 %v9555_v63, %s8753_s14 }
 0x5e6   : > { %8167 = vrot.lane.b32.xlu0 %v9557_v13, %s8753_s14 }
 0x5e9   : > { %8172 = vrot.lane.b32.xlu1 %v9999_v21, %s8753_s14 }
 0x5ea   : > { %8177 = vrot.lane.b32.xlu0 %v10001_v23, %s8753_s14 }
 0x5ed   : > { %8182 = vrot.lane.b32.xlu1 %v10675_v35, %s8753_s14 }
 0x5ee   : > { %8192 = vrot.lane.b32.xlu0 %v10677_v17, %s8753_s14 }
 0x5f1   : > { %8187 = vrot.lane.b32.xlu1 %v10673_v34, %s8754_s15 }
 0x5f2   : > { %8197 = vrot.lane.b32.xlu0 %v8146_v40, %s8754_s15 }
 0x5f5   : > { %8202 = vrot.lane.b32.xlu1 %v10693_v48, %s8754_s15 }
 0x5f6   : > { %8207 = vrot.lane.b32.xlu0 %v8156_v52, %s8754_s15 }
 0x5f9   : > { %8212 = vrot.lane.b32.xlu1 %v9555_v63, %s8754_s15 }
 0x5fa   : > { %8217 = vrot.lane.b32.xlu0 %v9557_v13, %s8754_s15 }
 0x5fd   : > { %8222 = vrot.lane.b32.xlu1 %v9999_v21, %s8754_s15 }
 0x5fe   : > { %8227 = vrot.lane.b32.xlu0 %v10001_v23, %s8754_s15 }
 0x601   : > { %8232 = vrot.lane.b32.xlu1 %v10675_v35, %s8754_s15 }
 0x602   : > { %8242 = vrot.lane.b32.xlu0 %v10677_v17, %s8754_s15  ;;  %s11457_s15 = scalar_lea.hbm %s11512_s8, %s6414_s21 }
 0x605   : > { %8237 = vrot.lane.b32.xlu1 %v10673_v34, %s8755_s20 }
 0x606   : > { %8247 = vrot.lane.b32.xlu0 %v8146_v40, %s8755_s20 }
 0x609   : > { %8252 = vrot.lane.b32.xlu1 %v10693_v48, %s8755_s20 }
 0x60a   : > { %8257 = vrot.lane.b32.xlu0 %v8156_v52, %s8755_s20 }
 0x60d   : > { %8262 = vrot.lane.b32.xlu1 %v9555_v63, %s8755_s20 }
 0x60e   : > { %8267 = vrot.lane.b32.xlu0 %v9557_v13, %s8755_s20 }
 0x611   : > { %8272 = vrot.lane.b32.xlu1 %v9999_v21, %s8755_s20 }
 0x612   : > { %8277 = vrot.lane.b32.xlu0 %v10001_v23, %s8755_s20 }
 0x615   : > { %8282 = vrot.lane.b32.xlu1 %v10675_v35, %s8755_s20 }
 0x616   : > { %8292 = vrot.lane.b32.xlu0 %v8146_v40, %s8756_s18 }
 0x619   : > { %8287 = vrot.lane.b32.xlu1 %v10673_v34, %s8756_s18 }
 0x61a   : > { %8302 = vrot.lane.b32.xlu0 %v8156_v52, %s8756_s18 }
 0x61d   : > { %8297 = vrot.lane.b32.xlu1 %v10693_v48, %s8756_s18 }
 0x61e   : > { %8312 = vrot.lane.b32.xlu0 %v9557_v13, %s8756_s18 }
 0x621   : > { %8307 = vrot.lane.b32.xlu1 %v9555_v63, %s8756_s18 }
 0x622   : > { %8322 = vrot.lane.b32.xlu0 %v10001_v23, %s8756_s18 }
 0x625   : > { %8317 = vrot.lane.b32.xlu1 %v9999_v21, %s8756_s18 }
 0x626   : > { %8337 = vrot.lane.b32.xlu0 %v8146_v40, %s8757_s22 }
 0x629   : > { %8327 = vrot.lane.b32.xlu1 %v10675_v35, %s8756_s18 }
 0x62a   : > { %8347 = vrot.lane.b32.xlu0 %v10677_v17, %s8755_s20  ;;  %s5793_s20 = scalar_lea.sflag [#allocation5], %s9030_s10 }
 0x62d   : > { %8332 = vrot.lane.b32.xlu1 %v10673_v34, %s8757_s22 }
 0x62e   : > { %8352 = vrot.lane.b32.xlu0 %v8156_v52, %s8757_s22 }
 0x631   : > { %8342 = vrot.lane.b32.xlu1 %v10693_v48, %s8757_s22 }
 0x632   : > { %8362 = vrot.lane.b32.xlu0 %v9557_v13, %s8757_s22 }
 0x635   : > { %8357 = vrot.lane.b32.xlu1 %v9555_v63, %s8757_s22 }
 0x636   : > { %8372 = vrot.lane.b32.xlu0 %v10001_v23, %s8757_s22 }
 0x639   : > { %8367 = vrot.lane.b32.xlu1 %v9999_v21, %s8757_s22 }
 0x63a   : > { %8387 = vrot.lane.b32.xlu0 %v8146_v40, %s8750_s11 }
 0x63d   : > { %8377 = vrot.lane.b32.xlu1 %v10675_v35, %s8757_s22 }
 0x63e   : > { %8397 = vrot.lane.b32.xlu0 %v10677_v17, %s8756_s18  ;;  %s8760_s18 = smov [#allocation12]  }
 0x641   : > { %8382 = vrot.lane.b32.xlu1 %v10673_v34, %s8750_s11 }
 0x642   : > { %8402 = vrot.lane.b32.xlu0 %v8146_v40, %s8758_s17 }
 0x645   : > { %8392 = vrot.lane.b32.xlu1 %v10673_v34, %s8758_s17 }
 0x646   : > { %8412 = vrot.lane.b32.xlu0 %v8156_v52, %s8750_s11 }
 0x649   : > { %8407 = vrot.lane.b32.xlu1 %v10693_v48, %s8750_s11 }
 0x64a   : > { %8422 = vrot.lane.b32.xlu0 %v8156_v52, %s8758_s17 }
 0x64b   : > { %v8133_v50 = vpop.permute.xlu1 %8132 }
 0x64c   : > { %v8135_v53 = vunpack.i.h.bf16 %v8133_v50  ;;  %v8134_v54 = vunpack.i.l.bf16 %v8133_v50  ;;  %v8143_v44 = vpop.permute.xlu0 %8142 }
 0x64d   : > { %v8145_v8 = vunpack.i.h.bf16 %v8143_v44  ;;  %v8144_v51 = vunpack.i.l.bf16 %v8143_v44  ;;  %8417 = vrot.lane.b32.xlu1 %v10693_v48, %s8758_s17 }
 0x64e   : > { %8432 = vrot.lane.b32.xlu0 %v9557_v13, %s8750_s11 }
 0x64f   : > { %v4196_v55 = vsel %vm11752_vm0, %v8135_v53, %v8145_v8  ;;  %v4206_v22 = vsel %vm11766_vm8, %v8145_v8, %v8135_v53  ;;  %v4195_v61 = vsel %vm11767_vm1, %v8134_v54, %v8144_v51  ;;  %v4205_v14 = vsel %vm11768_vm15, %v8144_v51, %v8134_v54  ;;  %v8138_v7 = vpop.permute.xlu1 %8137  ;;  %vm11770_vm0 = vmmov %vm11769_vm2  ;;  %v4228_v54 = vld [vmem:[#allocation11 + $0x8] sm:$0xff] }
 0x650   : > { %v6914_v33 = vpack.c.bf16 %v4196_v55, %v4195_v61  ;;  %v6917_v11 = vpack.c.bf16 %v4206_v22, %v4205_v14  ;;  %v8140_v19 = vunpack.i.h.bf16 %v8138_v7  ;;  %v8139_v10 = vunpack.i.l.bf16 %v8138_v7  ;;  %v8148_v20 = vpop.permute.xlu0 %8147  ;;  %vm11771_vm8 = vmmov %vm11770_vm0 }
 0x651   : > { %v8150_v0 = vunpack.i.h.bf16 %v8148_v20  ;;  %v8149_v6 = vunpack.i.l.bf16 %v8148_v20  ;;  %8427 = vrot.lane.b32.xlu1 %v9555_v63, %s8750_s11  ;;  %vm11772_vm1 = vmmov %vm11770_vm0 }
 0x652   : > { %8442 = vrot.lane.b32.xlu0 %v10677_v17, %s8757_s22  ;;  %6916 = vmatprep.subr.msk.bf16.mxu1 %vm9226_vm7, %v6914_v33  ;;  %vm11773_vm15 = vmmov %vm11770_vm0  ;;  %s8669_s22 = sshll.u32 %s8760_s18, 4  ;;  %s8670_s22 = int_to_ptr.vmem [resolvable:$false] %s8669_s22 }
 0x653   : > { %v4520_v3 = vsel %vm11769_vm2, %v8140_v19, %v8150_v0  ;;  %v4530_v1 = vsel %vm11770_vm0, %v8150_v0, %v8140_v19  ;;  %v4519_v60 = vsel %vm11771_vm8, %v8139_v10, %v8149_v6  ;;  %v4529_v24 = vsel %vm11772_vm1, %v8149_v6, %v8139_v10  ;;  %v8153_v62 = vpop.permute.xlu1 %8152  ;;  %6919 = vmatpush1.bf16.msk.msra.mxu1 %vm9246_vm10, %v6917_v11  ;;  %vm11774_vm10 = vmmov %vm11770_vm0  ;;  %p8672_p12 = scmp.lt.s32.totalorder %s11450_s19, %s8670_s22 }
 0x654   : > { %v6920_v28 = vpack.c.bf16 %v4520_v3, %v4519_v60  ;;  %v6923_v36 = vpack.c.bf16 %v4530_v1, %v4529_v24  ;;  %v8155_v16 = vunpack.i.h.bf16 %v8153_v62  ;;  %v8154_v34 = vunpack.i.l.bf16 %v8153_v62  ;;  %v8158_v41 = vpop.permute.xlu0 %8157  ;;  %vm11775_vm2 = vmmov %vm11770_vm0 }
 0x655   : > { %v8160_v40 = vunpack.i.h.bf16 %v8158_v41  ;;  %v8159_v27 = vunpack.i.l.bf16 %v8158_v41  ;;  %8437 = vrot.lane.b32.xlu1 %v9555_v63, %s8758_s17  ;;  %vm11776_vm8 = vmmov %vm11770_vm0 }
 0x656   : > { %8447 = vrot.lane.b32.xlu0 %v9557_v13, %s8758_s17  ;;  %6922 = vmatprep.subr.msk.bf16.mxu1 %vm9277_vm13, %v6920_v28  ;;  %vm11777_vm1 = vmmov %vm11770_vm0 }
 0x657   : > { %v4522_v25 = vsel %vm11773_vm15, %v8155_v16, %v8160_v40  ;;  %v4532_v43 = vsel %vm11774_vm10, %v8160_v40, %v8155_v16  ;;  %v4521_v48 = vsel %vm11775_vm2, %v8154_v34, %v8159_v27  ;;  %v4531_v47 = vsel %vm11770_vm0, %v8159_v27, %v8154_v34  ;;  %v8163_v49 = vpop.permute.xlu1 %8162  ;;  %6276 = vmatmul.mubr.msk.f32.vlgmr.msra.gmra.mrb[4].mxu1 %vm4312_vm4, %v4227_v38  ;;  %vm11778_vm15 = vmmov %vm11770_vm0 }
 0x658   : > { %v6926_v63 = vpack.c.bf16 %v4522_v25, %v4521_v48  ;;  %v6929_v13 = vpack.c.bf16 %v4532_v43, %v4531_v47  ;;  %v8165_v52 = vunpack.i.h.bf16 %v8163_v49  ;;  %v8164_v50 = vunpack.i.l.bf16 %v8163_v49  ;;  %6925 = vmatpush1.bf16.msk.msra.mxu1 %vm11676_vm14, %v6923_v36  ;;  %v8168_v53 = vpop.permute.xlu0 %8167  ;;  %4472 = vmatprep.mubr.f32.mxu1 %v8751_v12  ;;  %vm11779_vm10 = vmmov %vm11770_vm0 }
 0x659   : > { %v8170_v44 = vunpack.i.h.bf16 %v8168_v53  ;;  %v8169_v8 = vunpack.i.l.bf16 %v8168_v53  ;;  %8452 = vrot.lane.b32.xlu1 %v9999_v21, %s8750_s11  ;;  %vm11780_vm2 = vmmov %vm11770_vm0 }
 0x65a   : > { %8457 = vrot.lane.b32.xlu0 %v10001_v23, %s8750_s11  ;;  %6928 = vmatprep.subr.msk.bf16.mxu1 %vm9277_vm13, %v6926_v63 }
 0x65b   : > { %v4524_v51 = vsel %vm11776_vm8, %v8165_v52, %v8170_v44  ;;  %v4534_v55 = vsel %vm11777_vm1, %v8170_v44, %v8165_v52  ;;  %v4523_v22 = vsel %vm11778_vm15, %v8164_v50, %v8169_v8  ;;  %v4533_v61 = vsel %vm11779_vm10, %v8169_v8, %v8164_v50  ;;  %v8173_v14 = vpop.permute.xlu1 %8172  ;;  %6277 = vmatmul.mubr.msk.f32.gmra.mrb[6].mxu1 %vm4312_vm4, %v4228_v54  ;;  %vm11781_vm8 = vmmov %vm11770_vm0  ;;  %v6402_v50 = vld [vmem:[%s11509_s5 + $0x30] sm:$0xff]  ;;  %v6403_v8 = vld [vmem:[%s11509_s5 + $0x38] sm:$0xff] }
 0x65c   : > { %v6932_v7 = vpack.c.bf16 %v4524_v51, %v4523_v22  ;;  %v6935_v33 = vpack.c.bf16 %v4534_v55, %v4533_v61  ;;  %v8175_v11 = vunpack.i.h.bf16 %v8173_v14  ;;  %v8174_v19 = vunpack.i.l.bf16 %v8173_v14  ;;  %6931 = vmatpush1.bf16.msk.msra.mxu1 %vm11676_vm14, %v6929_v13  ;;  %v8178_v10 = vpop.permute.xlu0 %8177  ;;  %4632 = vmatprep.mubr.f32.mxu1 %v8751_v12  ;;  %vm11782_vm1 = vmmov %vm11770_vm0 }
 0x65d   : > { %v8180_v20 = vunpack.i.h.bf16 %v8178_v10  ;;  %v8179_v0 = vunpack.i.l.bf16 %v8178_v10  ;;  %8462 = vrot.lane.b32.xlu1 %v9999_v21, %s8758_s17  ;;  %vm11783_vm15 = vmmov %vm11770_vm0 }
 0x65e   : > { %8467 = vrot.lane.b32.xlu0 %v10001_v23, %s8758_s17  ;;  %6934 = vmatprep.subr.msk.bf16.mxu1 %vm9277_vm13, %v6932_v7  ;;  %vm11784_vm10 = vmmov %vm11770_vm0  ;;  %v4560_v7 = vld [vmem:[#allocation11 + $0x20] sm:$0xff] }
 0x65f   : > { %v4526_v6 = vsel %vm11780_vm2, %v8175_v11, %v8180_v20  ;;  %v4536_v3 = vsel %vm11770_vm0, %v8180_v20, %v8175_v11  ;;  %v4525_v1 = vsel %vm11781_vm8, %v8174_v19, %v8179_v0  ;;  %v4535_v60 = vsel %vm11782_vm1, %v8179_v0, %v8174_v19  ;;  %v8183_v24 = vpop.permute.xlu1 %8182  ;;  %vm11785_vm2 = vmmov %vm11770_vm0  ;;  %v5642_v19 = vld [vmem:[%s11511_s7] sm:$0xff] }
 0x660   : > { %v6938_v21 = vpack.c.bf16 %v4526_v6, %v4525_v1  ;;  %v6941_v62 = vpack.c.bf16 %v4536_v3, %v4535_v60  ;;  %v8185_v28 = vunpack.i.h.bf16 %v8183_v24  ;;  %v8184_v23 = vunpack.i.l.bf16 %v8183_v24  ;;  %6937 = vmatpush1.bf16.msk.msra.mxu1 %vm11676_vm14, %v6935_v33  ;;  %v8193_v36 = vpop.permute.xlu0 %8192  ;;  %v5643_v3 = vld [vmem:[%s11511_s7 + $0x8] sm:$0xff] }
 0x661   : > { %v8195_v16 = vunpack.i.h.bf16 %v8193_v36  ;;  %v8194_v34 = vunpack.i.l.bf16 %v8193_v36  ;;  %8472 = vrot.lane.b32.xlu1 %v10675_v35, %s8750_s11  ;;  %vm11786_vm8 = vcmp.lt.s32.totalorder %v9162_v18, 1 }
 0x662   : > { %8482 = vrot.lane.b32.xlu0 %v10677_v17, %s8750_s11  ;;  %6940 = vmatprep.subr.msk.bf16.mxu1 %vm9277_vm13, %v6938_v21  ;;  %vm11787_vm1 = vmmov %vm11786_vm8 }
 0x663   : > { %v4528_v41 = vsel %vm11783_vm15, %v8185_v28, %v8195_v16  ;;  %v4538_v38 = vsel %vm11784_vm10, %v8195_v16, %v8185_v28  ;;  %v4527_v40 = vsel %vm11785_vm2, %v8184_v23, %v8194_v34  ;;  %v4537_v27 = vsel %vm11770_vm0, %v8194_v34, %v8184_v23  ;;  %v8188_v25 = vpop.permute.xlu1 %8187  ;;  %vm11788_vm15 = vmmov %vm11787_vm1  ;;  %v4561_v28 = vld [vmem:[#allocation11 + $0x28] sm:$0xff]  ;;  %v5644_v16 = vld [vmem:[%s11511_s7 + $0x10] sm:$0xff] }
 0x664   : > { %v6944_v43 = vpack.c.bf16 %v4528_v41, %v4527_v40  ;;  %v6947_v48 = vpack.c.bf16 %v4538_v38, %v4537_v27  ;;  %v8190_v47 = vunpack.i.h.bf16 %v8188_v25  ;;  %v8189_v49 = vunpack.i.l.bf16 %v8188_v25  ;;  %6943 = vmatpush1.bf16.msk.msra.mxu1 %vm11676_vm14, %v6941_v62  ;;  %v8198_v63 = vpop.permute.xlu0 %8197  ;;  %vm11789_vm10 = vmmov %vm11787_vm1  ;;  %v5645_v25 = vld [vmem:[%s11511_s7 + $0x18] sm:$0xff] }
 0x665   : > { %v8200_v13 = vunpack.i.h.bf16 %v8198_v63  ;;  %v8199_v52 = vunpack.i.l.bf16 %v8198_v63  ;;  %8477 = vrot.lane.b32.xlu1 %v10675_v35, %s8758_s17  ;;  %vm11790_vm2 = vmmov %vm11787_vm1 }
 0x666   : > { %8487 = vrot.lane.b32.xlu0 %v10677_v17, %s8758_s17  ;;  %6946 = vmatprep.subr.msk.bf16.mxu1 %vm9277_vm13, %v6944_v43  ;;  %vm11791_vm0 = vmmov %vm11787_vm1  ;;  %s8671_s17 = scalar_lea.vmem %s8670_s22, 2048 }
 0x667   : > { %v4690_v53 = vsel %vm11786_vm8, %v8190_v47, %v8200_v13  ;;  %v4700_v54 = vsel %vm11787_vm1, %v8200_v13, %v8190_v47  ;;  %v4689_v44 = vsel %vm11788_vm15, %v8189_v49, %v8199_v52  ;;  %v4699_v35 = vsel %vm11789_vm10, %v8199_v52, %v8189_v49  ;;  %v8203_v17 = vpop.permute.xlu1 %8202  ;;  %vm11793_vm8 = vmmov %vm11791_vm0  ;;  %p8673_p1 = scmp.lt.s32.totalorder %s8671_s17, %s8665_s9 }
 0x668   : > { %v6950_v51 = vpack.c.bf16 %v4690_v53, %v4689_v44  ;;  %v6953_v55 = vpack.c.bf16 %v4700_v54, %v4699_v35  ;;  %v8205_v22 = vunpack.i.h.bf16 %v8203_v17  ;;  %v8204_v61 = vunpack.i.l.bf16 %v8203_v17  ;;  %6949 = vmatpush1.bf16.msk.msra.mxu1 %vm11676_vm14, %v6947_v48  ;;  %v8208_v14 = vpop.permute.xlu0 %8207  ;;  %vm11792_vm14 = vmmov %vm11791_vm0 }
 0x669   : > { %v8210_v33 = vunpack.i.h.bf16 %v8208_v14  ;;  %v8209_v11 = vunpack.i.l.bf16 %v8208_v14  ;;  %5594 = vperm.xlu1 %7530, %v6402_v50   ;;  %vm11794_vm1 = vmmov %vm11791_vm0  ;;  %p8674_p2 = por %p8673_p1, %p8672_p12 }
 0x66a   : > { %5599 = vperm.xlu0 %7529, %v6403_v8   ;;  %6952 = vmatprep.subr.msk.bf16.mxu1 %vm9226_vm7, %v6950_v51  ;;  %vm11795_vm15 = vmmov %vm11791_vm0 }
 0x66b   : > { %v4692_v10 = vsel %vm11790_vm2, %v8205_v22, %v8210_v33  ;;  %v4702_v58 = vsel %vm11791_vm0, %v8210_v33, %v8205_v22  ;;  %v4691_v20 = vsel %vm11792_vm14, %v8204_v61, %v8209_v11  ;;  %v4701_v0 = vsel %vm11793_vm8, %v8209_v11, %v8204_v61  ;;  %v8213_v6 = vpop.permute.xlu1 %8212  ;;  %6298 = vmatmul.mubr.msk.f32.vlgmr.msra.gmra.mrb[4].mxu1 %vm4312_vm4, %v4560_v7  ;;  %vm11796_vm10 = vmmov %vm11791_vm0  ;;  %p8675_p13 = pnand %p8674_p2, %p8668_p7 }
 0x66c   : > { %v6956_v1 = vpack.c.bf16 %v4692_v10, %v4691_v20  ;;  %v6959_v60 = vpack.c.bf16 %v4702_v58, %v4701_v0  ;;  %v8215_v24 = vunpack.i.h.bf16 %v8213_v6  ;;  %v8214_v21 = vunpack.i.l.bf16 %v8213_v6  ;;  %6955 = vmatpush1.bf16.msk.msra.mxu1 %vm9328_vm6, %v6953_v55  ;;  %v8218_v62 = vpop.permute.xlu0 %8217  ;;  %4638 = vmatprep.mubr.f32.mxu1 %v8751_v12  ;;  %vm11797_vm2 = vmmov %vm11791_vm0 }
 0x66d   : > { %v8220_v23 = vunpack.i.h.bf16 %v8218_v62  ;;  %v8219_v36 = vunpack.i.l.bf16 %v8218_v62  ;;  %5648 = vperm.xlu1 %7530, %v5642_v19   ;;  %vm11798_vm14 = vmmov %vm11791_vm0 }
 0x66e   : > { %5653 = vperm.xlu0 %7529, %v5643_v3   ;;  %6958 = vmatprep.subr.msk.bf16.mxu1 %vm9226_vm7, %v6956_v1  ;;  %vm11799_vm8 = vmmov %vm11791_vm0  ;;  %v4730_v1 = vld [vmem:[#allocation11 + $0x30] sm:$0xff] }
 0x66f   : > { %v4694_v34 = vsel %vm11794_vm1, %v8215_v24, %v8220_v23  ;;  %v4704_v41 = vsel %vm11795_vm15, %v8220_v23, %v8215_v24  ;;  %v4693_v38 = vsel %vm11796_vm10, %v8214_v21, %v8219_v36  ;;  %v4703_v40 = vsel %vm11797_vm2, %v8219_v36, %v8214_v21  ;;  %v8223_v27 = vpop.permute.xlu1 %8222  ;;  %6299 = vmatmul.mubr.msk.f32.gmra.mrb[6].mxu1 %vm4312_vm4, %v4561_v28  ;;  %vm11800_vm1 = vmmov %vm11791_vm0 }
 0x670   : > { %v6962_v43 = vpack.c.bf16 %v4694_v34, %v4693_v38  ;;  %v6965_v48 = vpack.c.bf16 %v4704_v41, %v4703_v40  ;;  %v8225_v47 = vunpack.i.h.bf16 %v8223_v27  ;;  %v8224_v49 = vunpack.i.l.bf16 %v8223_v27  ;;  %6961 = vmatpush1.bf16.msk.msra.mxu1 %vm9328_vm6, %v6959_v60  ;;  %v8228_v63 = vpop.permute.xlu0 %8227  ;;  %4802 = vmatprep.mubr.f32.mxu1 %v8751_v12  ;;  %vm11801_vm15 = vmmov %vm11791_vm0 }
 0x671   : > { %v8230_v13 = vunpack.i.h.bf16 %v8228_v63  ;;  %v8229_v52 = vunpack.i.l.bf16 %v8228_v63  ;;  %5658 = vperm.xlu1 %7530, %v5644_v16   ;;  %vm11802_vm10 = vmmov %vm11791_vm0 }
 0x672   : > { %5663 = vperm.xlu0 %7529, %v5645_v25   ;;  %6964 = vmatprep.subr.msk.bf16.mxu1 %vm9226_vm7, %v6962_v43  ;;  %vm11803_vm2 = vmmov %vm11791_vm0 }
 0x673   : > { %v4696_v50 = vsel %vm11791_vm0, %v8225_v47, %v8230_v13  ;;  %v4706_v53 = vsel %vm11798_vm14, %v8230_v13, %v8225_v47  ;;  %v4695_v54 = vsel %vm11799_vm8, %v8224_v49, %v8229_v52  ;;  %v4705_v44 = vsel %vm11800_vm1, %v8229_v52, %v8224_v49  ;;  %v8233_v35 = vpop.permute.xlu1 %8232 }
 0x674   : > { %v6968_v17 = vpack.c.bf16 %v4696_v50, %v4695_v54  ;;  %v6971_v8 = vpack.c.bf16 %v4706_v53, %v4705_v44  ;;  %v8235_v51 = vunpack.i.h.bf16 %v8233_v35  ;;  %v8234_v55 = vunpack.i.l.bf16 %v8233_v35  ;;  %6967 = vmatpush1.bf16.msk.msra.mxu1 %vm9328_vm6, %v6965_v48  ;;  %v8243_v22 = vpop.permute.xlu0 %8242 }
 0x675   : > { %v8245_v61 = vunpack.i.h.bf16 %v8243_v22  ;;  %v8244_v14 = vunpack.i.l.bf16 %v8243_v22 }
 0x676   : > { %6970 = vmatprep.subr.msk.bf16.mxu1 %vm9226_vm7, %v6968_v17 }
 0x677   : > { %v4698_v7 = vsel %vm11801_vm15, %v8235_v51, %v8245_v61  ;;  %v4708_v33 = vsel %vm11802_vm10, %v8245_v61, %v8235_v51  ;;  %v4697_v11 = vsel %vm11803_vm2, %v8234_v55, %v8244_v14  ;;  %v4707_v19 = vsel %vm11791_vm0, %v8244_v14, %v8234_v55  ;;  %v8238_v10 = vpop.permute.xlu1 %8237  ;;  %v4820_v55 = vld [vmem:[#allocation11 + $0x40] sm:$0xff] }
 0x678   : > { %v6974_v58 = vpack.c.bf16 %v4698_v7, %v4697_v11  ;;  %v6977_v20 = vpack.c.bf16 %v4708_v33, %v4707_v19  ;;  %6973 = vmatpush1.bf16.msk.msra.mxu1 %vm9328_vm6, %v6971_v8  ;;  %v8248_v0 = vpop.permute.xlu0 %8247  ;;  %v8240_v28 = vunpack.i.h.bf16 %v8238_v10  ;;  %v8239_v23 = vunpack.i.l.bf16 %v8238_v10 }
 0x679   : > { %v8250_v36 = vunpack.i.h.bf16 %v8248_v0  ;;  %v8249_v16 = vunpack.i.l.bf16 %v8248_v0 }
 0x67a   : > { %6976 = vmatprep.subr.msk.bf16.mxu1 %vm9226_vm7, %v6974_v58  ;;  %vm11804_vm7 = vcmp.lt.s32.totalorder %v9162_v18, 127 }
 0x67b   : > { %v8253_v6 = vpop.permute.xlu1 %8252  ;;  %v4960_v38 = vsel %vm11804_vm7, %v8250_v36, %v8240_v28  ;;  %vm11805_vm14 = vmmov %vm11804_vm7 }
 0x67c   : > { %6979 = vmatpush1.bf16.msk.msra.mxu1 %vm9328_vm6, %v6977_v20  ;;  %v8258_v3 = vpop.permute.xlu0 %8257  ;;  %v4959_v40 = vsel %vm11805_vm14, %v8249_v16, %v8239_v23  ;;  %v8255_v25 = vunpack.i.h.bf16 %v8253_v6  ;;  %v8254_v43 = vunpack.i.l.bf16 %v8253_v6  ;;  %vm11806_vm8 = vmmov %vm11804_vm7 }
 0x67d   : > { %6981 = vmatprep.subr.bf16.mxu1 %v9345_v45  ;;  %v8260_v48 = vunpack.i.h.bf16 %v8258_v3  ;;  %v8259_v47 = vunpack.i.l.bf16 %v8258_v3  ;;  %v4950_v63 = vsel %vm11806_vm8, %v8240_v28, %v8250_v36  ;;  %vm11807_vm1 = vmmov %vm11804_vm7  ;;  %v7000_v52 = vpack.c.bf16 %v4960_v38, %v4959_v40  ;;  %v4821_v3 = vld [vmem:[#allocation11 + $0x48] sm:$0xff] }
 0x67e   : > { %v4949_v13 = vsel %vm11807_vm1, %v8239_v23, %v8249_v16  ;;  %vm11808_vm15 = vmmov %vm11807_vm1 }
 0x67f   : > { %v10980_v60 = vpop.permute.xlu1 %8262  ;;  %6320 = vmatmul.mubr.msk.f32.vlgmr.msra.gmra.mrb[4].mxu1 %vm4312_vm4, %v4730_v1  ;;  %v4962_v17 = vsel %vm11808_vm15, %v8260_v48, %v8255_v25  ;;  %vm11809_vm10 = vmmov %vm11807_vm1  ;;  %v7003_v22 = vpack.c.bf16 %v4950_v63, %v4949_v13 }
 0x680   : > { %6983 = vmatpush1.bf16.msra.mxu1 %v9356_v9  ;;  %v10984_v24 = vpop.permute.xlu0 %8267  ;;  %4808 = vmatprep.mubr.f32.mxu1 %v8751_v12  ;;  %v8265_v50 = vunpack.i.h.bf16 %v10980_v60  ;;  %v8264_v53 = vunpack.i.l.bf16 %v10980_v60  ;;  %v4961_v8 = vsel %vm11809_vm10, %v8259_v47, %v8254_v43  ;;  %vm11810_vm2 = vmmov %vm11807_vm1 }
 0x681   : > { %6985 = vmatprep.subr.bf16.mxu1 %v9365_v59  ;;  %v8270_v54 = vunpack.i.h.bf16 %v10984_v24  ;;  %v8269_v44 = vunpack.i.l.bf16 %v10984_v24  ;;  %v4952_v61 = vsel %vm11810_vm2, %v8255_v25, %v8260_v48  ;;  %vm11811_vm0 = vmmov %vm11807_vm1  ;;  %v7006_v7 = vpack.c.bf16 %v4962_v17, %v4961_v8 }
 0x682   : > { %v4951_v14 = vsel %vm11811_vm0, %v8254_v43, %v8259_v47  ;;  %vm11812_vm7 = vmmov %vm11811_vm0 }
 0x683   : > { %v10988_v21 = vpop.permute.xlu1 %8272  ;;  %6321 = vmatmul.mubr.msk.f32.gmra.mrb[6].mxu1 %vm4312_vm4, %v4731_v15  ;;  %v4964_v33 = vsel %vm11812_vm7, %v8270_v54, %v8265_v50  ;;  %vm11813_vm14 = vmmov %vm11811_vm0  ;;  %v7009_v1 = vpack.c.bf16 %v4952_v61, %v4951_v14  ;;  %vm11819_vm7 = vcmp.lt.s32.totalorder %v9162_v18, 113 }
 0x684   : > { %6987 = vmatpush1.bf16.msra.mxu1 %v9370_v2  ;;  %v10992_v62 = vpop.permute.xlu0 %8277  ;;  %4892 = vmatprep.mubr.f32.mxu1 %v8751_v12  ;;  %v4963_v11 = vsel %vm11813_vm14, %v8269_v44, %v8264_v53  ;;  %v8275_v10 = vunpack.i.h.bf16 %v10988_v21  ;;  %v8274_v58 = vunpack.i.l.bf16 %v10988_v21  ;;  %vm11814_vm8 = vmmov %vm11811_vm0 }
 0x685   : > { %6989 = vmatprep.subr.bf16.mxu1 %v9563_v4  ;;  %v8280_v20 = vunpack.i.h.bf16 %v10992_v62  ;;  %v8279_v0 = vunpack.i.l.bf16 %v10992_v62  ;;  %v4954_v60 = vsel %vm11814_vm8, %v8265_v50, %v8270_v54  ;;  %vm11815_vm1 = vmmov %vm11811_vm0  ;;  %v7012_v15 = vpack.c.bf16 %v4964_v33, %v4963_v11 }
 0x686   : > { %v4953_v24 = vsel %vm11815_vm1, %v8264_v53, %v8269_v44  ;;  %vm11816_vm15 = vmmov %vm11811_vm0 }
 0x687   : > { %v10996_v34 = vpop.permute.xlu1 %8282  ;;  %v4966_v62 = vsel %vm11816_vm15, %v8280_v20, %v8275_v10  ;;  %vm11817_vm10 = vmmov %vm11811_vm0  ;;  %v7015_v36 = vpack.c.bf16 %v4954_v60, %v4953_v24  ;;  %v4955_v25 = vsel %vm11811_vm0, %v8274_v58, %v8279_v0 }
 0x688   : > { %6991 = vmatpush1.bf16.msra.mxu1 %v9565_v5  ;;  %v10999_v41 = vpop.permute.xlu0 %8292  ;;  %v4965_v28 = vsel %vm11817_vm10, %v8279_v0, %v8274_v58  ;;  %vm11818_vm2 = vmmov %vm11811_vm0 }
 0x689   : > { %6993 = vmatprep.subr.bf16.mxu1 %v10015_v30  ;;  %v4956_v40 = vsel %vm11818_vm2, %v8275_v10, %v8280_v20  ;;  %v7018_v43 = vpack.c.bf16 %v4966_v62, %v4965_v28  ;;  %v8295_v47 = vunpack.i.h.bf16 %v10999_v41  ;;  %v8294_v63 = vunpack.i.l.bf16 %v10999_v41  ;;  %vm11820_vm14 = vmmov %vm11819_vm7 }
 0x68a   : > { %v7021_v54 = vpack.c.bf16 %v4956_v40, %v4955_v25  ;;  %vm11821_vm8 = vmmov %vm11811_vm0 }
 0x68b   : > { %v11006_v27 = vpop.permute.xlu1 %8287  ;;  %vm11822_vm1 = vmmov %vm11811_vm0 }
 0x68c   : > { %6995 = vmatpush1.bf16.msra.mxu1 %v10017_v32  ;;  %v11009_v49 = vpop.permute.xlu0 %8302  ;;  %v8290_v16 = vunpack.i.h.bf16 %v11006_v27  ;;  %v8289_v38 = vunpack.i.l.bf16 %v11006_v27  ;;  %v8284_v27 = vunpack.i.l.bf16 %v10996_v34  ;;  %vm11823_vm15 = vmmov %vm11811_vm0 }
 0x68d   : > { %6997 = vmatprep.subr.bf16.mxu1 %v10685_v26  ;;  %vm11824_vm10 = vmmov %vm11811_vm0  ;;  %v8305_v10 = vunpack.i.h.bf16 %v11009_v49  ;;  %v8304_v58 = vunpack.i.l.bf16 %v11009_v49 }
 0x68e   : > { %v5129_v44 = vsel %vm11819_vm7, %v8294_v63, %v8289_v38  ;;  %v5130_v41 = vsel %vm11820_vm14, %v8295_v47, %v8290_v16  ;;  %vm11825_vm2 = vmmov %vm11819_vm7 }
 0x68f   : > { %v11020_v35 = vpop.permute.xlu1 %8297  ;;  %v5119_v20 = vsel %vm11825_vm2, %v8289_v38, %v8294_v63  ;;  %vm11826_vm0 = vmmov %vm11825_vm2  ;;  %v7030_v0 = vpack.c.bf16 %v5130_v41, %v5129_v44 }
 0x690   : > { %6999 = vmatpush1.bf16.msra.mxu1 %v10687_v29  ;;  %v11027_v51 = vpop.permute.xlu0 %8312  ;;  %v8300_v61 = vunpack.i.h.bf16 %v11020_v35  ;;  %v8299_v14 = vunpack.i.l.bf16 %v11020_v35  ;;  %v5120_v35 = vsel %vm11826_vm0, %v8290_v16, %v8295_v47  ;;  %vm11827_vm7 = vmmov %vm11826_vm0 }
 0x691   : > { %7002 = vmatprep.subr.msk.bf16.mxu1 %vm9277_vm13, %v7000_v52  ;;  %v8285_v52 = vunpack.i.h.bf16 %v10996_v34  ;;  %vm11828_vm14 = vmmov %vm11826_vm0  ;;  %v7033_v62 = vpack.c.bf16 %v5120_v35, %v5119_v20  ;;  %v8315_v28 = vunpack.i.h.bf16 %v11027_v51 }
 0x692   : > { %v5132_v60 = vsel %vm11828_vm14, %v8305_v10, %v8300_v61  ;;  %vm11834_vm2 = vmmov %vm11826_vm0 }
 0x693   : > { %v11039_v19 = vpop.permute.xlu1 %8307  ;;  %6322 = vmatmul.mubr.msk.f32.vlgmr.msra.gmra.mrb[4].mxu1 %vm4312_vm4, %v4820_v55  ;;  %vm11836_vm14 = vmmov %vm11826_vm0 }
 0x694   : > { %7005 = vmatpush1.bf16.msk.msra.mxu1 %vm9395_vm9, %v7003_v22  ;;  %v11048_v6 = vpop.permute.xlu0 %8322  ;;  %4898 = vmatprep.mubr.f32.mxu1 %v8751_v12  ;;  %v8310_v49 = vunpack.i.h.bf16 %v11039_v19  ;;  %v8309_v46 = vunpack.i.l.bf16 %v11039_v19 }
 0x695   : > { %7008 = vmatprep.subr.msk.bf16.mxu1 %vm9277_vm13, %v7006_v7 }
 0x697   : > { %v11057_v21 = vpop.permute.xlu1 %8317  ;;  %6323 = vmatmul.mubr.msk.f32.gmra.mrb[6].mxu1 %vm4312_vm4, %v4821_v3 }
 0x698   : > { %7011 = vmatpush1.bf16.msk.msra.mxu1 %vm9395_vm9, %v7009_v1  ;;  %v11066_v23 = vpop.permute.xlu0 %8337  ;;  %5062 = vmatprep.mubr.f32.mxu1 %v8751_v12  ;;  %v5131_v1 = vsel %vm11827_vm7, %v8304_v58, %v8299_v14  ;;  %v8319_v40 = vunpack.i.l.bf16 %v11057_v21  ;;  %vm11835_vm7 = vmmov %vm11826_vm0 }
 0x699   : > { %7014 = vmatprep.subr.msk.bf16.mxu1 %vm9277_vm13, %v7012_v15  ;;  %v4990_v15 = vld [vmem:[#allocation11 + $0x50] sm:$0xff]  ;;  %v7036_v38 = vpack.c.bf16 %v5132_v60, %v5131_v1 }
 0x69b   : > { %v11077_v48 = vpop.permute.xlu1 %8327 }
 0x69c   : > { %7017 = vmatpush1.bf16.msk.msra.mxu1 %vm9395_vm9, %v7015_v36  ;;  %v8348_v13 = vpop.permute.xlu0 %8347  ;;  %v8314_v36 = vunpack.i.l.bf16 %v11027_v51  ;;  %v8320_v51 = vunpack.i.h.bf16 %v11057_v21  ;;  %v5124_v21 = vsel %vm11834_vm2, %v8310_v49, %v8315_v28  ;;  %v8330_v20 = vunpack.i.h.bf16 %v11077_v48  ;;  %vm11842_vm2 = vmmov %vm11826_vm0 }
 0x69d   : > { %v8350_v50 = vunpack.i.h.bf16 %v8348_v13  ;;  %v8349_v53 = vunpack.i.l.bf16 %v8348_v13  ;;  %7020 = vmatprep.subr.msk.bf16.mxu1 %vm9277_vm13, %v7018_v43  ;;  %v4991_v13 = vld [vmem:[#allocation11 + $0x58] sm:$0xff] }
 0x69f   : > { %v4958_v17 = vsel %vm11821_vm8, %v8285_v52, %v8350_v50  ;;  %v4968_v8 = vsel %vm11822_vm1, %v8350_v50, %v8285_v52  ;;  %v4957_v34 = vsel %vm11823_vm15, %v8284_v27, %v8349_v53  ;;  %v4967_v55 = vsel %vm11824_vm10, %v8349_v53, %v8284_v27  ;;  %v11099_v22 = vpop.permute.xlu1 %8332  ;;  %vm11830_vm8 = vmmov %vm11826_vm0 }
 0x6a0   : > { %v7024_v7 = vpack.c.bf16 %v4968_v8, %v4967_v55  ;;  %v7027_v33 = vpack.c.bf16 %v4958_v17, %v4957_v34  ;;  %7023 = vmatpush1.bf16.msk.msra.mxu1 %vm9395_vm9, %v7021_v54  ;;  %v11105_v11 = vpop.permute.xlu0 %8352  ;;  %v5122_v19 = vsel %vm11830_vm8, %v8300_v61, %v8305_v10  ;;  %vm11831_vm1 = vmmov %vm11826_vm0  ;;  %v8324_v52 = vunpack.i.l.bf16 %v11048_v6 }
 0x6a1   : > { %v5133_v43 = vsel %vm11831_vm1, %v8314_v36, %v8309_v46  ;;  %vm11832_vm15 = vmmov %vm11826_vm0  ;;  %v8325_v50 = vunpack.i.h.bf16 %v11048_v6  ;;  %v8334_v34 = vunpack.i.l.bf16 %v11099_v22  ;;  %v8335_v61 = vunpack.i.h.bf16 %v11099_v22 }
 0x6a2   : > { %7026 = vmatprep.subr.msk.bf16.mxu1 %vm9277_vm13, %v7024_v7  ;;  %vm11829_vm13 = vmmov %vm11826_vm0  ;;  %v5134_v47 = vsel %vm11832_vm15, %v8315_v28, %v8310_v49  ;;  %v5125_v44 = vsel %vm11826_vm0, %v8319_v40, %v8324_v52  ;;  %v5135_v6 = vsel %vm11836_vm14, %v8324_v52, %v8319_v40  ;;  %v8339_v7 = vunpack.i.l.bf16 %v11066_v23 }
 0x6a3   : > { %v11115_v3 = vpop.permute.xlu1 %8342  ;;  %v5121_v16 = vsel %vm11829_vm13, %v8299_v14, %v8304_v58  ;;  %vm11833_vm10 = vmmov %vm11826_vm0  ;;  %v7042_v54 = vpack.c.bf16 %v5134_v47, %v5133_v43  ;;  %v5126_v17 = vsel %vm11835_vm7, %v8320_v51, %v8325_v50  ;;  %v8340_v58 = vunpack.i.h.bf16 %v11066_v23 }
 0x6a4   : > { %7029 = vmatpush1.bf16.msk.msra.mxu1 %vm9395_vm9, %v7027_v33  ;;  %v11125_v24 = vpop.permute.xlu0 %8362  ;;  %v7039_v27 = vpack.c.bf16 %v5122_v19, %v5121_v16  ;;  %v5123_v53 = vsel %vm11833_vm10, %v8309_v46, %v8314_v36  ;;  %vm11837_vm13 = vmmov %vm11826_vm0  ;;  %v7051_v10 = vpack.c.bf16 %v5126_v17, %v5125_v44  ;;  %vm11838_vm8 = vcmp.lt.s32.totalorder %v9162_v18, 112 }
 0x6a5   : > { %7032 = vmatprep.subr.msk.bf16.mxu1 %vm9430_vm5, %v7030_v0  ;;  %v5136_v8 = vsel %vm11837_vm13, %v8325_v50, %v8320_v51  ;;  %v7045_v14 = vpack.c.bf16 %v5124_v21, %v5123_v53  ;;  %v8329_v0 = vunpack.i.l.bf16 %v11077_v48  ;;  %v11183_v1 = vsel %vm11838_vm8, %v8334_v34, %v8339_v7  ;;  %vm11839_vm1 = vmmov %vm11838_vm8 }
 0x6a6   : > { %v7048_v33 = vpack.c.bf16 %v5136_v8, %v5135_v6  ;;  %v8355_v22 = vunpack.i.h.bf16 %v11105_v11  ;;  %v8354_v60 = vunpack.i.l.bf16 %v11105_v11  ;;  %v5299_v23 = vsel %vm11839_vm1, %v8339_v7, %v8334_v34  ;;  %vm11840_vm15 = vmmov %vm11839_vm1 }
 0x6a7   : > { %v11136_v25 = vpop.permute.xlu1 %8357  ;;  %6344 = vmatmul.mubr.msk.f32.vlgmr.msra.gmra.mrb[4].mxu1 %vm4312_vm4, %v4990_v15  ;;  %v5300_v46 = vsel %vm11840_vm15, %v8340_v58, %v8335_v61  ;;  %v8344_v28 = vunpack.i.l.bf16 %v11115_v3  ;;  %vm11841_vm10 = vmmov %vm11826_vm0  ;;  %vm11845_vm13 = vcmp.lt.s32.totalorder %v9162_v18, 16  ;;  %v8365_v7 = vunpack.i.h.bf16 %v11125_v24 }
 0x6a8   : > { %7035 = vmatpush1.bf16.msk.msra.mxu1 %vm9328_vm6, %v7033_v62  ;;  %v11146_v63 = vpop.permute.xlu0 %8372  ;;  %5068 = vmatprep.mubr.f32.mxu1 %v8751_v12  ;;  %v8345_v62 = vunpack.i.h.bf16 %v11115_v3  ;;  %vm11843_vm7 = vmmov %vm11826_vm0  ;;  %v7060_v50 = vpack.c.bf16 %v5300_v46, %v5299_v23  ;;  %v8360_v53 = vunpack.i.h.bf16 %v11136_v25  ;;  %v8359_v21 = vunpack.i.l.bf16 %v11136_v25 }
 0x6a9   : > { %7038 = vmatprep.subr.msk.bf16.mxu1 %vm9430_vm5, %v7036_v38  ;;  %vm11844_vm14 = vmmov %vm11839_vm1  ;;  %v8375_v23 = vunpack.i.h.bf16 %v11146_v63  ;;  %v8374_v46 = vunpack.i.l.bf16 %v11146_v63 }
 0x6aa   : > { %vm11846_vm8 = vmmov %vm11845_vm13 }
 0x6ab   : > { %v11159_v41 = vpop.permute.xlu1 %8367  ;;  %6345 = vmatmul.mubr.msk.f32.gmra.mrb[6].mxu1 %vm4312_vm4, %v4991_v13  ;;  %vm11847_vm1 = vmmov %vm11846_vm8 }
 0x6ac   : > { %7041 = vmatpush1.bf16.msk.msra.mxu1 %vm9328_vm6, %v7039_v27  ;;  %v8388_v55 = vpop.permute.xlu0 %8387  ;;  %5232 = vmatprep.mubr.f32.mxu1 %v8751_v12  ;;  %v5290_v27 = vsel %vm11844_vm14, %v8335_v61, %v8340_v58  ;;  %vm11848_vm15 = vmmov %vm11847_vm1  ;;  %v5160_v58 = vld [vmem:[#allocation11 + $0x60] sm:$0xff] }
 0x6ad   : > { %7044 = vmatprep.subr.msk.bf16.mxu1 %vm9430_vm5, %v7042_v54  ;;  %v8390_v11 = vunpack.i.h.bf16 %v8388_v55  ;;  %v8389_v36 = vunpack.i.l.bf16 %v8388_v55 }
 0x6af   : > { %v11178_v35 = vpop.permute.xlu1 %8377 }
 0x6b0   : > { %7047 = vmatpush1.bf16.msk.msra.mxu1 %vm9328_vm6, %v7045_v14  ;;  %v8398_v49 = vpop.permute.xlu0 %8397 }
 0x6b1   : > { %v8400_v15 = vunpack.i.h.bf16 %v8398_v49  ;;  %v8399_v48 = vunpack.i.l.bf16 %v8398_v49  ;;  %7050 = vmatprep.subr.msk.bf16.mxu1 %vm9430_vm5, %v7048_v33  ;;  %v8364_v33 = vunpack.i.l.bf16 %v11125_v24 }
 0x6b3   : > { %v5128_v16 = vsel %vm11841_vm10, %v8330_v20, %v8400_v15  ;;  %v5138_v19 = vsel %vm11842_vm2, %v8400_v15, %v8330_v20  ;;  %v5127_v38 = vsel %vm11826_vm0, %v8329_v0, %v8399_v48  ;;  %v5137_v40 = vsel %vm11843_vm7, %v8399_v48, %v8329_v0  ;;  %v8383_v43 = vpop.permute.xlu1 %8382  ;;  %vm11849_vm10 = vmmov %vm11844_vm14 }
 0x6b4   : > { %v7054_v47 = vpack.c.bf16 %v5138_v19, %v5137_v40  ;;  %v7057_v51 = vpack.c.bf16 %v5128_v16, %v5127_v38  ;;  %v8385_v13 = vunpack.i.h.bf16 %v8383_v43  ;;  %v8384_v52 = vunpack.i.l.bf16 %v8383_v43  ;;  %7053 = vmatpush1.bf16.msk.msra.mxu1 %vm9328_vm6, %v7051_v10  ;;  %v11207_v3 = vpop.permute.xlu0 %8402  ;;  %vm11850_vm2 = vmmov %vm11849_vm10 }
 0x6b5   : > { %v5301_v8 = vsel %vm11849_vm10, %v8354_v60, %v8344_v28  ;;  %v5302_v25 = vsel %vm11850_vm2, %v8355_v22, %v8345_v62  ;;  %vm11851_vm0 = vmmov %vm11850_vm2  ;;  %v8370_v20 = vunpack.i.h.bf16 %v11159_v41  ;;  %v8369_v0 = vunpack.i.l.bf16 %v11159_v41 }
 0x6b6   : > { %v4279_v54 = vsel %vm11845_vm13, %v8389_v36, %v8384_v52  ;;  %v4280_v44 = vsel %vm11846_vm8, %v8390_v11, %v8385_v13  ;;  %7056 = vmatprep.subr.msk.bf16.mxu1 %vm9430_vm5, %v7054_v47  ;;  %v4269_v17 = vsel %vm11847_vm1, %v8384_v52, %v8389_v36  ;;  %v4270_v6 = vsel %vm11848_vm15, %v8385_v13, %v8390_v11  ;;  %vm11852_vm5 = vmmov %vm11851_vm0  ;;  %v5161_v36 = vld [vmem:[#allocation11 + $0x68] sm:$0xff] }
 0x6b7   : > { %v6867_v34 = vpack.c.bf16 %v4280_v44, %v4279_v54  ;;  %v11227_v55 = vpop.permute.xlu1 %8392  ;;  %v6865_v61 = vpack.c.bf16 %v4270_v6, %v4269_v17  ;;  %v5291_v57 = vsel %vm11851_vm0, %v8344_v28, %v8354_v60  ;;  %v5292_v14 = vsel %vm11852_vm5, %v8345_v62, %v8355_v22  ;;  %vm11853_vm7 = vmmov %vm11851_vm0 }
 0x6b8   : > { %7059 = vmatpush1.bf16.msk.msra.mxu1 %vm9328_vm6, %v7057_v51  ;;  %v8413_v10 = vpop.permute.xlu0 %8412  ;;  %v7063_v60 = vpack.c.bf16 %v5290_v27, %v11183_v1  ;;  %v7065_v22 = vpack.c.bf16 %v5302_v25, %v5301_v8  ;;  %v5303_v49 = vsel %vm11853_vm7, %v8364_v33, %v8359_v21  ;;  %vm11854_vm14 = vmmov %vm11851_vm0  ;;  %v7068_v24 = vpack.c.bf16 %v5292_v14, %v5291_v57 }
 0x6b9   : > { %7062 = vmatprep.subr.msk.bf16.mxu1 %vm9466_vm12, %v7060_v50  ;;  %6866 = vmatprep.subr.bf16.mxu0 %v6865_v61  ;;  %v5304_v39 = vsel %vm11854_vm14, %v8365_v7, %v8360_v53  ;;  %vm11855_vm6 = vmmov %vm11851_vm0  ;;  %v8415_v1 = vunpack.i.h.bf16 %v8413_v10  ;;  %v8414_v48 = vunpack.i.l.bf16 %v8413_v10  ;;  %v8394_v54 = vunpack.i.l.bf16 %v11227_v55 }
 0x6ba   : > { %6869 = vmatpush1.bf16.msk.msra.mxu0 %vm9187_vm3, %v6867_v34  ;;  %v5293_v41 = vsel %vm11855_vm6, %v8359_v21, %v8364_v33  ;;  %vm11856_vm13 = vmmov %vm11851_vm0  ;;  %v7070_v19 = vpack.c.bf16 %v5304_v39, %v5303_v49  ;;  %v8380_v8 = vunpack.i.h.bf16 %v11178_v35  ;;  %v8379_v25 = vunpack.i.l.bf16 %v11178_v35 }
 0x6bb   : > { %v8408_v15 = vpop.permute.xlu1 %8407  ;;  %6366 = vmatmul.mubr.msk.f32.vlgmr.msra.gmra.mrb[4].mxu1 %vm4312_vm4, %v5160_v58  ;;  %v5294_v16 = vsel %vm11856_vm13, %v8360_v53, %v8365_v7  ;;  %vm11857_vm8 = vmmov %vm11851_vm0  ;;  %v8405_v34 = vunpack.i.h.bf16 %v11207_v3  ;;  %v8404_v61 = vunpack.i.l.bf16 %v11207_v3  ;;  %v8395_v57 = vunpack.i.h.bf16 %v11227_v55 }
 0x6bc   : > { %v8410_v62 = vunpack.i.h.bf16 %v8408_v15  ;;  %v8409_v28 = vunpack.i.l.bf16 %v8408_v15  ;;  %7064 = vmatpush1.bf16.msra.mxu1 %v7063_v60  ;;  %v11253_v11 = vpop.permute.xlu0 %8422  ;;  %5238 = vmatprep.mubr.f32.mxu1 %v8751_v12  ;;  %v5295_v63 = vsel %vm11857_vm8, %v8369_v0, %v8374_v46  ;;  %vm11858_vm1 = vmmov %vm11851_vm0  ;;  %v7073_v44 = vpack.c.bf16 %v5294_v16, %v5293_v41 }
 0x6bd   : > { %v5296_v38 = vsel %vm11858_vm1, %v8370_v20, %v8375_v23  ;;  %7067 = vmatprep.subr.msk.bf16.mxu1 %vm9466_vm12, %v7065_v22  ;;  %vm11859_vm10 = vmmov %vm11848_vm15  ;;  %vm11864_vm14 = vcmp.lt.s32.totalorder %v9162_v18, 111  ;;  %v8424_v16 = vunpack.i.l.bf16 %v11253_v11 }
 0x6be   : > { %v4281_v40 = vsel %vm11848_vm15, %v8414_v48, %v8409_v28  ;;  %v4282_v43 = vsel %vm11859_vm10, %v8415_v1, %v8410_v62  ;;  %vm11860_vm2 = vmmov %vm11859_vm10  ;;  %v7078_v6 = vpack.c.bf16 %v5296_v38, %v5295_v63 }
 0x6bf   : > { %v4271_v47 = vsel %vm11860_vm2, %v8409_v28, %v8414_v48  ;;  %vm11861_vm0 = vmmov %vm11860_vm2  ;;  %v6872_v27 = vpack.c.bf16 %v4282_v43, %v4281_v40  ;;  %v11276_v50 = vpop.permute.xlu1 %8417  ;;  %6367 = vmatmul.mubr.msk.f32.gmra.mrb[6].mxu1 %vm4312_vm4, %v5161_v36  ;;  %v8425_v48 = vunpack.i.h.bf16 %v11253_v11 }
 0x6c0   : > { %v4272_v51 = vsel %vm11861_vm0, %v8410_v62, %v8415_v1  ;;  %vm11862_vm5 = vmmov %vm11858_vm1  ;;  %7069 = vmatpush1.bf16.msra.mxu1 %v7068_v24  ;;  %v8433_v21 = vpop.permute.xlu0 %8432  ;;  %5402 = vmatprep.mubr.f32.mxu1 %v8751_v12  ;;  %v8420_v60 = vunpack.i.h.bf16 %v11276_v50  ;;  %v8419_v24 = vunpack.i.l.bf16 %v11276_v50 }
 0x6c1   : > { %v5305_v13 = vsel %vm11862_vm5, %v8374_v46, %v8369_v0  ;;  %vm11863_vm7 = vmmov %vm11858_vm1  ;;  %v6870_v53 = vpack.c.bf16 %v4272_v51, %v4271_v47  ;;  %7072 = vmatprep.subr.msk.bf16.mxu1 %vm9466_vm12, %v7070_v19  ;;  %v8435_v7 = vunpack.i.h.bf16 %v8433_v21  ;;  %v8434_v33 = vunpack.i.l.bf16 %v8433_v21 }
 0x6c2   : > { %v5306_v52 = vsel %vm11863_vm7, %v8375_v23, %v8370_v20  ;;  %v5469_v0 = vsel %vm11864_vm14, %v8404_v61, %v8394_v54  ;;  %vm11865_vm6 = vmmov %vm11861_vm0 }
 0x6c3   : > { %6871 = vmatprep.subr.bf16.mxu0 %v6870_v53  ;;  %v7075_v17 = vpack.c.bf16 %v5306_v52, %v5305_v13  ;;  %v8428_v14 = vpop.permute.xlu1 %8427  ;;  %vm11866_vm13 = vmmov %vm11861_vm0 }
 0x6c4   : > { %6874 = vmatpush1.bf16.msk.msra.mxu0 %vm9187_vm3, %v6872_v27  ;;  %v8430_v10 = vunpack.i.h.bf16 %v8428_v14  ;;  %v8429_v58 = vunpack.i.l.bf16 %v8428_v14  ;;  %7074 = vmatpush1.bf16.msra.mxu1 %v7073_v44  ;;  %v8443_v20 = vpop.permute.xlu0 %8442  ;;  %vm11867_vm8 = vmmov %vm11861_vm0 }
 0x6c5   : > { %v8445_v22 = vunpack.i.h.bf16 %v8443_v20  ;;  %v8444_v35 = vunpack.i.l.bf16 %v8443_v20  ;;  %7077 = vmatprep.subr.msk.bf16.mxu1 %vm9466_vm12, %v7075_v17  ;;  %vm11868_vm1 = vmmov %vm11861_vm0 }
 0x6c6   : > { %v4283_v3 = vsel %vm11865_vm6, %v8434_v33, %v8429_v58  ;;  %v4284_v55 = vsel %vm11866_vm13, %v8435_v7, %v8430_v10  ;;  %v4273_v49 = vsel %vm11867_vm8, %v8429_v58, %v8434_v33  ;;  %v4274_v39 = vsel %vm11868_vm1, %v8430_v10, %v8435_v7  ;;  %vm11869_vm15 = vmmov %vm11862_vm5 }
 0x6c7   : > { %v5298_v41 = vsel %vm11869_vm15, %v8380_v8, %v8445_v22  ;;  %vm11870_vm10 = vmmov %vm11862_vm5  ;;  %v8438_v15 = vpop.permute.xlu1 %8437  ;;  %v6877_v62 = vpack.c.bf16 %v4284_v55, %v4283_v3  ;;  %v6875_v38 = vpack.c.bf16 %v4274_v39, %v4273_v49  ;;  %v5331_v39 = vld [vmem:[#allocation11 + $0x78] sm:$0xff] }
 0x6c8   : > { %v5308_v23 = vsel %vm11870_vm10, %v8445_v22, %v8380_v8  ;;  %vm11871_vm2 = vmmov %vm11862_vm5  ;;  %7079 = vmatpush1.bf16.msra.mxu1 %v7078_v6  ;;  %v8448_v36 = vpop.permute.xlu0 %8447  ;;  %v8440_v27 = vunpack.i.h.bf16 %v8438_v15  ;;  %v8439_v11 = vunpack.i.l.bf16 %v8438_v15  ;;  %v5330_v8 = vld [vmem:[#allocation11 + $0x70] sm:$0xff] }
 0x6c9   : > { %v5297_v46 = vsel %vm11871_vm2, %v8379_v25, %v8444_v35  ;;  %vm11872_vm0 = vmmov %vm11864_vm14  ;;  %6876 = vmatprep.subr.bf16.mxu0 %v6875_v38  ;;  %v8449_v44 = vunpack.i.l.bf16 %v8448_v36 }
 0x6ca   : > { %v5470_v1 = vsel %vm11872_vm0, %v8405_v34, %v8395_v57  ;;  %vm11873_vm5 = vmmov %vm11871_vm2  ;;  %v7083_v63 = vpack.c.bf16 %v5298_v41, %v5297_v46  ;;  %6879 = vmatpush1.bf16.msk.msra.mxu0 %vm9187_vm3, %v6877_v62 }
 0x6cb   : > { %v5307_v28 = vsel %vm11873_vm5, %v8444_v35, %v8379_v25  ;;  %vm11874_vm7 = vmmov %vm11872_vm0  ;;  %v7085_v47 = vpack.c.bf16 %v5470_v1, %v5469_v0  ;;  %v8453_v52 = vpop.permute.xlu1 %8452 }
 0x6cc   : > { %v7080_v19 = vpack.c.bf16 %v5308_v23, %v5307_v28  ;;  %v5459_v40 = vsel %vm11874_vm7, %v8394_v54, %v8404_v61  ;;  %vm11875_vm14 = vmmov %vm11872_vm0  ;;  %v8455_v50 = vunpack.i.h.bf16 %v8453_v52  ;;  %v8454_v53 = vunpack.i.l.bf16 %v8453_v52  ;;  %v8458_v21 = vpop.permute.xlu0 %8457 }
 0x6cd   : > { %v5460_v43 = vsel %vm11875_vm14, %v8395_v57, %v8405_v34  ;;  %vm11876_vm6 = vmmov %vm11872_vm0  ;;  %v8450_v54 = vunpack.i.h.bf16 %v8448_v36  ;;  %v8460_v17 = vunpack.i.h.bf16 %v8458_v21  ;;  %v8459_v6 = vunpack.i.l.bf16 %v8458_v21 }
 0x6ce   : > { %v5471_v51 = vsel %vm11876_vm6, %v8424_v16, %v8419_v24  ;;  %vm11877_vm13 = vmmov %vm11872_vm0  ;;  %7082 = vmatprep.subr.msk.bf16.mxu1 %vm9466_vm12, %v7080_v19  ;;  %v7088_v25 = vpack.c.bf16 %v5460_v43, %v5459_v40  ;;  %vm11880_vm12 = vcmp.lt.s32.totalorder %v9162_v18, 16  ;;  %v4311_v18 = vld [vmem:[#allocation11 + $0x18] sm:$0xff] }
 0x6cf   : > { %v5472_v13 = vsel %vm11877_vm13, %v8425_v48, %v8420_v60  ;;  %7084 = vmatpush1.bf16.msra.mxu1 %v7083_v63  ;;  %vm11878_vm8 = vmmov %vm11872_vm0  ;;  %v4286_v37 = vsel %vm11880_vm12, %v8460_v17, %v8455_v50  ;;  %v8463_v7 = vpop.permute.xlu1 %8462  ;;  %v5474_v35 = vsel %vm11872_vm0, %v8450_v54, %v8440_v27 }
 0x6d0   : > { %v5461_v34 = vsel %vm11878_vm8, %v8419_v24, %v8424_v16  ;;  %vm11879_vm1 = vmmov %vm11872_vm0  ;;  %v7091_v57 = vpack.c.bf16 %v5472_v13, %v5471_v51  ;;  %7087 = vmatprep.subr.msk.bf16.mxu1 %vm9501_vm11, %v7085_v47  ;;  %v8465_v20 = vunpack.i.h.bf16 %v8463_v7  ;;  %v8464_v0 = vunpack.i.l.bf16 %v8463_v7 }
 0x6d1   : > { %v5462_v61 = vsel %vm11879_vm1, %v8420_v60, %v8425_v48  ;;  %vm11881_vm15 = vmmov %vm11880_vm12  ;;  %v8468_v60 = vpop.permute.xlu0 %8467 }
 0x6d2   : > { %v4285_v14 = vsel %vm11881_vm15, %v8459_v6, %v8454_v53  ;;  %vm11882_vm10 = vmmov %vm11880_vm12  ;;  %6378 = vmatmul.mubr.msk.f32.vlgmr.msra.gmra.mrb[4].mxu1 %vm4312_vm4, %v5330_v8  ;;  %v8470_v55 = vunpack.i.h.bf16 %v8468_v60  ;;  %v8469_v49 = vunpack.i.l.bf16 %v8468_v60  ;;  %v7094_v24 = vpack.c.bf16 %v5462_v61, %v5461_v34 }
 0x6d3   : > { %v4275_v33 = vsel %vm11882_vm10, %v8454_v53, %v8459_v6  ;;  %vm11883_vm2 = vmmov %vm11882_vm10  ;;  %v6882_v58 = vpack.c.bf16 %v4286_v37, %v4285_v14  ;;  %7090 = vmatpush1.bf16.msk.msra.mxu1 %vm9395_vm9, %v7088_v25  ;;  %5408 = vmatprep.mubr.f32.mxu1 %v8751_v12  ;;  %v8473_v1 = vpop.permute.xlu1 %8472 }
 0x6d4   : > { %v4276_v10 = vsel %vm11883_vm2, %v8455_v50, %v8460_v17  ;;  %vm11884_vm5 = vmmov %vm11872_vm0  ;;  %7093 = vmatprep.subr.msk.bf16.mxu1 %vm9501_vm11, %v7091_v57  ;;  %v8475_v62 = vunpack.i.h.bf16 %v8473_v1  ;;  %v8474_v28 = vunpack.i.l.bf16 %v8473_v1  ;;  %v4310_v57 = vld [vmem:[#allocation11 + $0x10] sm:$0xff] }
 0x6d5   : > { %v6880_v22 = vpack.c.bf16 %v4276_v10, %v4275_v33  ;;  %v5473_v3 = vsel %vm11884_vm5, %v8449_v44, %v8439_v11  ;;  %vm11885_vm7 = vmmov %vm11872_vm0  ;;  %v8483_v36 = vpop.permute.xlu0 %8482 }
 0x6d6   : > { %v5464_v41 = vsel %vm11885_vm7, %v8440_v27, %v8450_v54  ;;  %vm11886_vm14 = vmmov %vm11872_vm0  ;;  %v7097_v48 = vpack.c.bf16 %v5474_v35, %v5473_v3  ;;  %6379 = vmatmul.mubr.msk.f32.gmra.mrb[6].mxu1 %vm4312_vm4, %v5331_v39  ;;  %v8485_v16 = vunpack.i.h.bf16 %v8483_v36  ;;  %v8484_v19 = vunpack.i.l.bf16 %v8483_v36  ;;  %v8515_v36 = vld [vmem:[%s9036_s25] sm:$0xff] }
 0x6d7   : > { %6881 = vmatprep.subr.bf16.mxu0 %v6880_v22  ;;  %v5463_v23 = vsel %vm11886_vm14, %v8439_v11, %v8449_v44  ;;  %vm11887_vm6 = vmmov %vm11872_vm0  ;;  %7096 = vmatpush1.bf16.msk.msra.mxu1 %vm9395_vm9, %v7094_v24  ;;  %v8478_v13 = vpop.permute.xlu1 %8477  ;;  %v5614_v24 = vld [vmem:[%s11510_s6] sm:$0xff] }
 0x6d8   : > { %v5476_v46 = vsel %vm11887_vm6, %v8470_v55, %v8465_v20  ;;  %vm11888_vm13 = vmmov %vm11872_vm0  ;;  %6884 = vmatpush1.bf16.msk.msra.mxu0 %vm9187_vm3, %v6882_v58  ;;  %5572 = vmatprep.mubr.f32.mxu1 %v8751_v12  ;;  %v7100_v63 = vpack.c.bf16 %v5464_v41, %v5463_v23  ;;  %v4278_v27 = vsel %vm11883_vm2, %v8475_v62, %v8485_v16  ;;  %v8480_v50 = vunpack.i.h.bf16 %v8478_v13  ;;  %v5615_v41 = vld [vmem:[%s11510_s6 + $0x8] sm:$0xff]  ;;  %v5616_v23 = vld [vmem:[%s11510_s6 + $0x10] sm:$0xff] }
 0x6d9   : > { %v5475_v15 = vsel %vm11888_vm13, %v8469_v49, %v8464_v0  ;;  %vm11889_vm8 = vmmov %vm11872_vm0  ;;  %7099 = vmatprep.subr.msk.bf16.mxu1 %vm9501_vm11, %v7097_v48  ;;  %v8479_v53 = vunpack.i.l.bf16 %v8478_v13  ;;  %v8488_v21 = vpop.permute.xlu0 %8487 }
 0x6da   : > { %v5466_v38 = vsel %vm11889_vm8, %v8465_v20, %v8470_v55  ;;  %vm11890_vm1 = vmmov %vm11872_vm0  ;;  %v7103_v43 = vpack.c.bf16 %v5476_v46, %v5475_v15  ;;  %v8490_v44 = vunpack.i.h.bf16 %v8488_v21  ;;  %v8489_v17 = vunpack.i.l.bf16 %v8488_v21  ;;  %v5617_v46 = vld [vmem:[%s11510_s6 + $0x18] sm:$0xff] }
 0x6db   : > { %v5465_v40 = vsel %vm11890_vm1, %v8464_v0, %v8469_v49  ;;  %vm11891_vm12 = vmmov %vm11883_vm2  ;;  %7102 = vmatpush1.bf16.msk.msra.mxu1 %vm9395_vm9, %v7100_v63  ;;  %v8516_v63 = vld [vmem:[%s9036_s25 + $0x8] sm:$0xff] }
 0x6dc   : > { %v4288_v47 = vsel %vm11891_vm12, %v8485_v16, %v8475_v62  ;;  %vm11892_vm15 = vmmov %vm11883_vm2  ;;  %v7106_v6 = vpack.c.bf16 %v5466_v38, %v5465_v40  ;;  %7105 = vmatprep.subr.msk.bf16.mxu1 %vm9501_vm11, %v7103_v43  ;;  %v5468_v8 = vsel %vm11872_vm0, %v8480_v50, %v8490_v44 }
 0x6dd   : > { %v4287_v51 = vsel %vm11892_vm15, %v8484_v19, %v8474_v28  ;;  %vm11893_vm10 = vmmov %vm11883_vm2 }
 0x6de   : > { %v4277_v52 = vsel %vm11893_vm10, %v8474_v28, %v8484_v19  ;;  %v6887_v11 = vpack.c.bf16 %v4288_v47, %v4287_v51  ;;  %vm11894_vm5 = vmmov %vm11872_vm0  ;;  %v8517_v51 = vld [vmem:[%s9036_s25 + $0x10] sm:$0xff] }
 0x6df   : > { %v6885_v54 = vpack.c.bf16 %v4278_v27, %v4277_v52  ;;  %v5478_v25 = vsel %vm11894_vm5, %v8490_v44, %v8480_v50  ;;  %vm11895_vm7 = vmmov %vm11872_vm0  ;;  %7108 = vmatpush1.bf16.msk.msra.mxu1 %vm9395_vm9, %v7106_v6  ;;  %v8518_v27 = vld [vmem:[%s9036_s25 + $0x18] sm:$0xff]  ;;  %v8519_v44 = vld [vmem:[%s9036_s25 + $0x20] sm:$0xff] }
 0x6e0   : > { %v5467_v34 = vsel %vm11895_vm7, %v8479_v53, %v8489_v17  ;;  %vm11896_vm14 = vmmov %vm11872_vm0 }
 0x6e1   : > { %6886 = vmatprep.subr.bf16.mxu0 %v6885_v54  ;;  %v5477_v61 = vsel %vm11896_vm14, %v8489_v17, %v8479_v53  ;;  %v7112_v14 = vpack.c.bf16 %v5468_v8, %v5467_v34  ;;  %v8520_v8 = vld [vmem:[%s9036_s25 + $0x28] sm:$0xff] }
 0x6e2   : > { %6889 = vmatpush1.bf16.msk.msra.mxu0 %vm9187_vm3, %v6887_v11  ;;  %v7109_v37 = vpack.c.bf16 %v5478_v25, %v5477_v61  ;;  %vm5666_vm3 = vcmask 785408  }
 0x6e3   : > { %7116 = vmatprep.subr.bf16.mxu0 %v9345_v45  ;;  %v5501_v45 = vld [vmem:[#allocation11 + $0x88] sm:$0xff] }
 0x6e4   : > { %7111 = vmatprep.subr.msk.bf16.mxu1 %vm9501_vm11, %v7109_v37 }
 0x6e5   : > { %6254 = vmatmul.mubr.msk.f32.vlgmr.msra.gmra.mrb[8].mxu0 %vm4312_vm4, %v4310_v57  ;;  %7114 = vmatpush1.bf16.msk.msra.mxu1 %vm9395_vm9, %v7112_v14  ;;  %v8521_v14 = vld [vmem:[%s9036_s25 + $0x30] sm:$0xff] }
 0x6e6   : > { %7118 = vmatpush1.bf16.msra.mxu0 %v9356_v9  ;;  %4389 = vmatprep.mubr.f32.mxu0 %v8751_v12 }
 0x6e7   : > { %7120 = vmatprep.subr.bf16.mxu0 %v9365_v59 }
 0x6e8   : > { %6400 = vmatmul.mubr.msk.f32.vlgmr.msra.gmra.mrb[4].mxu1 %vm4312_vm4, %v5500_v42  ;;  %v5595_v10 = vpop.permute.xlu1 %5594  ;;  %v8522_v42 = vld [vmem:[%s9036_s25 + $0x38] sm:$0xff] }
 0x6e9   : > { %6255 = vmatmul.mubr.msk.f32.gmra.mrb[10].mxu0 %vm4312_vm4, %v4311_v18  ;;  %5578 = vmatprep.mubr.f32.mxu1 %v8751_v12 }
 0x6ea   : > { %7122 = vmatpush1.bf16.msra.mxu0 %v9370_v2  ;;  %5743 = vmatprep.mubr.f32.mxu0 %v8751_v12 }
 0x6eb   : > { %7124 = vmatprep.subr.bf16.mxu0 %v9563_v4 }
 0x6ec   : > { %6401 = vmatmul.mubr.msk.f32.gmra.mrb[6].mxu1 %vm4312_vm4, %v5501_v45  ;;  %v5649_v15 = vpop.permute.xlu1 %5648 }
 0x6ee   : > { %7126 = vmatpush1.bf16.msra.mxu0 %v9565_v5 }
 0x6ef   : > { %7128 = vmatprep.subr.bf16.mxu0 %v10015_v30  ;;  %v5600_v30 = vpop.permute.xlu0 %5599 }
 0x6f0   : > { %v5659_v52 = vpop.permute.xlu1 %5658 }
 0x6f2   : > { %7130 = vmatpush1.bf16.msra.mxu0 %v10017_v32 }
 0x6f3   : > { %7132 = vmatprep.subr.bf16.mxu0 %v10685_v26  ;;  %v5654_v19 = vpop.permute.xlu0 %5653 }
 0x6f6   : > { %7134 = vmatpush1.bf16.msra.mxu0 %v10687_v29 }
 0x6f7   : > { %v5664_v6 = vpop.permute.xlu0 %5663 }
 0x7b8   : > { %v4385_v9 = vpop.f32.mrb[8].mxu0 }
 0x7b9   : > { %v4387_v59 = vpop.f32.mrb[9].mxu0 }
 0x7bb   : > { %v5574_v56 = vpop.f32.mrb[4].mxu1 }
 0x7bc   : > { %v4391_v2 = vpop.f32.mrb[10].mxu0  ;;  %v7139_v4 = vadd.f32 %v5574_v56, %v4385_v9  ;;  %v5576_v7 = vpop.f32.mrb[5].mxu1 }
 0x7bd   : > { %v4393_v31 = vpop.f32.mrb[11].mxu0  ;;  %v7140_v33 = vadd.f32 %v5576_v7, %v4387_v59 }
 0x7be   : > { %v5602_v58 = vadd.f32 %v7139_v4, %v5595_v10 }
 0x7bf   : > { %v5580_v5 = vpop.f32.mrb[6].mxu1  ;;  %v5603_v60 = vadd.f32 %v7140_v33, %v5595_v10 }
 0x7c0   : > { %v7141_v20 = vadd.f32 %v5580_v5, %v4391_v2  ;;  %v5582_v0 = vpop.f32.mrb[7].mxu1  ;;  %v5606_v35 = vmax.f32 %v5602_v58, 0.0 }
 0x7c1   : > { %v7142_v32 = vadd.f32 %v5582_v0, %v4393_v31  ;;  %v5607_v3 = vmax.f32 %v5603_v60, 0.0 }
 0x7c2   : > { %v5604_v22 = vadd.f32 %v7141_v20, %v5600_v30 }
 0x7c3   : > { %v5605_v26 = vadd.f32 %v7142_v32, %v5600_v30 }
 0x7c4   : > { %v5608_v29 = vmax.f32 %v5604_v22, 0.0 }
 0x7c5   : > { %v5609_v55 = vmax.f32 %v5605_v26, 0.0 }
 0x7c6   : > { %v7137_v49 = vpack.c.bf16 %v5608_v29, %v5606_v35 }
 0x7c7   : > { %v7135_v39 = vpack.c.bf16 %v5609_v55, %v5607_v3 }
 0x7c9   : > { %7136 = vmatprep.subr.bf16.mxu0 %v7135_v39 }
 0x7ca   : > { %7138 = vmatpush1.bf16.msra.mxu0 %v7137_v49 }
 0x7cd   : > { %6404 = vmatmul.mubr.msk.f32.vlgmr.msra.gmra.mrb[12].mxu0 %vm5666_vm3, %v5614_v24 }
 0x7ce   : > { %5749 = vmatprep.mubr.f32.mxu0 %v8751_v12 }
 0x7d1   : > { %6405 = vmatmul.mubr.msk.f32.gmra.mrb[14].mxu0 %vm5666_vm3, %v5615_v41 }
 0x7d2   : > { %5755 = vmatprep.mubr.f32.mxu0 %v8751_v12 }
 0x7d5   : > { %6406 = vmatmul.mubr.msk.f32.gmra.mrb[16].mxu0 %vm5666_vm3, %v5616_v23 }
 0x7d6   : > { %5761 = vmatprep.mubr.f32.mxu0 %v8751_v12 }
 0x7d9   : > { %6407 = vmatmul.mubr.msk.f32.gmra.mrb[18].mxu0 %vm5666_vm3, %v5617_v46 }
 0x8a0   : > { %v5745_v1 = vpop.f32.mrb[12].mxu0 }
 0x8a1   : > { %v5746_v48 = vadd.f32 %v5745_v1, %v5649_v15  ;;  %v5747_v62 = vpop.f32.mrb[13].mxu0 }
 0x8a2   : > { %v5748_v28 = vadd.f32 %v5747_v62, %v5649_v15 }
 0x8a3   : > { %v5776_v16 = vadd.f32 %v8515_v36, %v5746_v48 }
 0x8a4   : > { %v5777_v38 = vadd.f32 %v8516_v63, %v5748_v28  ;;  %v5751_v40 = vpop.f32.mrb[14].mxu0 }
 0x8a5   : > { %5784 = vst [vmem:[%s11436_s12] sm:$0xff] %v5776_v16  ;;  %v5752_v12 = vadd.f32 %v5751_v40, %v5654_v19  ;;  %v5753_v43 = vpop.f32.mrb[15].mxu0 }
 0x8a6   : > { %5785 = vst [vmem:[%s11436_s12 + $0x8] sm:$0xff] %v5777_v38  ;;  %v5754_v47 = vadd.f32 %v5753_v43, %v5654_v19 }
 0x8a7   : > { %v5778_v13 = vadd.f32 %v8517_v51, %v5752_v12 }
 0x8a8   : > { %v5779_v11 = vadd.f32 %v8518_v27, %v5754_v47  ;;  %v5757_v50 = vpop.f32.mrb[16].mxu0 }
 0x8a9   : > { %5786 = vst [vmem:[%s11436_s12 + $0x10] sm:$0xff] %v5778_v13  ;;  %v5758_v53 = vadd.f32 %v5757_v50, %v5659_v52  ;;  %v5759_v21 = vpop.f32.mrb[17].mxu0 }
 0x8aa   : > { %5787 = vst [vmem:[%s11436_s12 + $0x18] sm:$0xff] %v5779_v11  ;;  %v5760_v54 = vadd.f32 %v5759_v21, %v5659_v52 }
 0x8ab   : > { %v5780_v17 = vadd.f32 %v8519_v44, %v5758_v53 }
 0x8ac   : > { %v5781_v25 = vadd.f32 %v8520_v8, %v5760_v54  ;;  %v5763_v34 = vpop.f32.mrb[18].mxu0 }
 0x8ad   : > { %5788 = vst [vmem:[%s11436_s12 + $0x20] sm:$0xff] %v5780_v17  ;;  %v5764_v61 = vadd.f32 %v5763_v34, %v5664_v6  ;;  %v5765_v57 = vpop.f32.mrb[19].mxu0 }
 0x8ae   : > { %5789 = vst [vmem:[%s11436_s12 + $0x28] sm:$0xff] %v5781_v25  ;;  %v5766_v37 = vadd.f32 %v5765_v57, %v5664_v6 }
 0x8af   : > { %v5782_v18 = vadd.f32 %v8521_v14, %v5764_v61 }
 0x8b0   : > { %v5783_v45 = vadd.f32 %v8522_v42, %v5766_v37 }
 0x8b1   : > { %5790 = vst [vmem:[%s11436_s12 + $0x30] sm:$0xff] %v5782_v18 }
 0x8b2   : > { %5791 = vst [vmem:[%s11436_s12 + $0x38] sm:$0xff] %v5783_v45 }
 0x8b3   : > { %8678 = shalt.err (!%p8675_p13)
}
 0x8b4   : > { %s8679_s25 = scalar_lea.hbm %s11457_s15, 1024  ;;  %s8683_s12 = scalar_lea.hbm %s11512_s8, 2048 }
 0x8b5   : > { %p8680_p9 = scmp.ne.s32.totalorder %s11457_s15, %s8679_s25  ;;  %p8684_p4 = scmp.lt.u32.totalorder %s11457_s15, %s11512_s8 }
 0x8b6   : > { %p8685_p8 = scmp.lt.u32.totalorder %s8683_s12, %s8679_s25  ;;  %p8687_p3 = scmp.lt.u32.totalorder %s8679_s25, %s11457_s15 }
 0x8b7   : > { %p8681_p0 = pnand %p8680_p9, %p8978_p10 }
 0x8b8   : > { %p8686_p6 = por %p8685_p8, %p8684_p4 }
 0x8b9   : > { %p8682_p11 = pneg %p8681_p0 }
 0x8ba   : > { %p8688_p5 = por %p8687_p3, %p8686_p6 }
 0x8bc   : > { %p8689_p7 = pnand %p8688_p5, %p8682_p11 }
 0x8be   : > { %8692 = shalt.err (!%p8689_p7)
}
 0x8bf   : > { %s8761_s14 = smov 256  }
 0x8c0   : > { %7285 = dma.vmem_to_hbm [thread:$0]  (%p8978_p10), %s11450_s19, 1024, %s11457_s15, %s5793_s20, %s8761_s14, %s8761_s14, %s8750_s11  }
 0x8c1 PF: > { %s11897_s9 = sld [smem:[#allocation17_spill]]  ;;  %s11898_s18 = sld [smem:[#allocation18_spill]] }
 0x8c2   : > { %p11900_p1 = scmp.ge.s32.totalorder %s8739_s30, 2 }
 0x8c7   : > { %s5821_s22 = sand.u32 1, %s11897_s9   ;;  %p11899_p12 = scmp.ne.s32.totalorder %s11898_s18, 0 }
 0x8c8   : > { %s5822_s17 = scalar_lea.sflag [#allocation5], %s5821_s22 }
 0x8c9   : > { %p7305_p2 = pnand %p11900_p1, %p11899_p12 }
 0x8cb   : > { %8722 = dma.done.wait (!%p7305_p2), %s5822_s17, 1024  }
 0x8cc   : > { %8724 = vsyncadd (!%p7305_p2), %s5822_s17, 4294966272  ;;  %p23_p13 = scmp.ge.s32.totalorder %s8968_s26, 4   ;;  %s11901_s27 = smov %s8731_s28 }
 0x8cd   : > { %s11902_s28 = smov %s8735_s29  ;;  %s11903_s29 = smov %s8984_s24 }
 0x8ce   : > { %s11904_s30 = smov %s8968_s26  ;;  %25 = sbr.rel (!%p23_p13) target bundleno = 7 (0x7), region = 148 }
 0x8d5   :  { %5827 = vsyncpa [#allocation4], 1 }
 0x8d6   :  { %5829 = vsyncpa [#allocation4 + $0x1], 1 }
 0x8d7   :  { %5830 = vsyncpa [#allocation7], 1 }
 0x8d8   :  { %5831 = vsyncpa [#allocation10], 1 }
 0x8d9   :  { %5832 = vsyncpa [#allocation5], 1 }
 0x8da   :  { %5834 = vsyncpa [#allocation5 + $0x1], 1 }

</bundles_post_ra>
